<compile_context>
chip_gen: v5e
topology: v5e:2x2
jax: 0.10.0
libtpu: 0.0.40
codegen_flags: <defaults>
</compile_context>

<pallas_src>
import math

import numpy as np
import jax
import jax.numpy as jnp
from jax.experimental import pallas as pl
from jax.experimental.pallas import tpu as pltpu

# Additive key-padding value (-inf surrogate).  Fully padded query rows produce
# a uniform softmax instead of PyTorch's NaN — documented behavioral divergence.
NEG_INF = -1e30


def _full_spec(shape):
    nd = len(shape)
    return pl.BlockSpec(shape, lambda i, _nd=nd: (0,) * _nd)


# ----------------------- fused whole-forward kernel -----------------------

def _make_dual_stb_kernel(*, B, S, d, ds, H, n_sp, n_st,
                          has_spatial, has_spmask, eps=1e-5):
    del ds  # spatial width is taken from the ref shapes

    def _layernorm(z, w, b):
        mu = jnp.mean(z, axis=-1, keepdims=True)
        zc = z - mu
        var = jnp.mean(zc * zc, axis=-1, keepdims=True)
        return zc * jax.lax.rsqrt(var + eps) * w + b

    def _encoder_layer(x2d, w, *, heads, kp3, extra_heads, ret_attn, exact_softmax):
        """Post-norm nn.TransformerEncoderLayer forward on a (B*S, dm) slab."""
        (wqkv, bqkv, wo, bo, w1, b1, w2, b2, l1w, l1b, l2w, l2b) = w
        dm = x2d.shape[1]
        Dh = dm // heads
        # Fused QKV projection; 1/sqrt(Dh) already folded into the Q columns.
        qkv = jnp.dot(x2d, wqkv, preferred_element_type=jnp.float32) + bqkv
        head_out = []
        attn_sum = None
        for h in range(heads):                       # per-head, batched over B
            c0 = h * Dh
            q = qkv[:, c0:c0 + Dh].reshape(B, S, Dh)
            k = qkv[:, dm + c0:dm + c0 + Dh].reshape(B, S, Dh)
            v = qkv[:, 2 * dm + c0:2 * dm + c0 + Dh].reshape(B, S, Dh)
            s = jnp.einsum('bqd,bkd->bqk', q, k,
                           preferred_element_type=jnp.float32)
            s = s + kp3                              # hoisted key-padding bcast
            if extra_heads is not None:
                s = s + extra_heads[h]               # quirk-gathered extra mask
            s = s - jnp.max(s, axis=-1, keepdims=True)
            p = jnp.exp(s)
            den = jnp.sum(p, axis=-1, keepdims=True)
            if exact_softmax:
                p = p / den                          # exact: probs reused as mask
            else:
                p = p * pl.reciprocal(den, approx=True)   # EUP slot, ~free
            head_out.append(jnp.einsum('bqk,bkd->bqd', p, v,
                                       preferred_element_type=jnp.float32))
            if ret_attn:
                attn_sum = p if attn_sum is None else attn_sum + p
        ao = head_out[0] if heads == 1 else jnp.concatenate(head_out, axis=-1)
        ao = ao.reshape(B * S, dm)
        z = x2d + jnp.dot(ao, wo, preferred_element_type=jnp.float32) + bo
        x1 = _layernorm(z, l1w, l1b)
        h1 = jnp.maximum(jnp.dot(x1, w1, preferred_element_type=jnp.float32) + b1, 0.0)
        z = x1 + jnp.dot(h1, w2, preferred_element_type=jnp.float32) + b2
        out = _layernorm(z, l2w, l2b)
        attn_avg = attn_sum * (1.0 / heads) if ret_attn else None
        return out, attn_avg

    def kernel(*refs):
        it = iter(refs)
        xs_ref = next(it) if has_spatial else None
        x_ref = next(it)
        kp_ref = next(it)
        len_ref = next(it)
        gamma_ref = next(it) if has_spatial else None
        spmask_ref = next(it) if has_spmask else None
        sp_refs = [next(it) for _ in range(12)] if has_spatial else None
        st_refs = [next(it) for _ in range(12)]
        o_ref = next(it)

        kp = kp_ref[...]                                        # (B, S)
        kp3 = jnp.broadcast_to(kp[:, None, :], (B, S, S))       # hoisted once

        extra_heads = None
        if has_spatial:
            # ---- spatial branch: SpatialMSM(4, 32, nhead=1, 3 layers) ----
            sp_extra = None
            if has_spmask:
                sp_extra = [jnp.broadcast_to(spmask_ref[...], (B, S, S))]
            xs = xs_ref[...]                                     # (B*S, 4)
            attn = None
            for li in range(n_sp):
                w = tuple(r[li] for r in sp_refs)
                last = li == n_sp - 1
                xs, a = _encoder_layer(xs, w, heads=1, kp3=kp3,
                                       extra_heads=sp_extra, ret_attn=last,
                                       exact_softmax=last)
                if last:
                    attn = a                                     # (B, S, S)

            # gamma * attn stays in VMEM; reproduce the torch
            # `.repeat(nhead,1,1)` + (b*H + h) batch-head flattening quirk by a
            # static gather, once per head, shared by all structural layers.
            gam = gamma_ref[...]                                 # (1, 1)
            extra_st = attn * gam[0, 0]                          # (B, S, S)
            extra_heads = []
            for h in range(H):
                rows = [extra_st[(b * H + h) % B:(b * H + h) % B + 1]
                        for b in range(B)]
                extra_heads.append(jnp.concatenate(rows, axis=0))  # (B, S, S)

        # ---- structural transformer encoder ----
        x = x_ref[...]                                           # (B*S, d)
        for li in range(n_st):
            w = tuple(r[li] for r in st_refs)
            x, _ = _encoder_layer(x, w, heads=H, kp3=kp3,
                                  extra_heads=extra_heads, ret_attn=False,
                                  exact_softmax=False)

        # ---- masked mean pooling over the sequence ----
        valid = jnp.where(kp < -1.0, 0.0, 1.0)                   # (B, S)
        pooled = jnp.sum(x.reshape(B, S, d) * valid[:, :, None], axis=1)
        o_ref[...] = pooled / len_ref[...]                        # exact / src_len

    return kernel


def dual_stb_forward(params, src, attn_mask, src_padding_mask, src_len, srcspatial):
    """src: (S, B, ninput); srcspatial: (S, B, 4) or None;
    src_padding_mask: (B, S) bool (True = padded); src_len: (B,).
    Returns (B, ninput)."""
    H = params['nhead']
    S, B, d = src.shape

    kp_add = jnp.where(src_padding_mask, NEG_INF, 0.0).astype(jnp.float32)   # (B, S)
    lens = src_len.astype(jnp.float32).reshape(B, 1)
    x0 = (src.transpose(1, 0, 2) + params['struct_pe'][:S][None]).reshape(B * S, d)

    has_spatial = srcspatial is not None
    has_spmask = False
    inputs = []
    ds = 0
    if has_spatial:
        ds = srcspatial.shape[-1]
        xs0 = (srcspatial.transpose(1, 0, 2)
               + params['spatial_pe'][:S][None]).reshape(B * S, ds)
        inputs.append(xs0)
    inputs += [x0, kp_add, lens]
    if has_spatial:
        gamma = (jax.nn.sigmoid(params['gamma']) * 10.0).reshape(1, 1)
        inputs.append(gamma.astype(jnp.float32))
        if attn_mask is not None:
            has_spmask = True
            am = attn_mask
            if am.dtype == jnp.bool_:
                am = jnp.where(am, NEG_INF, 0.0)
            am = am.astype(jnp.float32)
            inputs.append(am.reshape(1, S, S) if am.ndim == 2
                          else am.reshape(-1, S, S))
        inputs += list(params['sp'])
    inputs += list(params['st'])

    n_sp = params['sp'][0].shape[0] if has_spatial else 0
    n_st = params['st'][0].shape[0]

    kernel = _make_dual_stb_kernel(B=B, S=S, d=d, ds=ds, H=H, n_sp=n_sp,
                                   n_st=n_st, has_spatial=has_spatial,
                                   has_spmask=has_spmask)
    return pl.pallas_call(
        kernel,
        out_shape=jax.ShapeDtypeStruct((B, d), jnp.float32),
        grid=(1,),
        in_specs=[_full_spec(a.shape) for a in inputs],
        out_specs=_full_spec((B, d)),
        compiler_params=pltpu.CompilerParams(
            dimension_semantics=("arbitrary",)),
    )(*inputs)


# ----------------------------- parameters -----------------------------

def make_pos_embedding(emb_size, maxlen=201):
    den = np.exp(np.arange(0, emb_size, 2, dtype=np.float64)
                 * (-math.log(10000.0) / emb_size))
    pos = np.arange(0, maxlen, dtype=np.float64).reshape(maxlen, 1)
    pe = np.zeros((maxlen, emb_size), dtype=np.float64)
    pe[:, 0::2] = np.sin(pos * den)
    pe[:, 1::2] = np.cos(pos * den)
    return jnp.asarray(pe, dtype=jnp.float32)       # (maxlen, emb)


def init_encoder_layer(key, d, ff):
    ks = jax.random.split(key, 4)
    std = 0.02
    return {
        'in_proj_w': std * jax.random.normal(ks[0], (d, 3 * d), jnp.float32),
        'in_proj_b': jnp.zeros((3 * d,), jnp.float32),
        'out_proj_w': std * jax.random.normal(ks[1], (d, d), jnp.float32),
        'out_proj_b': jnp.zeros((d,), jnp.float32),
        'lin1_w': std * jax.random.normal(ks[2], (d, ff), jnp.float32),
        'lin1_b': jnp.zeros((ff,), jnp.float32),
        'lin2_w': std * jax.random.normal(ks[3], (ff, d), jnp.float32),
        'lin2_b': jnp.zeros((d,), jnp.float32),
        'ln1_w': jnp.ones((d,), jnp.float32),
        'ln1_b': jnp.zeros((d,), jnp.float32),
        'ln2_w': jnp.ones((d,), jnp.float32),
        'ln2_b': jnp.zeros((d,), jnp.float32),
    }


def init_dual_stb(key, ninput, nhidden, nhead, nlayer):
    k_struct, k_spatial = jax.random.split(key)
    struct_keys = jax.random.split(k_struct, nlayer)
    spatial_keys = jax.random.split(k_spatial, 3)    # SpatialMSM(4, 32, 1, 3, ...)
    return {
        'nhead': nhead,
        'gamma': jnp.float32(0.5),                   # nn.Parameter(tensor(0.5))
        'struct_pe': make_pos_embedding(ninput),
        'spatial_pe': make_pos_embedding(4),
        'struct_layers': [init_encoder_layer(kk, ninput, nhidden)
                          for kk in struct_keys],
        'spatial_layers': [init_encoder_layer(kk, 4, 32)
                           for kk in spatial_keys],
    }


def prepare_params(raw):
    """Stack per-layer weights along a leading layer axis (kernel indexes them
    statically) and fold the 1/sqrt(Dh) attention scale into the Q columns of
    the fused QKV projection (weight + bias)."""
    def stack_branch(layers, dm, heads):
        scale = 1.0 / math.sqrt(dm // heads)
        g = lambda k: jnp.stack([lp[k] for lp in layers], axis=0)
        wqkv = g('in_proj_w').at[:, :, :dm].multiply(scale)
        bqkv = g('in_proj_b')[:, None, :].at[:, :, :dm].multiply(scale)
        return [wqkv, bqkv,
                g('out_proj_w'), g('out_proj_b')[:, None, :],
                g('lin1_w'), g('lin1_b')[:, None, :],
                g('lin2_w'), g('lin2_b')[:, None, :],
                g('ln1_w')[:, None, :], g('ln1_b')[:, None, :],
                g('ln2_w')[:, None, :], g('ln2_b')[:, None, :]]
    d_struct = raw['struct_layers'][0]['in_proj_w'].shape[0]
    d_spatial = raw['spatial_layers'][0]['in_proj_w'].shape[0]
    return {
        'nhead': raw['nhead'],
        'gamma': raw['gamma'],
        'struct_pe': raw['struct_pe'],
        'spatial_pe': raw['spatial_pe'],
        'sp': stack_branch(raw['spatial_layers'], d_spatial, 1),
        'st': stack_branch(raw['struct_layers'], d_struct, raw['nhead']),
    }


# ------------------- pure-JAX reference (raw params) -------------------

def _ref_layernorm(x, w, b, eps=1e-5):
    mu = jnp.mean(x, axis=-1, keepdims=True)
    xc = x - mu
    var = jnp.mean(xc * xc, axis=-1, keepdims=True)
    return xc * jax.lax.rsqrt(var + eps) * w + b


def _ref_encoder_layer(x, lp, kp_add, extra, H):
    B, S, dm = x.shape
    Dh = dm // H
    hi = jax.lax.Precision.HIGHEST
    qkv = jnp.einsum('bsd,de->bse', x, lp['in_proj_w'], precision=hi) + lp['in_proj_b']
    q, k, v = qkv[..., :dm], qkv[..., dm:2 * dm], qkv[..., 2 * dm:]
    split = lambda t: t.reshape(B, S, H, Dh).transpose(0, 2, 1, 3)
    q = split(q) * (1.0 / math.sqrt(Dh))
    k, v = split(k), split(v)
    s = jnp.einsum('bhqd,bhkd->bhqk', q, k, precision=hi)
    s = s + kp_add[:, None, None, :]
    if extra is not None:
        idx = (jnp.arange(B)[:, None] * H + jnp.arange(H)[None, :]) % B
        s = s + extra[idx]
    s = s - jnp.max(s, axis=-1, keepdims=True)
    p = jnp.exp(s)
    p = p / jnp.sum(p, axis=-1, keepdims=True)
    o = jnp.einsum('bhqk,bhkd->bhqd', p, v, precision=hi)
    o = o.transpose(0, 2, 1, 3).reshape(B, S, dm)
    src2 = jnp.einsum('bsd,de->bse', o, lp['out_proj_w'], precision=hi) + lp['out_proj_b']
    x1 = _ref_layernorm(x + src2, lp['ln1_w'], lp['ln1_b'])
    h1 = jnp.maximum(jnp.einsum('bsd,df->bsf', x1, lp['lin1_w'], precision=hi)
                     + lp['lin1_b'], 0.0)
    src2 = jnp.einsum('bsf,fd->bsd', h1, lp['lin2_w'], precision=hi) + lp['lin2_b']
    out = _ref_layernorm(x1 + src2, lp['ln2_w'], lp['ln2_b'])
    return out, jnp.mean(p, axis=1)


def ref_dual_stb_forward(raw, src, attn_mask, src_padding_mask, src_len, srcspatial):
    H = raw['nhead']
    S, B, d = src.shape
    kp_add = jnp.where(src_padding_mask, NEG_INF, 0.0).astype(jnp.float32)
    xs = srcspatial.transpose(1, 0, 2) + raw['spatial_pe'][:S][None]
    extra_sp = None
    if attn_mask is not None:
        am = attn_mask
        if am.dtype == jnp.bool_:
            am = jnp.where(am, NEG_INF, 0.0)
        extra_sp = jnp.broadcast_to(am.astype(jnp.float32).reshape(-1, S, S), (B, S, S))
    attn = None
    for lp in raw['spatial_layers']:
        xs, attn = _ref_encoder_layer(xs, lp, kp_add, extra_sp, 1)
    gamma = jax.nn.sigmoid(raw['gamma']) * 10.0
    extra_st = gamma * attn
    x = src.transpose(1, 0, 2) + raw['struct_pe'][:S][None]
    for lp in raw['struct_layers']:
        x, _ = _ref_encoder_layer(x, lp, kp_add, extra_st, H)
    valid = 1.0 - src_padding_mask.astype(jnp.float32)
    pooled = jnp.sum(x * valid[:, :, None], axis=1)
    return pooled / src_len.astype(jnp.float32)[:, None]


# ----------------------------- main -----------------------------

if __name__ == "__main__":
    key = jax.random.PRNGKey(0)
    ninput, nhidden, nhead, nlayer = 16, 32, 2, 2
    S, B = 8, 2

    kparam, k1, k2 = jax.random.split(key, 3)
    raw = init_dual_stb(kparam, ninput, nhidden, nhead, nlayer)
    params = prepare_params(raw)

    src = jax.random.normal(k1, (S, B, ninput), jnp.float32)
    srcspatial = jax.random.normal(k2, (S, B, 4), jnp.float32)
    lens = jnp.array([8, 5], jnp.int32)
    src_padding_mask = jnp.arange(S)[None, :] >= lens[:, None]    # (B, S) bool
    src_len = lens.astype(jnp.float32)
    attn_mask = None

    out = dual_stb_forward(params, src, attn_mask, src_padding_mask,
                           src_len, srcspatial)
    out = jax.block_until_ready(out)

    assert out.shape == (B, ninput), out.shape
    assert bool(jnp.all(jnp.isfinite(out)))

    # Pure-JAX reference on the raw (unstacked, scale-unfolded) parameters.
    ref = ref_dual_stb_forward(raw, src, attn_mask, src_padding_mask,
                               src_len, srcspatial)
    np.testing.assert_allclose(np.asarray(out), np.asarray(ref),
                               rtol=5e-2, atol=5e-2)
    print("KERNEL_OK")
</pallas_src>

<mosaic_0001>
module attributes {stable_mosaic.version = 11 : i64} {
  func.func @kernel(%arg0: i32, %arg1: memref<16x4xf32, #tpu.memory_space<vmem>>, %arg2: memref<16x16xf32, #tpu.memory_space<vmem>>, %arg3: memref<2x8xf32, #tpu.memory_space<vmem>>, %arg4: memref<2x1xf32, #tpu.memory_space<vmem>>, %arg5: memref<1x1xf32, #tpu.memory_space<vmem>>, %arg6: memref<3x4x12xf32, #tpu.memory_space<vmem>>, %arg7: memref<3x1x12xf32, #tpu.memory_space<vmem>>, %arg8: memref<3x4x4xf32, #tpu.memory_space<vmem>>, %arg9: memref<3x1x4xf32, #tpu.memory_space<vmem>>, %arg10: memref<3x4x32xf32, #tpu.memory_space<vmem>>, %arg11: memref<3x1x32xf32, #tpu.memory_space<vmem>>, %arg12: memref<3x32x4xf32, #tpu.memory_space<vmem>>, %arg13: memref<3x1x4xf32, #tpu.memory_space<vmem>>, %arg14: memref<3x1x4xf32, #tpu.memory_space<vmem>>, %arg15: memref<3x1x4xf32, #tpu.memory_space<vmem>>, %arg16: memref<3x1x4xf32, #tpu.memory_space<vmem>>, %arg17: memref<3x1x4xf32, #tpu.memory_space<vmem>>, %arg18: memref<2x16x48xf32, #tpu.memory_space<vmem>>, %arg19: memref<2x1x48xf32, #tpu.memory_space<vmem>>, %arg20: memref<2x16x16xf32, #tpu.memory_space<vmem>>, %arg21: memref<2x1x16xf32, #tpu.memory_space<vmem>>, %arg22: memref<2x16x32xf32, #tpu.memory_space<vmem>>, %arg23: memref<2x1x32xf32, #tpu.memory_space<vmem>>, %arg24: memref<2x32x16xf32, #tpu.memory_space<vmem>>, %arg25: memref<2x1x16xf32, #tpu.memory_space<vmem>>, %arg26: memref<2x1x16xf32, #tpu.memory_space<vmem>>, %arg27: memref<2x1x16xf32, #tpu.memory_space<vmem>>, %arg28: memref<2x1x16xf32, #tpu.memory_space<vmem>>, %arg29: memref<2x1x16xf32, #tpu.memory_space<vmem>>, %arg30: memref<2x16xf32, #tpu.memory_space<vmem>>) attributes {dimension_semantics = [#tpu.dimension_semantics<arbitrary>], iteration_bounds = array<i64: 1>, scalar_prefetch = 0 : i64, scratch_operands = 0 : i64, tpu.core_type = #tpu.core_type<tc>, window_params = [{pipeline_mode = #tpu.pipeline_mode<synchronous>, transform_indices = @transform_0, window_bounds = array<i64: 16, 4>}, {pipeline_mode = #tpu.pipeline_mode<synchronous>, transform_indices = @transform_1, window_bounds = array<i64: 16, 16>}, {pipeline_mode = #tpu.pipeline_mode<synchronous>, transform_indices = @transform_2, window_bounds = array<i64: 2, 8>}, {pipeline_mode = #tpu.pipeline_mode<synchronous>, transform_indices = @transform_3, window_bounds = array<i64: 2, 1>}, {pipeline_mode = #tpu.pipeline_mode<synchronous>, transform_indices = @transform_4, window_bounds = array<i64: 1, 1>}, {pipeline_mode = #tpu.pipeline_mode<synchronous>, transform_indices = @transform_5, window_bounds = array<i64: 3, 4, 12>}, {pipeline_mode = #tpu.pipeline_mode<synchronous>, transform_indices = @transform_6, window_bounds = array<i64: 3, 1, 12>}, {pipeline_mode = #tpu.pipeline_mode<synchronous>, transform_indices = @transform_7, window_bounds = array<i64: 3, 4, 4>}, {pipeline_mode = #tpu.pipeline_mode<synchronous>, transform_indices = @transform_8, window_bounds = array<i64: 3, 1, 4>}, {pipeline_mode = #tpu.pipeline_mode<synchronous>, transform_indices = @transform_9, window_bounds = array<i64: 3, 4, 32>}, {pipeline_mode = #tpu.pipeline_mode<synchronous>, transform_indices = @transform_10, window_bounds = array<i64: 3, 1, 32>}, {pipeline_mode = #tpu.pipeline_mode<synchronous>, transform_indices = @transform_11, window_bounds = array<i64: 3, 32, 4>}, {pipeline_mode = #tpu.pipeline_mode<synchronous>, transform_indices = @transform_12, window_bounds = array<i64: 3, 1, 4>}, {pipeline_mode = #tpu.pipeline_mode<synchronous>, transform_indices = @transform_13, window_bounds = array<i64: 3, 1, 4>}, {pipeline_mode = #tpu.pipeline_mode<synchronous>, transform_indices = @transform_14, window_bounds = array<i64: 3, 1, 4>}, {pipeline_mode = #tpu.pipeline_mode<synchronous>, transform_indices = @transform_15, window_bounds = array<i64: 3, 1, 4>}, {pipeline_mode = #tpu.pipeline_mode<synchronous>, transform_indices = @transform_16, window_bounds = array<i64: 3, 1, 4>}, {pipeline_mode = #tpu.pipeline_mode<synchronous>, transform_indices = @transform_17, window_bounds = array<i64: 2, 16, 48>}, {pipeline_mode = #tpu.pipeline_mode<synchronous>, transform_indices = @transform_18, window_bounds = array<i64: 2, 1, 48>}, {pipeline_mode = #tpu.pipeline_mode<synchronous>, transform_indices = @transform_19, window_bounds = array<i64: 2, 16, 16>}, {pipeline_mode = #tpu.pipeline_mode<synchronous>, transform_indices = @transform_20, window_bounds = array<i64: 2, 1, 16>}, {pipeline_mode = #tpu.pipeline_mode<synchronous>, transform_indices = @transform_21, window_bounds = array<i64: 2, 16, 32>}, {pipeline_mode = #tpu.pipeline_mode<synchronous>, transform_indices = @transform_22, window_bounds = array<i64: 2, 1, 32>}, {pipeline_mode = #tpu.pipeline_mode<synchronous>, transform_indices = @transform_23, window_bounds = array<i64: 2, 32, 16>}, {pipeline_mode = #tpu.pipeline_mode<synchronous>, transform_indices = @transform_24, window_bounds = array<i64: 2, 1, 16>}, {pipeline_mode = #tpu.pipeline_mode<synchronous>, transform_indices = @transform_25, window_bounds = array<i64: 2, 1, 16>}, {pipeline_mode = #tpu.pipeline_mode<synchronous>, transform_indices = @transform_26, window_bounds = array<i64: 2, 1, 16>}, {pipeline_mode = #tpu.pipeline_mode<synchronous>, transform_indices = @transform_27, window_bounds = array<i64: 2, 1, 16>}, {pipeline_mode = #tpu.pipeline_mode<synchronous>, transform_indices = @transform_28, window_bounds = array<i64: 2, 1, 16>}, {pipeline_mode = #tpu.pipeline_mode<synchronous>, transform_indices = @transform_29, window_bounds = array<i64: 2, 16>}]} {
    %c0 = arith.constant 0 : index
    %c0_0 = arith.constant 0 : index
    %0 = vector.load %arg3[%c0, %c0_0] : memref<2x8xf32, #tpu.memory_space<vmem>>, vector<2x8xf32>
    %1 = vector.shape_cast %0 : vector<2x8xf32> to vector<2x1x8xf32>
    %2 = vector.shape_cast %1 : vector<2x1x8xf32> to vector<2x1x8xf32>
    %3 = vector.broadcast %2 : vector<2x1x8xf32> to vector<2x8x8xf32>
    %c0_1 = arith.constant 0 : index
    %c0_2 = arith.constant 0 : index
    %4 = vector.load %arg1[%c0_1, %c0_2] : memref<16x4xf32, #tpu.memory_space<vmem>>, vector<16x4xf32>
    %c0_3 = arith.constant 0 : index
    %c0_4 = arith.constant 0 : index
    %c0_5 = arith.constant 0 : index
    %5 = vector.load %arg6[%c0_3, %c0_4, %c0_5] : memref<3x4x12xf32, #tpu.memory_space<vmem>>, vector<1x4x12xf32>
    %6 = vector.shape_cast %5 : vector<1x4x12xf32> to vector<4x12xf32>
    %c0_6 = arith.constant 0 : index
    %c0_7 = arith.constant 0 : index
    %c0_8 = arith.constant 0 : index
    %7 = vector.load %arg7[%c0_6, %c0_7, %c0_8] : memref<3x1x12xf32, #tpu.memory_space<vmem>>, vector<1x1x12xf32>
    %8 = vector.shape_cast %7 : vector<1x1x12xf32> to vector<1x12xf32>
    %c0_9 = arith.constant 0 : index
    %c0_10 = arith.constant 0 : index
    %c0_11 = arith.constant 0 : index
    %9 = vector.load %arg8[%c0_9, %c0_10, %c0_11] : memref<3x4x4xf32, #tpu.memory_space<vmem>>, vector<1x4x4xf32>
    %10 = vector.shape_cast %9 : vector<1x4x4xf32> to vector<4x4xf32>
    %c0_12 = arith.constant 0 : index
    %c0_13 = arith.constant 0 : index
    %c0_14 = arith.constant 0 : index
    %11 = vector.load %arg9[%c0_12, %c0_13, %c0_14] : memref<3x1x4xf32, #tpu.memory_space<vmem>>, vector<1x1x4xf32>
    %12 = vector.shape_cast %11 : vector<1x1x4xf32> to vector<1x4xf32>
    %c0_15 = arith.constant 0 : index
    %c0_16 = arith.constant 0 : index
    %c0_17 = arith.constant 0 : index
    %13 = vector.load %arg10[%c0_15, %c0_16, %c0_17] : memref<3x4x32xf32, #tpu.memory_space<vmem>>, vector<1x4x32xf32>
    %14 = vector.shape_cast %13 : vector<1x4x32xf32> to vector<4x32xf32>
    %c0_18 = arith.constant 0 : index
    %c0_19 = arith.constant 0 : index
    %c0_20 = arith.constant 0 : index
    %15 = vector.load %arg11[%c0_18, %c0_19, %c0_20] : memref<3x1x32xf32, #tpu.memory_space<vmem>>, vector<1x1x32xf32>
    %16 = vector.shape_cast %15 : vector<1x1x32xf32> to vector<1x32xf32>
    %c0_21 = arith.constant 0 : index
    %c0_22 = arith.constant 0 : index
    %c0_23 = arith.constant 0 : index
    %17 = vector.load %arg12[%c0_21, %c0_22, %c0_23] : memref<3x32x4xf32, #tpu.memory_space<vmem>>, vector<1x32x4xf32>
    %18 = vector.shape_cast %17 : vector<1x32x4xf32> to vector<32x4xf32>
    %c0_24 = arith.constant 0 : index
    %c0_25 = arith.constant 0 : index
    %c0_26 = arith.constant 0 : index
    %19 = vector.load %arg13[%c0_24, %c0_25, %c0_26] : memref<3x1x4xf32, #tpu.memory_space<vmem>>, vector<1x1x4xf32>
    %20 = vector.shape_cast %19 : vector<1x1x4xf32> to vector<1x4xf32>
    %c0_27 = arith.constant 0 : index
    %c0_28 = arith.constant 0 : index
    %c0_29 = arith.constant 0 : index
    %21 = vector.load %arg14[%c0_27, %c0_28, %c0_29] : memref<3x1x4xf32, #tpu.memory_space<vmem>>, vector<1x1x4xf32>
    %22 = vector.shape_cast %21 : vector<1x1x4xf32> to vector<1x4xf32>
    %c0_30 = arith.constant 0 : index
    %c0_31 = arith.constant 0 : index
    %c0_32 = arith.constant 0 : index
    %23 = vector.load %arg15[%c0_30, %c0_31, %c0_32] : memref<3x1x4xf32, #tpu.memory_space<vmem>>, vector<1x1x4xf32>
    %24 = vector.shape_cast %23 : vector<1x1x4xf32> to vector<1x4xf32>
    %c0_33 = arith.constant 0 : index
    %c0_34 = arith.constant 0 : index
    %c0_35 = arith.constant 0 : index
    %25 = vector.load %arg16[%c0_33, %c0_34, %c0_35] : memref<3x1x4xf32, #tpu.memory_space<vmem>>, vector<1x1x4xf32>
    %26 = vector.shape_cast %25 : vector<1x1x4xf32> to vector<1x4xf32>
    %c0_36 = arith.constant 0 : index
    %c0_37 = arith.constant 0 : index
    %c0_38 = arith.constant 0 : index
    %27 = vector.load %arg17[%c0_36, %c0_37, %c0_38] : memref<3x1x4xf32, #tpu.memory_space<vmem>>, vector<1x1x4xf32>
    %28 = vector.shape_cast %27 : vector<1x1x4xf32> to vector<1x4xf32>
    %cst = arith.constant dense<0.000000e+00> : vector<16x12xf32>
    %29 = tpu.matmul %4, %6, %cst {dimension_numbers = #tpu.dot_dimension_numbers<[1], [0], [0], [1], [0, 0, 1, 1], [], []>} : vector<16x4xf32>, vector<4x12xf32>, vector<16x12xf32> -> vector<16x12xf32>
    %30 = vector.broadcast %8 : vector<1x12xf32> to vector<16x12xf32>
    %31 = arith.addf %29, %30 : vector<16x12xf32>
    %32 = vector.extract_strided_slice %31 {offsets = [0, 0], sizes = [16, 4], strides = [1, 1]} : vector<16x12xf32> to vector<16x4xf32>
    %33 = vector.shape_cast %32 : vector<16x4xf32> to vector<2x8x4xf32>
    %34 = vector.extract_strided_slice %31 {offsets = [0, 4], sizes = [16, 4], strides = [1, 1]} : vector<16x12xf32> to vector<16x4xf32>
    %35 = vector.shape_cast %34 : vector<16x4xf32> to vector<2x8x4xf32>
    %36 = vector.extract_strided_slice %31 {offsets = [0, 8], sizes = [16, 4], strides = [1, 1]} : vector<16x12xf32> to vector<16x4xf32>
    %37 = vector.shape_cast %36 : vector<16x4xf32> to vector<2x8x4xf32>
    "tpu.trace_start"() <{level = 10 : i32, message = "bqd,bkd->bqk"}> : () -> ()
    %cst_39 = arith.constant dense<0.000000e+00> : vector<2x8x8xf32>
    %38 = tpu.matmul %33, %35, %cst_39 {dimension_numbers = #tpu.dot_dimension_numbers<[2], [2], [1], [1], [0, 0, 0, 1, 1, 1], [0], [0]>} : vector<2x8x4xf32>, vector<2x8x4xf32>, vector<2x8x8xf32> -> vector<2x8x8xf32>
    "tpu.trace_stop"() : () -> ()
    %39 = arith.addf %38, %3 : vector<2x8x8xf32>
    %cst_40 = arith.constant dense<0xFF800000> : vector<2x8xf32>
    %40 = vector.multi_reduction <maximumf>, %39, %cst_40 [2] : vector<2x8x8xf32> to vector<2x8xf32>
    %41 = vector.shape_cast %40 : vector<2x8xf32> to vector<2x8x1xf32>
    %42 = vector.broadcast %41 : vector<2x8x1xf32> to vector<2x8x8xf32>
    %43 = arith.subf %39, %42 : vector<2x8x8xf32>
    %44 = math.exp %43 : vector<2x8x8xf32>
    %cst_41 = arith.constant dense<0.000000e+00> : vector<2x8xf32>
    %45 = vector.multi_reduction <add>, %44, %cst_41 [2] : vector<2x8x8xf32> to vector<2x8xf32>
    %46 = vector.shape_cast %45 : vector<2x8xf32> to vector<2x8x1xf32>
    %47 = tpu.reciprocal %46 {approx = true} : vector<2x8x1xf32> -> vector<2x8x1xf32>
    %48 = vector.broadcast %47 : vector<2x8x1xf32> to vector<2x8x8xf32>
    %49 = arith.mulf %44, %48 : vector<2x8x8xf32>
    "tpu.trace_start"() <{level = 10 : i32, message = "bqk,bkd->bqd"}> : () -> ()
    %cst_42 = arith.constant dense<0.000000e+00> : vector<2x8x4xf32>
    %50 = tpu.matmul %49, %37, %cst_42 {dimension_numbers = #tpu.dot_dimension_numbers<[2], [1], [1], [2], [0, 0, 0, 1, 1, 2], [0], [0]>} : vector<2x8x8xf32>, vector<2x8x4xf32>, vector<2x8x4xf32> -> vector<2x8x4xf32>
    "tpu.trace_stop"() : () -> ()
    %51 = vector.shape_cast %50 : vector<2x8x4xf32> to vector<16x4xf32>
    %cst_43 = arith.constant dense<0.000000e+00> : vector<16x4xf32>
    %52 = tpu.matmul %51, %10, %cst_43 {dimension_numbers = #tpu.dot_dimension_numbers<[1], [0], [0], [1], [0, 0, 1, 1], [], []>} : vector<16x4xf32>, vector<4x4xf32>, vector<16x4xf32> -> vector<16x4xf32>
    %53 = arith.addf %4, %52 : vector<16x4xf32>
    %54 = vector.broadcast %12 : vector<1x4xf32> to vector<16x4xf32>
    %55 = arith.addf %53, %54 : vector<16x4xf32>
    %cst_44 = arith.constant dense<0.000000e+00> : vector<16xf32>
    %56 = vector.multi_reduction <add>, %55, %cst_44 [1] : vector<16x4xf32> to vector<16xf32>
    %57 = vector.shape_cast %56 : vector<16xf32> to vector<16x1xf32>
    %cst_45 = arith.constant 4.000000e+00 : f32
    %58 = vector.broadcast %cst_45 : f32 to vector<16x1xf32>
    %59 = arith.divf %57, %58 : vector<16x1xf32>
    %60 = vector.broadcast %59 : vector<16x1xf32> to vector<16x4xf32>
    %61 = arith.subf %55, %60 : vector<16x4xf32>
    %62 = arith.mulf %61, %61 : vector<16x4xf32>
    %cst_46 = arith.constant dense<0.000000e+00> : vector<16xf32>
    %63 = vector.multi_reduction <add>, %62, %cst_46 [1] : vector<16x4xf32> to vector<16xf32>
    %64 = vector.shape_cast %63 : vector<16xf32> to vector<16x1xf32>
    %cst_47 = arith.constant 4.000000e+00 : f32
    %65 = vector.broadcast %cst_47 : f32 to vector<16x1xf32>
    %66 = arith.divf %64, %65 : vector<16x1xf32>
    %cst_48 = arith.constant 9.99999974E-6 : f32
    %67 = vector.broadcast %cst_48 : f32 to vector<16x1xf32>
    %68 = arith.addf %66, %67 : vector<16x1xf32>
    %69 = math.rsqrt %68 : vector<16x1xf32>
    %70 = vector.broadcast %69 : vector<16x1xf32> to vector<16x4xf32>
    %71 = arith.mulf %61, %70 : vector<16x4xf32>
    %72 = vector.broadcast %22 : vector<1x4xf32> to vector<16x4xf32>
    %73 = arith.mulf %71, %72 : vector<16x4xf32>
    %74 = vector.broadcast %24 : vector<1x4xf32> to vector<16x4xf32>
    %75 = arith.addf %73, %74 : vector<16x4xf32>
    %cst_49 = arith.constant dense<0.000000e+00> : vector<16x32xf32>
    %76 = tpu.matmul %75, %14, %cst_49 {dimension_numbers = #tpu.dot_dimension_numbers<[1], [0], [0], [1], [0, 0, 1, 1], [], []>} : vector<16x4xf32>, vector<4x32xf32>, vector<16x32xf32> -> vector<16x32xf32>
    %77 = vector.broadcast %16 : vector<1x32xf32> to vector<16x32xf32>
    %78 = arith.addf %76, %77 : vector<16x32xf32>
    %cst_50 = arith.constant 0.000000e+00 : f32
    %79 = vector.broadcast %cst_50 : f32 to vector<16x32xf32>
    %80 = arith.maximumf %78, %79 : vector<16x32xf32>
    %cst_51 = arith.constant dense<0.000000e+00> : vector<16x4xf32>
    %81 = tpu.matmul %80, %18, %cst_51 {dimension_numbers = #tpu.dot_dimension_numbers<[1], [0], [0], [1], [0, 0, 1, 1], [], []>} : vector<16x32xf32>, vector<32x4xf32>, vector<16x4xf32> -> vector<16x4xf32>
    %82 = arith.addf %75, %81 : vector<16x4xf32>
    %83 = vector.broadcast %20 : vector<1x4xf32> to vector<16x4xf32>
    %84 = arith.addf %82, %83 : vector<16x4xf32>
    %cst_52 = arith.constant dense<0.000000e+00> : vector<16xf32>
    %85 = vector.multi_reduction <add>, %84, %cst_52 [1] : vector<16x4xf32> to vector<16xf32>
    %86 = vector.shape_cast %85 : vector<16xf32> to vector<16x1xf32>
    %cst_53 = arith.constant 4.000000e+00 : f32
    %87 = vector.broadcast %cst_53 : f32 to vector<16x1xf32>
    %88 = arith.divf %86, %87 : vector<16x1xf32>
    %89 = vector.broadcast %88 : vector<16x1xf32> to vector<16x4xf32>
    %90 = arith.subf %84, %89 : vector<16x4xf32>
    %91 = arith.mulf %90, %90 : vector<16x4xf32>
    %cst_54 = arith.constant dense<0.000000e+00> : vector<16xf32>
    %92 = vector.multi_reduction <add>, %91, %cst_54 [1] : vector<16x4xf32> to vector<16xf32>
    %93 = vector.shape_cast %92 : vector<16xf32> to vector<16x1xf32>
    %cst_55 = arith.constant 4.000000e+00 : f32
    %94 = vector.broadcast %cst_55 : f32 to vector<16x1xf32>
    %95 = arith.divf %93, %94 : vector<16x1xf32>
    %cst_56 = arith.constant 9.99999974E-6 : f32
    %96 = vector.broadcast %cst_56 : f32 to vector<16x1xf32>
    %97 = arith.addf %95, %96 : vector<16x1xf32>
    %98 = math.rsqrt %97 : vector<16x1xf32>
    %99 = vector.broadcast %98 : vector<16x1xf32> to vector<16x4xf32>
    %100 = arith.mulf %90, %99 : vector<16x4xf32>
    %101 = vector.broadcast %26 : vector<1x4xf32> to vector<16x4xf32>
    %102 = arith.mulf %100, %101 : vector<16x4xf32>
    %103 = vector.broadcast %28 : vector<1x4xf32> to vector<16x4xf32>
    %104 = arith.addf %102, %103 : vector<16x4xf32>
    %c1 = arith.constant 1 : index
    %c0_57 = arith.constant 0 : index
    %c0_58 = arith.constant 0 : index
    %105 = vector.load %arg6[%c1, %c0_57, %c0_58] : memref<3x4x12xf32, #tpu.memory_space<vmem>>, vector<1x4x12xf32>
    %106 = vector.shape_cast %105 : vector<1x4x12xf32> to vector<4x12xf32>
    %c1_59 = arith.constant 1 : index
    %c0_60 = arith.constant 0 : index
    %c0_61 = arith.constant 0 : index
    %107 = vector.load %arg7[%c1_59, %c0_60, %c0_61] : memref<3x1x12xf32, #tpu.memory_space<vmem>>, vector<1x1x12xf32>
    %108 = vector.shape_cast %107 : vector<1x1x12xf32> to vector<1x12xf32>
    %c1_62 = arith.constant 1 : index
    %c0_63 = arith.constant 0 : index
    %c0_64 = arith.constant 0 : index
    %109 = vector.load %arg8[%c1_62, %c0_63, %c0_64] : memref<3x4x4xf32, #tpu.memory_space<vmem>>, vector<1x4x4xf32>
    %110 = vector.shape_cast %109 : vector<1x4x4xf32> to vector<4x4xf32>
    %c1_65 = arith.constant 1 : index
    %c0_66 = arith.constant 0 : index
    %c0_67 = arith.constant 0 : index
    %111 = vector.load %arg9[%c1_65, %c0_66, %c0_67] : memref<3x1x4xf32, #tpu.memory_space<vmem>>, vector<1x1x4xf32>
    %112 = vector.shape_cast %111 : vector<1x1x4xf32> to vector<1x4xf32>
    %c1_68 = arith.constant 1 : index
    %c0_69 = arith.constant 0 : index
    %c0_70 = arith.constant 0 : index
    %113 = vector.load %arg10[%c1_68, %c0_69, %c0_70] : memref<3x4x32xf32, #tpu.memory_space<vmem>>, vector<1x4x32xf32>
    %114 = vector.shape_cast %113 : vector<1x4x32xf32> to vector<4x32xf32>
    %c1_71 = arith.constant 1 : index
    %c0_72 = arith.constant 0 : index
    %c0_73 = arith.constant 0 : index
    %115 = vector.load %arg11[%c1_71, %c0_72, %c0_73] : memref<3x1x32xf32, #tpu.memory_space<vmem>>, vector<1x1x32xf32>
    %116 = vector.shape_cast %115 : vector<1x1x32xf32> to vector<1x32xf32>
    %c1_74 = arith.constant 1 : index
    %c0_75 = arith.constant 0 : index
    %c0_76 = arith.constant 0 : index
    %117 = vector.load %arg12[%c1_74, %c0_75, %c0_76] : memref<3x32x4xf32, #tpu.memory_space<vmem>>, vector<1x32x4xf32>
    %118 = vector.shape_cast %117 : vector<1x32x4xf32> to vector<32x4xf32>
    %c1_77 = arith.constant 1 : index
    %c0_78 = arith.constant 0 : index
    %c0_79 = arith.constant 0 : index
    %119 = vector.load %arg13[%c1_77, %c0_78, %c0_79] : memref<3x1x4xf32, #tpu.memory_space<vmem>>, vector<1x1x4xf32>
    %120 = vector.shape_cast %119 : vector<1x1x4xf32> to vector<1x4xf32>
    %c1_80 = arith.constant 1 : index
    %c0_81 = arith.constant 0 : index
    %c0_82 = arith.constant 0 : index
    %121 = vector.load %arg14[%c1_80, %c0_81, %c0_82] : memref<3x1x4xf32, #tpu.memory_space<vmem>>, vector<1x1x4xf32>
    %122 = vector.shape_cast %121 : vector<1x1x4xf32> to vector<1x4xf32>
    %c1_83 = arith.constant 1 : index
    %c0_84 = arith.constant 0 : index
    %c0_85 = arith.constant 0 : index
    %123 = vector.load %arg15[%c1_83, %c0_84, %c0_85] : memref<3x1x4xf32, #tpu.memory_space<vmem>>, vector<1x1x4xf32>
    %124 = vector.shape_cast %123 : vector<1x1x4xf32> to vector<1x4xf32>
    %c1_86 = arith.constant 1 : index
    %c0_87 = arith.constant 0 : index
    %c0_88 = arith.constant 0 : index
    %125 = vector.load %arg16[%c1_86, %c0_87, %c0_88] : memref<3x1x4xf32, #tpu.memory_space<vmem>>, vector<1x1x4xf32>
    %126 = vector.shape_cast %125 : vector<1x1x4xf32> to vector<1x4xf32>
    %c1_89 = arith.constant 1 : index
    %c0_90 = arith.constant 0 : index
    %c0_91 = arith.constant 0 : index
    %127 = vector.load %arg17[%c1_89, %c0_90, %c0_91] : memref<3x1x4xf32, #tpu.memory_space<vmem>>, vector<1x1x4xf32>
    %128 = vector.shape_cast %127 : vector<1x1x4xf32> to vector<1x4xf32>
    %cst_92 = arith.constant dense<0.000000e+00> : vector<16x12xf32>
    %129 = tpu.matmul %104, %106, %cst_92 {dimension_numbers = #tpu.dot_dimension_numbers<[1], [0], [0], [1], [0, 0, 1, 1], [], []>} : vector<16x4xf32>, vector<4x12xf32>, vector<16x12xf32> -> vector<16x12xf32>
    %130 = vector.broadcast %108 : vector<1x12xf32> to vector<16x12xf32>
    %131 = arith.addf %129, %130 : vector<16x12xf32>
    %132 = vector.extract_strided_slice %131 {offsets = [0, 0], sizes = [16, 4], strides = [1, 1]} : vector<16x12xf32> to vector<16x4xf32>
    %133 = vector.shape_cast %132 : vector<16x4xf32> to vector<2x8x4xf32>
    %134 = vector.extract_strided_slice %131 {offsets = [0, 4], sizes = [16, 4], strides = [1, 1]} : vector<16x12xf32> to vector<16x4xf32>
    %135 = vector.shape_cast %134 : vector<16x4xf32> to vector<2x8x4xf32>
    %136 = vector.extract_strided_slice %131 {offsets = [0, 8], sizes = [16, 4], strides = [1, 1]} : vector<16x12xf32> to vector<16x4xf32>
    %137 = vector.shape_cast %136 : vector<16x4xf32> to vector<2x8x4xf32>
    "tpu.trace_start"() <{level = 10 : i32, message = "bqd,bkd->bqk"}> : () -> ()
    %cst_93 = arith.constant dense<0.000000e+00> : vector<2x8x8xf32>
    %138 = tpu.matmul %133, %135, %cst_93 {dimension_numbers = #tpu.dot_dimension_numbers<[2], [2], [1], [1], [0, 0, 0, 1, 1, 1], [0], [0]>} : vector<2x8x4xf32>, vector<2x8x4xf32>, vector<2x8x8xf32> -> vector<2x8x8xf32>
    "tpu.trace_stop"() : () -> ()
    %139 = arith.addf %138, %3 : vector<2x8x8xf32>
    %cst_94 = arith.constant dense<0xFF800000> : vector<2x8xf32>
    %140 = vector.multi_reduction <maximumf>, %139, %cst_94 [2] : vector<2x8x8xf32> to vector<2x8xf32>
    %141 = vector.shape_cast %140 : vector<2x8xf32> to vector<2x8x1xf32>
    %142 = vector.broadcast %141 : vector<2x8x1xf32> to vector<2x8x8xf32>
    %143 = arith.subf %139, %142 : vector<2x8x8xf32>
    %144 = math.exp %143 : vector<2x8x8xf32>
    %cst_95 = arith.constant dense<0.000000e+00> : vector<2x8xf32>
    %145 = vector.multi_reduction <add>, %144, %cst_95 [2] : vector<2x8x8xf32> to vector<2x8xf32>
    %146 = vector.shape_cast %145 : vector<2x8xf32> to vector<2x8x1xf32>
    %147 = tpu.reciprocal %146 {approx = true} : vector<2x8x1xf32> -> vector<2x8x1xf32>
    %148 = vector.broadcast %147 : vector<2x8x1xf32> to vector<2x8x8xf32>
    %149 = arith.mulf %144, %148 : vector<2x8x8xf32>
    "tpu.trace_start"() <{level = 10 : i32, message = "bqk,bkd->bqd"}> : () -> ()
    %cst_96 = arith.constant dense<0.000000e+00> : vector<2x8x4xf32>
    %150 = tpu.matmul %149, %137, %cst_96 {dimension_numbers = #tpu.dot_dimension_numbers<[2], [1], [1], [2], [0, 0, 0, 1, 1, 2], [0], [0]>} : vector<2x8x8xf32>, vector<2x8x4xf32>, vector<2x8x4xf32> -> vector<2x8x4xf32>
    "tpu.trace_stop"() : () -> ()
    %151 = vector.shape_cast %150 : vector<2x8x4xf32> to vector<16x4xf32>
    %cst_97 = arith.constant dense<0.000000e+00> : vector<16x4xf32>
    %152 = tpu.matmul %151, %110, %cst_97 {dimension_numbers = #tpu.dot_dimension_numbers<[1], [0], [0], [1], [0, 0, 1, 1], [], []>} : vector<16x4xf32>, vector<4x4xf32>, vector<16x4xf32> -> vector<16x4xf32>
    %153 = arith.addf %104, %152 : vector<16x4xf32>
    %154 = vector.broadcast %112 : vector<1x4xf32> to vector<16x4xf32>
    %155 = arith.addf %153, %154 : vector<16x4xf32>
    %cst_98 = arith.constant dense<0.000000e+00> : vector<16xf32>
    %156 = vector.multi_reduction <add>, %155, %cst_98 [1] : vector<16x4xf32> to vector<16xf32>
    %157 = vector.shape_cast %156 : vector<16xf32> to vector<16x1xf32>
    %cst_99 = arith.constant 4.000000e+00 : f32
    %158 = vector.broadcast %cst_99 : f32 to vector<16x1xf32>
    %159 = arith.divf %157, %158 : vector<16x1xf32>
    %160 = vector.broadcast %159 : vector<16x1xf32> to vector<16x4xf32>
    %161 = arith.subf %155, %160 : vector<16x4xf32>
    %162 = arith.mulf %161, %161 : vector<16x4xf32>
    %cst_100 = arith.constant dense<0.000000e+00> : vector<16xf32>
    %163 = vector.multi_reduction <add>, %162, %cst_100 [1] : vector<16x4xf32> to vector<16xf32>
    %164 = vector.shape_cast %163 : vector<16xf32> to vector<16x1xf32>
    %cst_101 = arith.constant 4.000000e+00 : f32
    %165 = vector.broadcast %cst_101 : f32 to vector<16x1xf32>
    %166 = arith.divf %164, %165 : vector<16x1xf32>
    %cst_102 = arith.constant 9.99999974E-6 : f32
    %167 = vector.broadcast %cst_102 : f32 to vector<16x1xf32>
    %168 = arith.addf %166, %167 : vector<16x1xf32>
    %169 = math.rsqrt %168 : vector<16x1xf32>
    %170 = vector.broadcast %169 : vector<16x1xf32> to vector<16x4xf32>
    %171 = arith.mulf %161, %170 : vector<16x4xf32>
    %172 = vector.broadcast %122 : vector<1x4xf32> to vector<16x4xf32>
    %173 = arith.mulf %171, %172 : vector<16x4xf32>
    %174 = vector.broadcast %124 : vector<1x4xf32> to vector<16x4xf32>
    %175 = arith.addf %173, %174 : vector<16x4xf32>
    %cst_103 = arith.constant dense<0.000000e+00> : vector<16x32xf32>
    %176 = tpu.matmul %175, %114, %cst_103 {dimension_numbers = #tpu.dot_dimension_numbers<[1], [0], [0], [1], [0, 0, 1, 1], [], []>} : vector<16x4xf32>, vector<4x32xf32>, vector<16x32xf32> -> vector<16x32xf32>
    %177 = vector.broadcast %116 : vector<1x32xf32> to vector<16x32xf32>
    %178 = arith.addf %176, %177 : vector<16x32xf32>
    %cst_104 = arith.constant 0.000000e+00 : f32
    %179 = vector.broadcast %cst_104 : f32 to vector<16x32xf32>
    %180 = arith.maximumf %178, %179 : vector<16x32xf32>
    %cst_105 = arith.constant dense<0.000000e+00> : vector<16x4xf32>
    %181 = tpu.matmul %180, %118, %cst_105 {dimension_numbers = #tpu.dot_dimension_numbers<[1], [0], [0], [1], [0, 0, 1, 1], [], []>} : vector<16x32xf32>, vector<32x4xf32>, vector<16x4xf32> -> vector<16x4xf32>
    %182 = arith.addf %175, %181 : vector<16x4xf32>
    %183 = vector.broadcast %120 : vector<1x4xf32> to vector<16x4xf32>
    %184 = arith.addf %182, %183 : vector<16x4xf32>
    %cst_106 = arith.constant dense<0.000000e+00> : vector<16xf32>
    %185 = vector.multi_reduction <add>, %184, %cst_106 [1] : vector<16x4xf32> to vector<16xf32>
    %186 = vector.shape_cast %185 : vector<16xf32> to vector<16x1xf32>
    %cst_107 = arith.constant 4.000000e+00 : f32
    %187 = vector.broadcast %cst_107 : f32 to vector<16x1xf32>
    %188 = arith.divf %186, %187 : vector<16x1xf32>
    %189 = vector.broadcast %188 : vector<16x1xf32> to vector<16x4xf32>
    %190 = arith.subf %184, %189 : vector<16x4xf32>
    %191 = arith.mulf %190, %190 : vector<16x4xf32>
    %cst_108 = arith.constant dense<0.000000e+00> : vector<16xf32>
    %192 = vector.multi_reduction <add>, %191, %cst_108 [1] : vector<16x4xf32> to vector<16xf32>
    %193 = vector.shape_cast %192 : vector<16xf32> to vector<16x1xf32>
    %cst_109 = arith.constant 4.000000e+00 : f32
    %194 = vector.broadcast %cst_109 : f32 to vector<16x1xf32>
    %195 = arith.divf %193, %194 : vector<16x1xf32>
    %cst_110 = arith.constant 9.99999974E-6 : f32
    %196 = vector.broadcast %cst_110 : f32 to vector<16x1xf32>
    %197 = arith.addf %195, %196 : vector<16x1xf32>
    %198 = math.rsqrt %197 : vector<16x1xf32>
    %199 = vector.broadcast %198 : vector<16x1xf32> to vector<16x4xf32>
    %200 = arith.mulf %190, %199 : vector<16x4xf32>
    %201 = vector.broadcast %126 : vector<1x4xf32> to vector<16x4xf32>
    %202 = arith.mulf %200, %201 : vector<16x4xf32>
    %203 = vector.broadcast %128 : vector<1x4xf32> to vector<16x4xf32>
    %204 = arith.addf %202, %203 : vector<16x4xf32>
    %c2 = arith.constant 2 : index
    %c0_111 = arith.constant 0 : index
    %c0_112 = arith.constant 0 : index
    %205 = vector.load %arg6[%c2, %c0_111, %c0_112] : memref<3x4x12xf32, #tpu.memory_space<vmem>>, vector<1x4x12xf32>
    %206 = vector.shape_cast %205 : vector<1x4x12xf32> to vector<4x12xf32>
    %c2_113 = arith.constant 2 : index
    %c0_114 = arith.constant 0 : index
    %c0_115 = arith.constant 0 : index
    %207 = vector.load %arg7[%c2_113, %c0_114, %c0_115] : memref<3x1x12xf32, #tpu.memory_space<vmem>>, vector<1x1x12xf32>
    %208 = vector.shape_cast %207 : vector<1x1x12xf32> to vector<1x12xf32>
    %cst_116 = arith.constant dense<0.000000e+00> : vector<16x12xf32>
    %209 = tpu.matmul %204, %206, %cst_116 {dimension_numbers = #tpu.dot_dimension_numbers<[1], [0], [0], [1], [0, 0, 1, 1], [], []>} : vector<16x4xf32>, vector<4x12xf32>, vector<16x12xf32> -> vector<16x12xf32>
    %210 = vector.broadcast %208 : vector<1x12xf32> to vector<16x12xf32>
    %211 = arith.addf %209, %210 : vector<16x12xf32>
    %212 = vector.extract_strided_slice %211 {offsets = [0, 0], sizes = [16, 4], strides = [1, 1]} : vector<16x12xf32> to vector<16x4xf32>
    %213 = vector.shape_cast %212 : vector<16x4xf32> to vector<2x8x4xf32>
    %214 = vector.extract_strided_slice %211 {offsets = [0, 4], sizes = [16, 4], strides = [1, 1]} : vector<16x12xf32> to vector<16x4xf32>
    %215 = vector.shape_cast %214 : vector<16x4xf32> to vector<2x8x4xf32>
    "tpu.trace_start"() <{level = 10 : i32, message = "bqd,bkd->bqk"}> : () -> ()
    %cst_117 = arith.constant dense<0.000000e+00> : vector<2x8x8xf32>
    %216 = tpu.matmul %213, %215, %cst_117 {dimension_numbers = #tpu.dot_dimension_numbers<[2], [2], [1], [1], [0, 0, 0, 1, 1, 1], [0], [0]>} : vector<2x8x4xf32>, vector<2x8x4xf32>, vector<2x8x8xf32> -> vector<2x8x8xf32>
    "tpu.trace_stop"() : () -> ()
    %217 = arith.addf %216, %3 : vector<2x8x8xf32>
    %cst_118 = arith.constant dense<0xFF800000> : vector<2x8xf32>
    %218 = vector.multi_reduction <maximumf>, %217, %cst_118 [2] : vector<2x8x8xf32> to vector<2x8xf32>
    %219 = vector.shape_cast %218 : vector<2x8xf32> to vector<2x8x1xf32>
    %220 = vector.broadcast %219 : vector<2x8x1xf32> to vector<2x8x8xf32>
    %221 = arith.subf %217, %220 : vector<2x8x8xf32>
    %222 = math.exp %221 : vector<2x8x8xf32>
    %cst_119 = arith.constant dense<0.000000e+00> : vector<2x8xf32>
    %223 = vector.multi_reduction <add>, %222, %cst_119 [2] : vector<2x8x8xf32> to vector<2x8xf32>
    %224 = vector.shape_cast %223 : vector<2x8xf32> to vector<2x8x1xf32>
    %225 = vector.broadcast %224 : vector<2x8x1xf32> to vector<2x8x8xf32>
    %226 = arith.divf %222, %225 : vector<2x8x8xf32>
    %cst_120 = arith.constant 1.000000e+00 : f32
    %227 = vector.broadcast %cst_120 : f32 to vector<2x8x8xf32>
    %228 = arith.mulf %226, %227 : vector<2x8x8xf32>
    %c0_121 = arith.constant 0 : index
    %c0_122 = arith.constant 0 : index
    %229 = vector.load %arg5[%c0_121, %c0_122] : memref<1x1xf32, #tpu.memory_space<vmem>>, vector<1x1xf32>
    %230 = vector.extract %229[0, 0] : f32 from vector<1x1xf32>
    %231 = vector.broadcast %230 : f32 to vector<2x8x8xf32>
    %232 = arith.mulf %228, %231 : vector<2x8x8xf32>
    %233 = vector.extract_strided_slice %232 {offsets = [0, 0, 0], sizes = [1, 8, 8], strides = [1, 1, 1]} : vector<2x8x8xf32> to vector<1x8x8xf32>
    %234 = vector.extract_strided_slice %232 {offsets = [0, 0, 0], sizes = [1, 8, 8], strides = [1, 1, 1]} : vector<2x8x8xf32> to vector<1x8x8xf32>
    %235 = tpu.concatenate %233, %234 in 0 : vector<1x8x8xf32>, vector<1x8x8xf32> -> vector<2x8x8xf32>
    %236 = vector.extract_strided_slice %232 {offsets = [1, 0, 0], sizes = [1, 8, 8], strides = [1, 1, 1]} : vector<2x8x8xf32> to vector<1x8x8xf32>
    %237 = vector.extract_strided_slice %232 {offsets = [1, 0, 0], sizes = [1, 8, 8], strides = [1, 1, 1]} : vector<2x8x8xf32> to vector<1x8x8xf32>
    %238 = tpu.concatenate %236, %237 in 0 : vector<1x8x8xf32>, vector<1x8x8xf32> -> vector<2x8x8xf32>
    %c0_123 = arith.constant 0 : index
    %c0_124 = arith.constant 0 : index
    %239 = vector.load %arg2[%c0_123, %c0_124] : memref<16x16xf32, #tpu.memory_space<vmem>>, vector<16x16xf32>
    %c0_125 = arith.constant 0 : index
    %c0_126 = arith.constant 0 : index
    %c0_127 = arith.constant 0 : index
    %240 = vector.load %arg18[%c0_125, %c0_126, %c0_127] : memref<2x16x48xf32, #tpu.memory_space<vmem>>, vector<1x16x48xf32>
    %241 = vector.shape_cast %240 : vector<1x16x48xf32> to vector<16x48xf32>
    %c0_128 = arith.constant 0 : index
    %c0_129 = arith.constant 0 : index
    %c0_130 = arith.constant 0 : index
    %242 = vector.load %arg19[%c0_128, %c0_129, %c0_130] : memref<2x1x48xf32, #tpu.memory_space<vmem>>, vector<1x1x48xf32>
    %243 = vector.shape_cast %242 : vector<1x1x48xf32> to vector<1x48xf32>
    %c0_131 = arith.constant 0 : index
    %c0_132 = arith.constant 0 : index
    %c0_133 = arith.constant 0 : index
    %244 = vector.load %arg20[%c0_131, %c0_132, %c0_133] : memref<2x16x16xf32, #tpu.memory_space<vmem>>, vector<1x16x16xf32>
    %245 = vector.shape_cast %244 : vector<1x16x16xf32> to vector<16x16xf32>
    %c0_134 = arith.constant 0 : index
    %c0_135 = arith.constant 0 : index
    %c0_136 = arith.constant 0 : index
    %246 = vector.load %arg21[%c0_134, %c0_135, %c0_136] : memref<2x1x16xf32, #tpu.memory_space<vmem>>, vector<1x1x16xf32>
    %247 = vector.shape_cast %246 : vector<1x1x16xf32> to vector<1x16xf32>
    %c0_137 = arith.constant 0 : index
    %c0_138 = arith.constant 0 : index
    %c0_139 = arith.constant 0 : index
    %248 = vector.load %arg22[%c0_137, %c0_138, %c0_139] : memref<2x16x32xf32, #tpu.memory_space<vmem>>, vector<1x16x32xf32>
    %249 = vector.shape_cast %248 : vector<1x16x32xf32> to vector<16x32xf32>
    %c0_140 = arith.constant 0 : index
    %c0_141 = arith.constant 0 : index
    %c0_142 = arith.constant 0 : index
    %250 = vector.load %arg23[%c0_140, %c0_141, %c0_142] : memref<2x1x32xf32, #tpu.memory_space<vmem>>, vector<1x1x32xf32>
    %251 = vector.shape_cast %250 : vector<1x1x32xf32> to vector<1x32xf32>
    %c0_143 = arith.constant 0 : index
    %c0_144 = arith.constant 0 : index
    %c0_145 = arith.constant 0 : index
    %252 = vector.load %arg24[%c0_143, %c0_144, %c0_145] : memref<2x32x16xf32, #tpu.memory_space<vmem>>, vector<1x32x16xf32>
    %253 = vector.shape_cast %252 : vector<1x32x16xf32> to vector<32x16xf32>
    %c0_146 = arith.constant 0 : index
    %c0_147 = arith.constant 0 : index
    %c0_148 = arith.constant 0 : index
    %254 = vector.load %arg25[%c0_146, %c0_147, %c0_148] : memref<2x1x16xf32, #tpu.memory_space<vmem>>, vector<1x1x16xf32>
    %255 = vector.shape_cast %254 : vector<1x1x16xf32> to vector<1x16xf32>
    %c0_149 = arith.constant 0 : index
    %c0_150 = arith.constant 0 : index
    %c0_151 = arith.constant 0 : index
    %256 = vector.load %arg26[%c0_149, %c0_150, %c0_151] : memref<2x1x16xf32, #tpu.memory_space<vmem>>, vector<1x1x16xf32>
    %257 = vector.shape_cast %256 : vector<1x1x16xf32> to vector<1x16xf32>
    %c0_152 = arith.constant 0 : index
    %c0_153 = arith.constant 0 : index
    %c0_154 = arith.constant 0 : index
    %258 = vector.load %arg27[%c0_152, %c0_153, %c0_154] : memref<2x1x16xf32, #tpu.memory_space<vmem>>, vector<1x1x16xf32>
    %259 = vector.shape_cast %258 : vector<1x1x16xf32> to vector<1x16xf32>
    %c0_155 = arith.constant 0 : index
    %c0_156 = arith.constant 0 : index
    %c0_157 = arith.constant 0 : index
    %260 = vector.load %arg28[%c0_155, %c0_156, %c0_157] : memref<2x1x16xf32, #tpu.memory_space<vmem>>, vector<1x1x16xf32>
    %261 = vector.shape_cast %260 : vector<1x1x16xf32> to vector<1x16xf32>
    %c0_158 = arith.constant 0 : index
    %c0_159 = arith.constant 0 : index
    %c0_160 = arith.constant 0 : index
    %262 = vector.load %arg29[%c0_158, %c0_159, %c0_160] : memref<2x1x16xf32, #tpu.memory_space<vmem>>, vector<1x1x16xf32>
    %263 = vector.shape_cast %262 : vector<1x1x16xf32> to vector<1x16xf32>
    %cst_161 = arith.constant dense<0.000000e+00> : vector<16x48xf32>
    %264 = tpu.matmul %239, %241, %cst_161 {dimension_numbers = #tpu.dot_dimension_numbers<[1], [0], [0], [1], [0, 0, 1, 1], [], []>} : vector<16x16xf32>, vector<16x48xf32>, vector<16x48xf32> -> vector<16x48xf32>
    %265 = vector.broadcast %243 : vector<1x48xf32> to vector<16x48xf32>
    %266 = arith.addf %264, %265 : vector<16x48xf32>
    %267 = vector.extract_strided_slice %266 {offsets = [0, 0], sizes = [16, 8], strides = [1, 1]} : vector<16x48xf32> to vector<16x8xf32>
    %268 = vector.shape_cast %267 : vector<16x8xf32> to vector<2x8x8xf32>
    %269 = vector.extract_strided_slice %266 {offsets = [0, 16], sizes = [16, 8], strides = [1, 1]} : vector<16x48xf32> to vector<16x8xf32>
    %270 = vector.shape_cast %269 : vector<16x8xf32> to vector<2x8x8xf32>
    %271 = vector.extract_strided_slice %266 {offsets = [0, 32], sizes = [16, 8], strides = [1, 1]} : vector<16x48xf32> to vector<16x8xf32>
    %272 = vector.shape_cast %271 : vector<16x8xf32> to vector<2x8x8xf32>
    "tpu.trace_start"() <{level = 10 : i32, message = "bqd,bkd->bqk"}> : () -> ()
    %cst_162 = arith.constant dense<0.000000e+00> : vector<2x8x8xf32>
    %273 = tpu.matmul %268, %270, %cst_162 {dimension_numbers = #tpu.dot_dimension_numbers<[2], [2], [1], [1], [0, 0, 0, 1, 1, 1], [0], [0]>} : vector<2x8x8xf32>, vector<2x8x8xf32>, vector<2x8x8xf32> -> vector<2x8x8xf32>
    "tpu.trace_stop"() : () -> ()
    %274 = arith.addf %273, %3 : vector<2x8x8xf32>
    %275 = arith.addf %274, %235 : vector<2x8x8xf32>
    %cst_163 = arith.constant dense<0xFF800000> : vector<2x8xf32>
    %276 = vector.multi_reduction <maximumf>, %275, %cst_163 [2] : vector<2x8x8xf32> to vector<2x8xf32>
    %277 = vector.shape_cast %276 : vector<2x8xf32> to vector<2x8x1xf32>
    %278 = vector.broadcast %277 : vector<2x8x1xf32> to vector<2x8x8xf32>
    %279 = arith.subf %275, %278 : vector<2x8x8xf32>
    %280 = math.exp %279 : vector<2x8x8xf32>
    %cst_164 = arith.constant dense<0.000000e+00> : vector<2x8xf32>
    %281 = vector.multi_reduction <add>, %280, %cst_164 [2] : vector<2x8x8xf32> to vector<2x8xf32>
    %282 = vector.shape_cast %281 : vector<2x8xf32> to vector<2x8x1xf32>
    %283 = tpu.reciprocal %282 {approx = true} : vector<2x8x1xf32> -> vector<2x8x1xf32>
    %284 = vector.broadcast %283 : vector<2x8x1xf32> to vector<2x8x8xf32>
    %285 = arith.mulf %280, %284 : vector<2x8x8xf32>
    "tpu.trace_start"() <{level = 10 : i32, message = "bqk,bkd->bqd"}> : () -> ()
    %cst_165 = arith.constant dense<0.000000e+00> : vector<2x8x8xf32>
    %286 = tpu.matmul %285, %272, %cst_165 {dimension_numbers = #tpu.dot_dimension_numbers<[2], [1], [1], [2], [0, 0, 0, 1, 1, 2], [0], [0]>} : vector<2x8x8xf32>, vector<2x8x8xf32>, vector<2x8x8xf32> -> vector<2x8x8xf32>
    "tpu.trace_stop"() : () -> ()
    %287 = vector.extract_strided_slice %266 {offsets = [0, 8], sizes = [16, 8], strides = [1, 1]} : vector<16x48xf32> to vector<16x8xf32>
    %288 = vector.shape_cast %287 : vector<16x8xf32> to vector<2x8x8xf32>
    %289 = vector.extract_strided_slice %266 {offsets = [0, 24], sizes = [16, 8], strides = [1, 1]} : vector<16x48xf32> to vector<16x8xf32>
    %290 = vector.shape_cast %289 : vector<16x8xf32> to vector<2x8x8xf32>
    %291 = vector.extract_strided_slice %266 {offsets = [0, 40], sizes = [16, 8], strides = [1, 1]} : vector<16x48xf32> to vector<16x8xf32>
    %292 = vector.shape_cast %291 : vector<16x8xf32> to vector<2x8x8xf32>
    "tpu.trace_start"() <{level = 10 : i32, message = "bqd,bkd->bqk"}> : () -> ()
    %cst_166 = arith.constant dense<0.000000e+00> : vector<2x8x8xf32>
    %293 = tpu.matmul %288, %290, %cst_166 {dimension_numbers = #tpu.dot_dimension_numbers<[2], [2], [1], [1], [0, 0, 0, 1, 1, 1], [0], [0]>} : vector<2x8x8xf32>, vector<2x8x8xf32>, vector<2x8x8xf32> -> vector<2x8x8xf32>
    "tpu.trace_stop"() : () -> ()
    %294 = arith.addf %293, %3 : vector<2x8x8xf32>
    %295 = arith.addf %294, %238 : vector<2x8x8xf32>
    %cst_167 = arith.constant dense<0xFF800000> : vector<2x8xf32>
    %296 = vector.multi_reduction <maximumf>, %295, %cst_167 [2] : vector<2x8x8xf32> to vector<2x8xf32>
    %297 = vector.shape_cast %296 : vector<2x8xf32> to vector<2x8x1xf32>
    %298 = vector.broadcast %297 : vector<2x8x1xf32> to vector<2x8x8xf32>
    %299 = arith.subf %295, %298 : vector<2x8x8xf32>
    %300 = math.exp %299 : vector<2x8x8xf32>
    %cst_168 = arith.constant dense<0.000000e+00> : vector<2x8xf32>
    %301 = vector.multi_reduction <add>, %300, %cst_168 [2] : vector<2x8x8xf32> to vector<2x8xf32>
    %302 = vector.shape_cast %301 : vector<2x8xf32> to vector<2x8x1xf32>
    %303 = tpu.reciprocal %302 {approx = true} : vector<2x8x1xf32> -> vector<2x8x1xf32>
    %304 = vector.broadcast %303 : vector<2x8x1xf32> to vector<2x8x8xf32>
    %305 = arith.mulf %300, %304 : vector<2x8x8xf32>
    "tpu.trace_start"() <{level = 10 : i32, message = "bqk,bkd->bqd"}> : () -> ()
    %cst_169 = arith.constant dense<0.000000e+00> : vector<2x8x8xf32>
    %306 = tpu.matmul %305, %292, %cst_169 {dimension_numbers = #tpu.dot_dimension_numbers<[2], [1], [1], [2], [0, 0, 0, 1, 1, 2], [0], [0]>} : vector<2x8x8xf32>, vector<2x8x8xf32>, vector<2x8x8xf32> -> vector<2x8x8xf32>
    "tpu.trace_stop"() : () -> ()
    %307 = tpu.concatenate %286, %306 in 2 : vector<2x8x8xf32>, vector<2x8x8xf32> -> vector<2x8x16xf32>
    %308 = vector.shape_cast %307 : vector<2x8x16xf32> to vector<16x16xf32>
    %cst_170 = arith.constant dense<0.000000e+00> : vector<16x16xf32>
    %309 = tpu.matmul %308, %245, %cst_170 {dimension_numbers = #tpu.dot_dimension_numbers<[1], [0], [0], [1], [0, 0, 1, 1], [], []>} : vector<16x16xf32>, vector<16x16xf32>, vector<16x16xf32> -> vector<16x16xf32>
    %310 = arith.addf %239, %309 : vector<16x16xf32>
    %311 = vector.broadcast %247 : vector<1x16xf32> to vector<16x16xf32>
    %312 = arith.addf %310, %311 : vector<16x16xf32>
    %cst_171 = arith.constant dense<0.000000e+00> : vector<16xf32>
    %313 = vector.multi_reduction <add>, %312, %cst_171 [1] : vector<16x16xf32> to vector<16xf32>
    %314 = vector.shape_cast %313 : vector<16xf32> to vector<16x1xf32>
    %cst_172 = arith.constant 1.600000e+01 : f32
    %315 = vector.broadcast %cst_172 : f32 to vector<16x1xf32>
    %316 = arith.divf %314, %315 : vector<16x1xf32>
    %317 = vector.broadcast %316 : vector<16x1xf32> to vector<16x16xf32>
    %318 = arith.subf %312, %317 : vector<16x16xf32>
    %319 = arith.mulf %318, %318 : vector<16x16xf32>
    %cst_173 = arith.constant dense<0.000000e+00> : vector<16xf32>
    %320 = vector.multi_reduction <add>, %319, %cst_173 [1] : vector<16x16xf32> to vector<16xf32>
    %321 = vector.shape_cast %320 : vector<16xf32> to vector<16x1xf32>
    %cst_174 = arith.constant 1.600000e+01 : f32
    %322 = vector.broadcast %cst_174 : f32 to vector<16x1xf32>
    %323 = arith.divf %321, %322 : vector<16x1xf32>
    %cst_175 = arith.constant 9.99999974E-6 : f32
    %324 = vector.broadcast %cst_175 : f32 to vector<16x1xf32>
    %325 = arith.addf %323, %324 : vector<16x1xf32>
    %326 = math.rsqrt %325 : vector<16x1xf32>
    %327 = vector.broadcast %326 : vector<16x1xf32> to vector<16x16xf32>
    %328 = arith.mulf %318, %327 : vector<16x16xf32>
    %329 = vector.broadcast %257 : vector<1x16xf32> to vector<16x16xf32>
    %330 = arith.mulf %328, %329 : vector<16x16xf32>
    %331 = vector.broadcast %259 : vector<1x16xf32> to vector<16x16xf32>
    %332 = arith.addf %330, %331 : vector<16x16xf32>
    %cst_176 = arith.constant dense<0.000000e+00> : vector<16x32xf32>
    %333 = tpu.matmul %332, %249, %cst_176 {dimension_numbers = #tpu.dot_dimension_numbers<[1], [0], [0], [1], [0, 0, 1, 1], [], []>} : vector<16x16xf32>, vector<16x32xf32>, vector<16x32xf32> -> vector<16x32xf32>
    %334 = vector.broadcast %251 : vector<1x32xf32> to vector<16x32xf32>
    %335 = arith.addf %333, %334 : vector<16x32xf32>
    %cst_177 = arith.constant 0.000000e+00 : f32
    %336 = vector.broadcast %cst_177 : f32 to vector<16x32xf32>
    %337 = arith.maximumf %335, %336 : vector<16x32xf32>
    %cst_178 = arith.constant dense<0.000000e+00> : vector<16x16xf32>
    %338 = tpu.matmul %337, %253, %cst_178 {dimension_numbers = #tpu.dot_dimension_numbers<[1], [0], [0], [1], [0, 0, 1, 1], [], []>} : vector<16x32xf32>, vector<32x16xf32>, vector<16x16xf32> -> vector<16x16xf32>
    %339 = arith.addf %332, %338 : vector<16x16xf32>
    %340 = vector.broadcast %255 : vector<1x16xf32> to vector<16x16xf32>
    %341 = arith.addf %339, %340 : vector<16x16xf32>
    %cst_179 = arith.constant dense<0.000000e+00> : vector<16xf32>
    %342 = vector.multi_reduction <add>, %341, %cst_179 [1] : vector<16x16xf32> to vector<16xf32>
    %343 = vector.shape_cast %342 : vector<16xf32> to vector<16x1xf32>
    %cst_180 = arith.constant 1.600000e+01 : f32
    %344 = vector.broadcast %cst_180 : f32 to vector<16x1xf32>
    %345 = arith.divf %343, %344 : vector<16x1xf32>
    %346 = vector.broadcast %345 : vector<16x1xf32> to vector<16x16xf32>
    %347 = arith.subf %341, %346 : vector<16x16xf32>
    %348 = arith.mulf %347, %347 : vector<16x16xf32>
    %cst_181 = arith.constant dense<0.000000e+00> : vector<16xf32>
    %349 = vector.multi_reduction <add>, %348, %cst_181 [1] : vector<16x16xf32> to vector<16xf32>
    %350 = vector.shape_cast %349 : vector<16xf32> to vector<16x1xf32>
    %cst_182 = arith.constant 1.600000e+01 : f32
    %351 = vector.broadcast %cst_182 : f32 to vector<16x1xf32>
    %352 = arith.divf %350, %351 : vector<16x1xf32>
    %cst_183 = arith.constant 9.99999974E-6 : f32
    %353 = vector.broadcast %cst_183 : f32 to vector<16x1xf32>
    %354 = arith.addf %352, %353 : vector<16x1xf32>
    %355 = math.rsqrt %354 : vector<16x1xf32>
    %356 = vector.broadcast %355 : vector<16x1xf32> to vector<16x16xf32>
    %357 = arith.mulf %347, %356 : vector<16x16xf32>
    %358 = vector.broadcast %261 : vector<1x16xf32> to vector<16x16xf32>
    %359 = arith.mulf %357, %358 : vector<16x16xf32>
    %360 = vector.broadcast %263 : vector<1x16xf32> to vector<16x16xf32>
    %361 = arith.addf %359, %360 : vector<16x16xf32>
    %c1_184 = arith.constant 1 : index
    %c0_185 = arith.constant 0 : index
    %c0_186 = arith.constant 0 : index
    %362 = vector.load %arg18[%c1_184, %c0_185, %c0_186] : memref<2x16x48xf32, #tpu.memory_space<vmem>>, vector<1x16x48xf32>
    %363 = vector.shape_cast %362 : vector<1x16x48xf32> to vector<16x48xf32>
    %c1_187 = arith.constant 1 : index
    %c0_188 = arith.constant 0 : index
    %c0_189 = arith.constant 0 : index
    %364 = vector.load %arg19[%c1_187, %c0_188, %c0_189] : memref<2x1x48xf32, #tpu.memory_space<vmem>>, vector<1x1x48xf32>
    %365 = vector.shape_cast %364 : vector<1x1x48xf32> to vector<1x48xf32>
    %c1_190 = arith.constant 1 : index
    %c0_191 = arith.constant 0 : index
    %c0_192 = arith.constant 0 : index
    %366 = vector.load %arg20[%c1_190, %c0_191, %c0_192] : memref<2x16x16xf32, #tpu.memory_space<vmem>>, vector<1x16x16xf32>
    %367 = vector.shape_cast %366 : vector<1x16x16xf32> to vector<16x16xf32>
    %c1_193 = arith.constant 1 : index
    %c0_194 = arith.constant 0 : index
    %c0_195 = arith.constant 0 : index
    %368 = vector.load %arg21[%c1_193, %c0_194, %c0_195] : memref<2x1x16xf32, #tpu.memory_space<vmem>>, vector<1x1x16xf32>
    %369 = vector.shape_cast %368 : vector<1x1x16xf32> to vector<1x16xf32>
    %c1_196 = arith.constant 1 : index
    %c0_197 = arith.constant 0 : index
    %c0_198 = arith.constant 0 : index
    %370 = vector.load %arg22[%c1_196, %c0_197, %c0_198] : memref<2x16x32xf32, #tpu.memory_space<vmem>>, vector<1x16x32xf32>
    %371 = vector.shape_cast %370 : vector<1x16x32xf32> to vector<16x32xf32>
    %c1_199 = arith.constant 1 : index
    %c0_200 = arith.constant 0 : index
    %c0_201 = arith.constant 0 : index
    %372 = vector.load %arg23[%c1_199, %c0_200, %c0_201] : memref<2x1x32xf32, #tpu.memory_space<vmem>>, vector<1x1x32xf32>
    %373 = vector.shape_cast %372 : vector<1x1x32xf32> to vector<1x32xf32>
    %c1_202 = arith.constant 1 : index
    %c0_203 = arith.constant 0 : index
    %c0_204 = arith.constant 0 : index
    %374 = vector.load %arg24[%c1_202, %c0_203, %c0_204] : memref<2x32x16xf32, #tpu.memory_space<vmem>>, vector<1x32x16xf32>
    %375 = vector.shape_cast %374 : vector<1x32x16xf32> to vector<32x16xf32>
    %c1_205 = arith.constant 1 : index
    %c0_206 = arith.constant 0 : index
    %c0_207 = arith.constant 0 : index
    %376 = vector.load %arg25[%c1_205, %c0_206, %c0_207] : memref<2x1x16xf32, #tpu.memory_space<vmem>>, vector<1x1x16xf32>
    %377 = vector.shape_cast %376 : vector<1x1x16xf32> to vector<1x16xf32>
    %c1_208 = arith.constant 1 : index
    %c0_209 = arith.constant 0 : index
    %c0_210 = arith.constant 0 : index
    %378 = vector.load %arg26[%c1_208, %c0_209, %c0_210] : memref<2x1x16xf32, #tpu.memory_space<vmem>>, vector<1x1x16xf32>
    %379 = vector.shape_cast %378 : vector<1x1x16xf32> to vector<1x16xf32>
    %c1_211 = arith.constant 1 : index
    %c0_212 = arith.constant 0 : index
    %c0_213 = arith.constant 0 : index
    %380 = vector.load %arg27[%c1_211, %c0_212, %c0_213] : memref<2x1x16xf32, #tpu.memory_space<vmem>>, vector<1x1x16xf32>
    %381 = vector.shape_cast %380 : vector<1x1x16xf32> to vector<1x16xf32>
    %c1_214 = arith.constant 1 : index
    %c0_215 = arith.constant 0 : index
    %c0_216 = arith.constant 0 : index
    %382 = vector.load %arg28[%c1_214, %c0_215, %c0_216] : memref<2x1x16xf32, #tpu.memory_space<vmem>>, vector<1x1x16xf32>
    %383 = vector.shape_cast %382 : vector<1x1x16xf32> to vector<1x16xf32>
    %c1_217 = arith.constant 1 : index
    %c0_218 = arith.constant 0 : index
    %c0_219 = arith.constant 0 : index
    %384 = vector.load %arg29[%c1_217, %c0_218, %c0_219] : memref<2x1x16xf32, #tpu.memory_space<vmem>>, vector<1x1x16xf32>
    %385 = vector.shape_cast %384 : vector<1x1x16xf32> to vector<1x16xf32>
    %cst_220 = arith.constant dense<0.000000e+00> : vector<16x48xf32>
    %386 = tpu.matmul %361, %363, %cst_220 {dimension_numbers = #tpu.dot_dimension_numbers<[1], [0], [0], [1], [0, 0, 1, 1], [], []>} : vector<16x16xf32>, vector<16x48xf32>, vector<16x48xf32> -> vector<16x48xf32>
    %387 = vector.broadcast %365 : vector<1x48xf32> to vector<16x48xf32>
    %388 = arith.addf %386, %387 : vector<16x48xf32>
    %389 = vector.extract_strided_slice %388 {offsets = [0, 0], sizes = [16, 8], strides = [1, 1]} : vector<16x48xf32> to vector<16x8xf32>
    %390 = vector.shape_cast %389 : vector<16x8xf32> to vector<2x8x8xf32>
    %391 = vector.extract_strided_slice %388 {offsets = [0, 16], sizes = [16, 8], strides = [1, 1]} : vector<16x48xf32> to vector<16x8xf32>
    %392 = vector.shape_cast %391 : vector<16x8xf32> to vector<2x8x8xf32>
    %393 = vector.extract_strided_slice %388 {offsets = [0, 32], sizes = [16, 8], strides = [1, 1]} : vector<16x48xf32> to vector<16x8xf32>
    %394 = vector.shape_cast %393 : vector<16x8xf32> to vector<2x8x8xf32>
    "tpu.trace_start"() <{level = 10 : i32, message = "bqd,bkd->bqk"}> : () -> ()
    %cst_221 = arith.constant dense<0.000000e+00> : vector<2x8x8xf32>
    %395 = tpu.matmul %390, %392, %cst_221 {dimension_numbers = #tpu.dot_dimension_numbers<[2], [2], [1], [1], [0, 0, 0, 1, 1, 1], [0], [0]>} : vector<2x8x8xf32>, vector<2x8x8xf32>, vector<2x8x8xf32> -> vector<2x8x8xf32>
    "tpu.trace_stop"() : () -> ()
    %396 = arith.addf %395, %3 : vector<2x8x8xf32>
    %397 = arith.addf %396, %235 : vector<2x8x8xf32>
    %cst_222 = arith.constant dense<0xFF800000> : vector<2x8xf32>
    %398 = vector.multi_reduction <maximumf>, %397, %cst_222 [2] : vector<2x8x8xf32> to vector<2x8xf32>
    %399 = vector.shape_cast %398 : vector<2x8xf32> to vector<2x8x1xf32>
    %400 = vector.broadcast %399 : vector<2x8x1xf32> to vector<2x8x8xf32>
    %401 = arith.subf %397, %400 : vector<2x8x8xf32>
    %402 = math.exp %401 : vector<2x8x8xf32>
    %cst_223 = arith.constant dense<0.000000e+00> : vector<2x8xf32>
    %403 = vector.multi_reduction <add>, %402, %cst_223 [2] : vector<2x8x8xf32> to vector<2x8xf32>
    %404 = vector.shape_cast %403 : vector<2x8xf32> to vector<2x8x1xf32>
    %405 = tpu.reciprocal %404 {approx = true} : vector<2x8x1xf32> -> vector<2x8x1xf32>
    %406 = vector.broadcast %405 : vector<2x8x1xf32> to vector<2x8x8xf32>
    %407 = arith.mulf %402, %406 : vector<2x8x8xf32>
    "tpu.trace_start"() <{level = 10 : i32, message = "bqk,bkd->bqd"}> : () -> ()
    %cst_224 = arith.constant dense<0.000000e+00> : vector<2x8x8xf32>
    %408 = tpu.matmul %407, %394, %cst_224 {dimension_numbers = #tpu.dot_dimension_numbers<[2], [1], [1], [2], [0, 0, 0, 1, 1, 2], [0], [0]>} : vector<2x8x8xf32>, vector<2x8x8xf32>, vector<2x8x8xf32> -> vector<2x8x8xf32>
    "tpu.trace_stop"() : () -> ()
    %409 = vector.extract_strided_slice %388 {offsets = [0, 8], sizes = [16, 8], strides = [1, 1]} : vector<16x48xf32> to vector<16x8xf32>
    %410 = vector.shape_cast %409 : vector<16x8xf32> to vector<2x8x8xf32>
    %411 = vector.extract_strided_slice %388 {offsets = [0, 24], sizes = [16, 8], strides = [1, 1]} : vector<16x48xf32> to vector<16x8xf32>
    %412 = vector.shape_cast %411 : vector<16x8xf32> to vector<2x8x8xf32>
    %413 = vector.extract_strided_slice %388 {offsets = [0, 40], sizes = [16, 8], strides = [1, 1]} : vector<16x48xf32> to vector<16x8xf32>
    %414 = vector.shape_cast %413 : vector<16x8xf32> to vector<2x8x8xf32>
    "tpu.trace_start"() <{level = 10 : i32, message = "bqd,bkd->bqk"}> : () -> ()
    %cst_225 = arith.constant dense<0.000000e+00> : vector<2x8x8xf32>
    %415 = tpu.matmul %410, %412, %cst_225 {dimension_numbers = #tpu.dot_dimension_numbers<[2], [2], [1], [1], [0, 0, 0, 1, 1, 1], [0], [0]>} : vector<2x8x8xf32>, vector<2x8x8xf32>, vector<2x8x8xf32> -> vector<2x8x8xf32>
    "tpu.trace_stop"() : () -> ()
    %416 = arith.addf %415, %3 : vector<2x8x8xf32>
    %417 = arith.addf %416, %238 : vector<2x8x8xf32>
    %cst_226 = arith.constant dense<0xFF800000> : vector<2x8xf32>
    %418 = vector.multi_reduction <maximumf>, %417, %cst_226 [2] : vector<2x8x8xf32> to vector<2x8xf32>
    %419 = vector.shape_cast %418 : vector<2x8xf32> to vector<2x8x1xf32>
    %420 = vector.broadcast %419 : vector<2x8x1xf32> to vector<2x8x8xf32>
    %421 = arith.subf %417, %420 : vector<2x8x8xf32>
    %422 = math.exp %421 : vector<2x8x8xf32>
    %cst_227 = arith.constant dense<0.000000e+00> : vector<2x8xf32>
    %423 = vector.multi_reduction <add>, %422, %cst_227 [2] : vector<2x8x8xf32> to vector<2x8xf32>
    %424 = vector.shape_cast %423 : vector<2x8xf32> to vector<2x8x1xf32>
    %425 = tpu.reciprocal %424 {approx = true} : vector<2x8x1xf32> -> vector<2x8x1xf32>
    %426 = vector.broadcast %425 : vector<2x8x1xf32> to vector<2x8x8xf32>
    %427 = arith.mulf %422, %426 : vector<2x8x8xf32>
    "tpu.trace_start"() <{level = 10 : i32, message = "bqk,bkd->bqd"}> : () -> ()
    %cst_228 = arith.constant dense<0.000000e+00> : vector<2x8x8xf32>
    %428 = tpu.matmul %427, %414, %cst_228 {dimension_numbers = #tpu.dot_dimension_numbers<[2], [1], [1], [2], [0, 0, 0, 1, 1, 2], [0], [0]>} : vector<2x8x8xf32>, vector<2x8x8xf32>, vector<2x8x8xf32> -> vector<2x8x8xf32>
    "tpu.trace_stop"() : () -> ()
    %429 = tpu.concatenate %408, %428 in 2 : vector<2x8x8xf32>, vector<2x8x8xf32> -> vector<2x8x16xf32>
    %430 = vector.shape_cast %429 : vector<2x8x16xf32> to vector<16x16xf32>
    %cst_229 = arith.constant dense<0.000000e+00> : vector<16x16xf32>
    %431 = tpu.matmul %430, %367, %cst_229 {dimension_numbers = #tpu.dot_dimension_numbers<[1], [0], [0], [1], [0, 0, 1, 1], [], []>} : vector<16x16xf32>, vector<16x16xf32>, vector<16x16xf32> -> vector<16x16xf32>
    %432 = arith.addf %361, %431 : vector<16x16xf32>
    %433 = vector.broadcast %369 : vector<1x16xf32> to vector<16x16xf32>
    %434 = arith.addf %432, %433 : vector<16x16xf32>
    %cst_230 = arith.constant dense<0.000000e+00> : vector<16xf32>
    %435 = vector.multi_reduction <add>, %434, %cst_230 [1] : vector<16x16xf32> to vector<16xf32>
    %436 = vector.shape_cast %435 : vector<16xf32> to vector<16x1xf32>
    %cst_231 = arith.constant 1.600000e+01 : f32
    %437 = vector.broadcast %cst_231 : f32 to vector<16x1xf32>
    %438 = arith.divf %436, %437 : vector<16x1xf32>
    %439 = vector.broadcast %438 : vector<16x1xf32> to vector<16x16xf32>
    %440 = arith.subf %434, %439 : vector<16x16xf32>
    %441 = arith.mulf %440, %440 : vector<16x16xf32>
    %cst_232 = arith.constant dense<0.000000e+00> : vector<16xf32>
    %442 = vector.multi_reduction <add>, %441, %cst_232 [1] : vector<16x16xf32> to vector<16xf32>
    %443 = vector.shape_cast %442 : vector<16xf32> to vector<16x1xf32>
    %cst_233 = arith.constant 1.600000e+01 : f32
    %444 = vector.broadcast %cst_233 : f32 to vector<16x1xf32>
    %445 = arith.divf %443, %444 : vector<16x1xf32>
    %cst_234 = arith.constant 9.99999974E-6 : f32
    %446 = vector.broadcast %cst_234 : f32 to vector<16x1xf32>
    %447 = arith.addf %445, %446 : vector<16x1xf32>
    %448 = math.rsqrt %447 : vector<16x1xf32>
    %449 = vector.broadcast %448 : vector<16x1xf32> to vector<16x16xf32>
    %450 = arith.mulf %440, %449 : vector<16x16xf32>
    %451 = vector.broadcast %379 : vector<1x16xf32> to vector<16x16xf32>
    %452 = arith.mulf %450, %451 : vector<16x16xf32>
    %453 = vector.broadcast %381 : vector<1x16xf32> to vector<16x16xf32>
    %454 = arith.addf %452, %453 : vector<16x16xf32>
    %cst_235 = arith.constant dense<0.000000e+00> : vector<16x32xf32>
    %455 = tpu.matmul %454, %371, %cst_235 {dimension_numbers = #tpu.dot_dimension_numbers<[1], [0], [0], [1], [0, 0, 1, 1], [], []>} : vector<16x16xf32>, vector<16x32xf32>, vector<16x32xf32> -> vector<16x32xf32>
    %456 = vector.broadcast %373 : vector<1x32xf32> to vector<16x32xf32>
    %457 = arith.addf %455, %456 : vector<16x32xf32>
    %cst_236 = arith.constant 0.000000e+00 : f32
    %458 = vector.broadcast %cst_236 : f32 to vector<16x32xf32>
    %459 = arith.maximumf %457, %458 : vector<16x32xf32>
    %cst_237 = arith.constant dense<0.000000e+00> : vector<16x16xf32>
    %460 = tpu.matmul %459, %375, %cst_237 {dimension_numbers = #tpu.dot_dimension_numbers<[1], [0], [0], [1], [0, 0, 1, 1], [], []>} : vector<16x32xf32>, vector<32x16xf32>, vector<16x16xf32> -> vector<16x16xf32>
    %461 = arith.addf %454, %460 : vector<16x16xf32>
    %462 = vector.broadcast %377 : vector<1x16xf32> to vector<16x16xf32>
    %463 = arith.addf %461, %462 : vector<16x16xf32>
    %cst_238 = arith.constant dense<0.000000e+00> : vector<16xf32>
    %464 = vector.multi_reduction <add>, %463, %cst_238 [1] : vector<16x16xf32> to vector<16xf32>
    %465 = vector.shape_cast %464 : vector<16xf32> to vector<16x1xf32>
    %cst_239 = arith.constant 1.600000e+01 : f32
    %466 = vector.broadcast %cst_239 : f32 to vector<16x1xf32>
    %467 = arith.divf %465, %466 : vector<16x1xf32>
    %468 = vector.broadcast %467 : vector<16x1xf32> to vector<16x16xf32>
    %469 = arith.subf %463, %468 : vector<16x16xf32>
    %470 = arith.mulf %469, %469 : vector<16x16xf32>
    %cst_240 = arith.constant dense<0.000000e+00> : vector<16xf32>
    %471 = vector.multi_reduction <add>, %470, %cst_240 [1] : vector<16x16xf32> to vector<16xf32>
    %472 = vector.shape_cast %471 : vector<16xf32> to vector<16x1xf32>
    %cst_241 = arith.constant 1.600000e+01 : f32
    %473 = vector.broadcast %cst_241 : f32 to vector<16x1xf32>
    %474 = arith.divf %472, %473 : vector<16x1xf32>
    %cst_242 = arith.constant 9.99999974E-6 : f32
    %475 = vector.broadcast %cst_242 : f32 to vector<16x1xf32>
    %476 = arith.addf %474, %475 : vector<16x1xf32>
    %477 = math.rsqrt %476 : vector<16x1xf32>
    %478 = vector.broadcast %477 : vector<16x1xf32> to vector<16x16xf32>
    %479 = arith.mulf %469, %478 : vector<16x16xf32>
    %480 = vector.broadcast %383 : vector<1x16xf32> to vector<16x16xf32>
    %481 = arith.mulf %479, %480 : vector<16x16xf32>
    %482 = vector.broadcast %385 : vector<1x16xf32> to vector<16x16xf32>
    %483 = arith.addf %481, %482 : vector<16x16xf32>
    %cst_243 = arith.constant -1.000000e+00 : f32
    %484 = vector.broadcast %cst_243 : f32 to vector<2x8xf32>
    %485 = arith.cmpf olt, %0, %484 : vector<2x8xf32>
    %cst_244 = arith.constant 0.000000e+00 : f32
    %cst_245 = arith.constant 1.000000e+00 : f32
    %486 = vector.broadcast %cst_244 : f32 to vector<2x8xf32>
    %487 = vector.broadcast %cst_245 : f32 to vector<2x8xf32>
    %488 = arith.select %485, %486, %487 : vector<2x8xi1>, vector<2x8xf32>
    %489 = vector.shape_cast %483 : vector<16x16xf32> to vector<2x8x16xf32>
    %490 = vector.shape_cast %488 : vector<2x8xf32> to vector<2x8x1xf32>
    %491 = vector.broadcast %490 : vector<2x8x1xf32> to vector<2x8x16xf32>
    %492 = arith.mulf %489, %491 : vector<2x8x16xf32>
    %cst_246 = arith.constant dense<0.000000e+00> : vector<2x16xf32>
    %493 = vector.multi_reduction <add>, %492, %cst_246 [1] : vector<2x8x16xf32> to vector<2x16xf32>
    %c0_247 = arith.constant 0 : index
    %c0_248 = arith.constant 0 : index
    %494 = vector.load %arg4[%c0_247, %c0_248] : memref<2x1xf32, #tpu.memory_space<vmem>>, vector<2x1xf32>
    %495 = vector.broadcast %494 : vector<2x1xf32> to vector<2x16xf32>
    %496 = arith.divf %493, %495 : vector<2x16xf32>
    %c0_249 = arith.constant 0 : index
    %c0_250 = arith.constant 0 : index
    %497 = vector.load %arg30[%c0_249, %c0_250] : memref<2x16xf32, #tpu.memory_space<vmem>>, vector<2x16xf32>
    tpu.vector_store %arg30[%c0_249, %c0_250], %496 {strides = array<i32>} : memref<2x16xf32, #tpu.memory_space<vmem>>, vector<2x16xf32>,
    return
  }
  func.func @transform_0(%arg0: i32) -> (i32, i32) {
    %c0_i32 = arith.constant 0 : i32
    %c0_i32_0 = arith.constant 0 : i32
    %c0_i32_1 = arith.constant 0 : i32
    return %c0_i32, %c0_i32_0 : i32, i32
  }
  func.func @transform_1(%arg0: i32) -> (i32, i32) {
    %c0_i32 = arith.constant 0 : i32
    %c0_i32_0 = arith.constant 0 : i32
    %c0_i32_1 = arith.constant 0 : i32
    return %c0_i32, %c0_i32_0 : i32, i32
  }
  func.func @transform_2(%arg0: i32) -> (i32, i32) {
    %c0_i32 = arith.constant 0 : i32
    %c0_i32_0 = arith.constant 0 : i32
    %c0_i32_1 = arith.constant 0 : i32
    return %c0_i32, %c0_i32_0 : i32, i32
  }
  func.func @transform_3(%arg0: i32) -> (i32, i32) {
    %c0_i32 = arith.constant 0 : i32
    %c0_i32_0 = arith.constant 0 : i32
    %c0_i32_1 = arith.constant 0 : i32
    return %c0_i32, %c0_i32_0 : i32, i32
  }
  func.func @transform_4(%arg0: i32) -> (i32, i32) {
    %c0_i32 = arith.constant 0 : i32
    %c0_i32_0 = arith.constant 0 : i32
    %c0_i32_1 = arith.constant 0 : i32
    return %c0_i32, %c0_i32_0 : i32, i32
  }
  func.func @transform_5(%arg0: i32) -> (i32, i32, i32) {
    %c0_i32 = arith.constant 0 : i32
    %c0_i32_0 = arith.constant 0 : i32
    %c0_i32_1 = arith.constant 0 : i32
    %c0_i32_2 = arith.constant 0 : i32
    return %c0_i32, %c0_i32_0, %c0_i32_1 : i32, i32, i32
  }
  func.func @transform_6(%arg0: i32) -> (i32, i32, i32) {
    %c0_i32 = arith.constant 0 : i32
    %c0_i32_0 = arith.constant 0 : i32
    %c0_i32_1 = arith.constant 0 : i32
    %c0_i32_2 = arith.constant 0 : i32
    return %c0_i32, %c0_i32_0, %c0_i32_1 : i32, i32, i32
  }
  func.func @transform_7(%arg0: i32) -> (i32, i32, i32) {
    %c0_i32 = arith.constant 0 : i32
    %c0_i32_0 = arith.constant 0 : i32
    %c0_i32_1 = arith.constant 0 : i32
    %c0_i32_2 = arith.constant 0 : i32
    return %c0_i32, %c0_i32_0, %c0_i32_1 : i32, i32, i32
  }
  func.func @transform_8(%arg0: i32) -> (i32, i32, i32) {
    %c0_i32 = arith.constant 0 : i32
    %c0_i32_0 = arith.constant 0 : i32
    %c0_i32_1 = arith.constant 0 : i32
    %c0_i32_2 = arith.constant 0 : i32
    return %c0_i32, %c0_i32_0, %c0_i32_1 : i32, i32, i32
  }
  func.func @transform_9(%arg0: i32) -> (i32, i32, i32) {
    %c0_i32 = arith.constant 0 : i32
    %c0_i32_0 = arith.constant 0 : i32
    %c0_i32_1 = arith.constant 0 : i32
    %c0_i32_2 = arith.constant 0 : i32
    return %c0_i32, %c0_i32_0, %c0_i32_1 : i32, i32, i32
  }
  func.func @transform_10(%arg0: i32) -> (i32, i32, i32) {
    %c0_i32 = arith.constant 0 : i32
    %c0_i32_0 = arith.constant 0 : i32
    %c0_i32_1 = arith.constant 0 : i32
    %c0_i32_2 = arith.constant 0 : i32
    return %c0_i32, %c0_i32_0, %c0_i32_1 : i32, i32, i32
  }
  func.func @transform_11(%arg0: i32) -> (i32, i32, i32) {
    %c0_i32 = arith.constant 0 : i32
    %c0_i32_0 = arith.constant 0 : i32
    %c0_i32_1 = arith.constant 0 : i32
    %c0_i32_2 = arith.constant 0 : i32
    return %c0_i32, %c0_i32_0, %c0_i32_1 : i32, i32, i32
  }
  func.func @transform_12(%arg0: i32) -> (i32, i32, i32) {
    %c0_i32 = arith.constant 0 : i32
    %c0_i32_0 = arith.constant 0 : i32
    %c0_i32_1 = arith.constant 0 : i32
    %c0_i32_2 = arith.constant 0 : i32
    return %c0_i32, %c0_i32_0, %c0_i32_1 : i32, i32, i32
  }
  func.func @transform_13(%arg0: i32) -> (i32, i32, i32) {
    %c0_i32 = arith.constant 0 : i32
    %c0_i32_0 = arith.constant 0 : i32
    %c0_i32_1 = arith.constant 0 : i32
    %c0_i32_2 = arith.constant 0 : i32
    return %c0_i32, %c0_i32_0, %c0_i32_1 : i32, i32, i32
  }
  func.func @transform_14(%arg0: i32) -> (i32, i32, i32) {
    %c0_i32 = arith.constant 0 : i32
    %c0_i32_0 = arith.constant 0 : i32
    %c0_i32_1 = arith.constant 0 : i32
    %c0_i32_2 = arith.constant 0 : i32
    return %c0_i32, %c0_i32_0, %c0_i32_1 : i32, i32, i32
  }
  func.func @transform_15(%arg0: i32) -> (i32, i32, i32) {
    %c0_i32 = arith.constant 0 : i32
    %c0_i32_0 = arith.constant 0 : i32
    %c0_i32_1 = arith.constant 0 : i32
    %c0_i32_2 = arith.constant 0 : i32
    return %c0_i32, %c0_i32_0, %c0_i32_1 : i32, i32, i32
  }
  func.func @transform_16(%arg0: i32) -> (i32, i32, i32) {
    %c0_i32 = arith.constant 0 : i32
    %c0_i32_0 = arith.constant 0 : i32
    %c0_i32_1 = arith.constant 0 : i32
    %c0_i32_2 = arith.constant 0 : i32
    return %c0_i32, %c0_i32_0, %c0_i32_1 : i32, i32, i32
  }
  func.func @transform_17(%arg0: i32) -> (i32, i32, i32) {
    %c0_i32 = arith.constant 0 : i32
    %c0_i32_0 = arith.constant 0 : i32
    %c0_i32_1 = arith.constant 0 : i32
    %c0_i32_2 = arith.constant 0 : i32
    return %c0_i32, %c0_i32_0, %c0_i32_1 : i32, i32, i32
  }
  func.func @transform_18(%arg0: i32) -> (i32, i32, i32) {
    %c0_i32 = arith.constant 0 : i32
    %c0_i32_0 = arith.constant 0 : i32
    %c0_i32_1 = arith.constant 0 : i32
    %c0_i32_2 = arith.constant 0 : i32
    return %c0_i32, %c0_i32_0, %c0_i32_1 : i32, i32, i32
  }
  func.func @transform_19(%arg0: i32) -> (i32, i32, i32) {
    %c0_i32 = arith.constant 0 : i32
    %c0_i32_0 = arith.constant 0 : i32
    %c0_i32_1 = arith.constant 0 : i32
    %c0_i32_2 = arith.constant 0 : i32
    return %c0_i32, %c0_i32_0, %c0_i32_1 : i32, i32, i32
  }
  func.func @transform_20(%arg0: i32) -> (i32, i32, i32) {
    %c0_i32 = arith.constant 0 : i32
    %c0_i32_0 = arith.constant 0 : i32
    %c0_i32_1 = arith.constant 0 : i32
    %c0_i32_2 = arith.constant 0 : i32
    return %c0_i32, %c0_i32_0, %c0_i32_1 : i32, i32, i32
  }
  func.func @transform_21(%arg0: i32) -> (i32, i32, i32) {
    %c0_i32 = arith.constant 0 : i32
    %c0_i32_0 = arith.constant 0 : i32
    %c0_i32_1 = arith.constant 0 : i32
    %c0_i32_2 = arith.constant 0 : i32
    return %c0_i32, %c0_i32_0, %c0_i32_1 : i32, i32, i32
  }
  func.func @transform_22(%arg0: i32) -> (i32, i32, i32) {
    %c0_i32 = arith.constant 0 : i32
    %c0_i32_0 = arith.constant 0 : i32
    %c0_i32_1 = arith.constant 0 : i32
    %c0_i32_2 = arith.constant 0 : i32
    return %c0_i32, %c0_i32_0, %c0_i32_1 : i32, i32, i32
  }
  func.func @transform_23(%arg0: i32) -> (i32, i32, i32) {
    %c0_i32 = arith.constant 0 : i32
    %c0_i32_0 = arith.constant 0 : i32
    %c0_i32_1 = arith.constant 0 : i32
    %c0_i32_2 = arith.constant 0 : i32
    return %c0_i32, %c0_i32_0, %c0_i32_1 : i32, i32, i32
  }
  func.func @transform_24(%arg0: i32) -> (i32, i32, i32) {
    %c0_i32 = arith.constant 0 : i32
    %c0_i32_0 = arith.constant 0 : i32
    %c0_i32_1 = arith.constant 0 : i32
    %c0_i32_2 = arith.constant 0 : i32
    return %c0_i32, %c0_i32_0, %c0_i32_1 : i32, i32, i32
  }
  func.func @transform_25(%arg0: i32) -> (i32, i32, i32) {
    %c0_i32 = arith.constant 0 : i32
    %c0_i32_0 = arith.constant 0 : i32
    %c0_i32_1 = arith.constant 0 : i32
    %c0_i32_2 = arith.constant 0 : i32
    return %c0_i32, %c0_i32_0, %c0_i32_1 : i32, i32, i32
  }
  func.func @transform_26(%arg0: i32) -> (i32, i32, i32) {
    %c0_i32 = arith.constant 0 : i32
    %c0_i32_0 = arith.constant 0 : i32
    %c0_i32_1 = arith.constant 0 : i32
    %c0_i32_2 = arith.constant 0 : i32
    return %c0_i32, %c0_i32_0, %c0_i32_1 : i32, i32, i32
  }
  func.func @transform_27(%arg0: i32) -> (i32, i32, i32) {
    %c0_i32 = arith.constant 0 : i32
    %c0_i32_0 = arith.constant 0 : i32
    %c0_i32_1 = arith.constant 0 : i32
    %c0_i32_2 = arith.constant 0 : i32
    return %c0_i32, %c0_i32_0, %c0_i32_1 : i32, i32, i32
  }
  func.func @transform_28(%arg0: i32) -> (i32, i32, i32) {
    %c0_i32 = arith.constant 0 : i32
    %c0_i32_0 = arith.constant 0 : i32
    %c0_i32_1 = arith.constant 0 : i32
    %c0_i32_2 = arith.constant 0 : i32
    return %c0_i32, %c0_i32_0, %c0_i32_1 : i32, i32, i32
  }
  func.func @transform_29(%arg0: i32) -> (i32, i32) {
    %c0_i32 = arith.constant 0 : i32
    %c0_i32_0 = arith.constant 0 : i32
    %c0_i32_1 = arith.constant 0 : i32
    return %c0_i32, %c0_i32_0 : i32, i32
  }
}

</mosaic_0001>

<bundles_post_ra>
// kernel: tpu_custom_call.1
= control target key start
LH: loop header
LB: loop body
LE: loop exit
PB: predicated region body
PF: predicated region fallthrough
CT: control target
= control target key end

     0   :  { %s2654_s6 = smov 1   ;;  %s2655_s10 = smov 2   ;;  %s3232_s0 = inlined_call_operand.smem [shape: u32[30], index: -1, kind: input, shape index: {}] }
   0x1   :  { %s2703_s5 = sld [smem:[%s3232_s0]]   ;;  %s2656_s14 = smov 3  }
   0x2   :  { %s2708_s9 = sld [smem:[%s3232_s0 + %s2654_s6]]   ;;  %s2657_s18 = smov 4  }
   0x3   :  { %s2713_s13 = sld [smem:[%s3232_s0 + %s2655_s10]]   ;;  %s2658_s22 = smov 5  }
   0x4   :  { %s2718_s17 = sld [smem:[%s3232_s0 + %s2656_s14]]   ;;  %s2659_s26 = smov 6  }
   0x5   :  { %s2290_s21 = sld [smem:[%s3232_s0 + %s2657_s18]]   ;;  %s2660_s30 = smov 7  }
   0x6   :  { %s2726_s25 = sld [smem:[%s3232_s0 + %s2658_s22]]   ;;  %s2661_s4 = smov 8  }
   0x7   :  { %s2731_s29 = sld [smem:[%s3232_s0 + %s2659_s26]]   ;;  %s2662_s10 = smov 9  }
   0x8   :  { %3243 = sst [smem:[#allocation6_spill]] %s2708_s9  ;;  %s2663_s15 = smov 10  }
   0x9   :  { %s2736_s3 = sld [smem:[%s3232_s0 + %s2660_s30]]   ;;  %s2664_s20 = smov 11  }
   0xa   :  { %3244 = sst [smem:[#allocation7_spill]] %s2718_s17  ;;  %s2665_s26 = smov 12  }
   0xb   :  { %s2741_s8 = sld [smem:[%s3232_s0 + %s2661_s4]]   ;;  %v64_v0 = vstv %s2290_s21  ;;  %s2666_s1 = smov 13  }
   0xc   :  { %s2746_s14 = sld [smem:[%s3232_s0 + %s2662_s10]]   ;;  %65 = vst [vmem:[#allocation2] sm:$0x1] %v64_v0  ;;  %s2667_s21 = smov 14  }
   0xd   :  { %s2751_s19 = sld [smem:[%s3232_s0 + %s2663_s15]]   ;;  %s2668_s12 = smov 15  }
   0xe   :  { %s2756_s24 = sld [smem:[%s3232_s0 + %s2664_s20]]   ;;  %s2669_s20 = smov 16  }
   0xf   :  { %s2761_s30 = sld [smem:[%s3232_s0 + %s2665_s26]]   ;;  %s2670_s27 = smov 17  }
  0x10   :  { %s2766_s6 = sld [smem:[%s3232_s0 + %s2666_s1]]   ;;  %s2671_s4 = smov 18  }
  0x11   :  { %s2771_s11 = sld [smem:[%s3232_s0 + %s2667_s21]]  }
  0x12   :  { %s2776_s18 = sld [smem:[%s3232_s0 + %s2668_s12]]   ;;  %s2672_s12 = smov 19  }
  0x13   :  { %s2781_s26 = sld [smem:[%s3232_s0 + %s2669_s20]]   ;;  %s2673_s20 = smov 20  }
  0x14   :  { %s2786_s2 = sld [smem:[%s3232_s0 + %s2670_s27]]   ;;  %s2674_s27 = smov 21  }
  0x15   :  { %s2791_s10 = sld [smem:[%s3232_s0 + %s2671_s4]]   ;;  %s2675_s4 = smov 22  }
  0x16   :  { %s2796_s17 = sld [smem:[%s3232_s0 + %s2672_s12]]   ;;  %s2676_s12 = smov 23  }
  0x17   :  { %s2801_s9 = sld [smem:[%s3232_s0 + %s2673_s20]]   ;;  %s2677_s20 = smov 24  }
  0x1a   :  { %3245 = sst [smem:[#allocation8_spill]] %s2786_s2 }
  0x1b   :  { %3246 = sst [smem:[#allocation9_spill]] %s2791_s10 }
  0x1c   :  { %3247 = sst [smem:[#allocation10_spill]] %s2796_s17 }
  0x1d   :  { %3248 = sst [smem:[#allocation11_spill]] %s2801_s9 }
  0x1e   :  { %s2806_s2 = sld [smem:[%s3232_s0 + %s2674_s27]]   ;;  %s2678_s27 = smov 25  }
  0x1f   :  { %s2811_s10 = sld [smem:[%s3232_s0 + %s2675_s4]]   ;;  %s2679_s4 = smov 26  }
  0x20   :  { %s2816_s17 = sld [smem:[%s3232_s0 + %s2676_s12]]   ;;  %s2680_s12 = smov 27  }
  0x21   :  { %s2821_s9 = sld [smem:[%s3232_s0 + %s2677_s20]]   ;;  %s2681_s20 = smov 28  }
  0x24   :  { %3249 = sst [smem:[#allocation12_spill]] %s2806_s2 }
  0x25   :  { %3250 = sst [smem:[#allocation13_spill]] %s2811_s10 }
  0x26   :  { %3251 = sst [smem:[#allocation14_spill]] %s2816_s17 }
  0x27   :  { %3252 = sst [smem:[#allocation15_spill]] %s2821_s9 }
  0x28   :  { %s2826_s2 = sld [smem:[%s3232_s0 + %s2678_s27]]   ;;  %s2682_s27 = smov 29  }
  0x29   :  { %s2831_s10 = sld [smem:[%s3232_s0 + %s2679_s4]]  }
  0x2a   :  { %s2836_s17 = sld [smem:[%s3232_s0 + %s2680_s12]]  }
  0x2b   :  { %s2841_s9 = sld [smem:[%s3232_s0 + %s2681_s20]]  }
  0x2e   :  { %3253 = sst [smem:[#allocation16_spill]] %s2826_s2 }
  0x2f   :  { %s2846_s2 = sld [smem:[%s3232_s0 + %s2682_s27]]  }
  0x30   :  { %v134_v1 = vld [vmem:[%s2726_s25] sm:$0xf]  ;;  %vm159_vm0 = vcmask 1043456   ;;  %vm152_vm1 = vcmask 31744   ;;  %v2853_v3 = vld [vmem:[%s2703_s5 + $0x8] sm:$0xff] }
  0x31   :  { %v2850_v2 = vld [vmem:[%s2703_s5] sm:$0xff]  ;;  %2316 = vmatpush.msk.msra.mxu0 %vm159_vm0, %v134_v1  ;;  %2432 = vmatpush.msk.msra.mxu3 %vm159_vm0, %v134_v1 }
  0x32   :  { %2317 = vmatmul.msk.f32.vlgmr.msra.gmra.mxu0 %vm152_vm1, %v2850_v2  ;;  %2318 = vmatmul.msk.f32.vlgmr.msra.gmra.mxu3 %vm152_vm1, %v2853_v3 }
  0x33   :  { %66 = vsyncpa [#allocation4], 0  ;;  %v2498_v4 = vld [vmem:[%s2731_s29] ss:$0 sm:$0xff]  ;;  %s2683_s0 = smov 120   ;;  %s2684_s5 = smov 124  }
  0x34   :  { %v125_v12 = vld [vmem:[%s2713_s13] sm:$0x3]  ;;  %vm240_vm2 = vcmask 64512   ;;  %v2685_v51 = vmov 4.0   ;;  %vm452_vm10 = vcmask 261120   ;;  %s3260_s4 = sld [smem:[#allocation16_spill]] }
  0x35   :  { %v2870_v13 = vperm.slane %v125_v12, 0  ;;  %v127_v17 = vrot.slane %v125_v12, 1  ;;  %v136_v39 = vld [vmem:[%s2736_s3] sm:$0xf]  ;;  %s3261_s21 = sld [smem:[#allocation14_spill]]  ;;  %s2644_s20 = scalar_lea.hbm %s2846_s2, 2 }
  0x36   :  { %v2499_v42 = vld [vmem:[%s2741_s8] ss:$0 sm:$0xff]  ;;  %s3262_s7 = sld [smem:[#allocation13_spill]] }
  0x37   :  { %v2874_v18 = vperm.slane %v127_v17, 0  ;;  %s3263_s12 = sld [smem:[#allocation15_spill]] }
  0xaf   :  { %v180_v5 = vpop.f32.mrf.mxu0 }
  0xb0   :  { %v181_v6 = vadd.f32 %v2498_v4, %v180_v5 }
  0xb2   :  { %263 = vrot.lane.b32.xlu2 %v181_v6, %s2683_s0  ;;  %187 = vrot.lane.b32.xlu0 %v181_v6, %s2684_s5 }
  0xb5   :  { %v183_v7 = vpop.f32.mrf.mxu3 }
  0xb6   :  { %v184_v8 = vadd.f32 %v2498_v4, %v183_v7  ;;  %v138_v4 = vld [vmem:[%s2746_s14] sm:$0xf] }
  0xb8   :  { %214 = vrot.lane.b32.xlu1 %v184_v8, %s2684_s5 }
 0x10c   :  { %v264_v9 = vpop.permute.xlu2 %263 }
 0x10d   :  { %284 = vmatpush.msrb.mxu3 %v264_v9 }
 0x124   :  { %v188_v10 = vpop.permute.xlu0 %187 }
 0x125   :  { %2319 = vmatpush.xpose.msk.msra.mxu1 %vm152_vm1, %v188_v10 }
 0x128   :  { %2320 = vmatmul.msk.f32.vlgmr.msra.gmra.mxu1 %vm152_vm1, %v181_v6 }
 0x129   :  { %2325 = vmatpush.msk.msrb.mxu1 %vm159_vm0, %v136_v39  ;;  %v2502_v39 = vld [vmem:[%s2751_s19] ss:$0 sm:$0xff] }
 0x12a   :  { %v215_v11 = vpop.permute.xlu1 %214 }
 0x12b   :  { %2321 = vmatpush.xpose.msk.msra.mxu2 %vm152_vm1, %v215_v11 }
 0x12e   :  { %2322 = vmatmul.msk.f32.vlgmr.msra.gmra.mxu2 %vm152_vm1, %v184_v8 }
 0x12f   :  { %2328 = vmatpush.msk.msrb.mxu2 %vm159_vm0, %v138_v4 }
 0x1a5   :  { %v210_v14 = vpop.f32.mrf.mxu1 }
 0x1a6   :  { %v211_v15 = vadd.f32 %v210_v14, %v2870_v13 }
 0x1a8   :  { %v241_v16 = vsel %vm240_vm2, %v211_v15, -inf }
 0x1a9   :  { %242 = vmax.xlane.f32.xlu0 %v241_v16 }
 0x1b1   :  { %v237_v19 = vpop.f32.mrf.mxu2 }
 0x1b2   :  { %v238_v20 = vadd.f32 %v237_v19, %v2874_v18 }
 0x1b4   :  { %v244_v21 = vsel %vm240_vm2, %v238_v20, -inf }
 0x1b5   :  { %245 = vmax.xlane.f32.xlu2 %v244_v21 }
 0x1bd   :  { %289 = vrot.lane.b32.xlu0 %v184_v8, %s2683_s0  ;;  %v143_v8 = vld [vmem:[%s2756_s24 + $0x18] sm:$0xff] }
 0x1be   :  { %471 = vmatpush.msrb.mxu0 %v143_v8 }
 0x21c   :  { %v243_v22 = vpop.xlane.xlu0 %242 }
 0x21d   :  { %v247_v23 = vsub.f32 %v211_v15, %v243_v22 }
 0x21f   :  { %v249_v24 = vmul.f32 1.442695, %v247_v23 }
 0x221   :  { %2531 = vpow2.f32 %v249_v24  ;;  %v2501_v24 = vld [vmem:[%s2771_s11] ss:$0 sm:$0xff] }
 0x227   :  { %v2532_v25 = vpop.eup %2531 }
 0x228   :  { %v246_v26 = vpop.xlane.xlu2 %245  ;;  %v253_v27 = vsel %vm240_vm2, %v2532_v25, 0.0 }
 0x229   :  { %v248_v28 = vsub.f32 %v238_v20, %v246_v26  ;;  %254 = vadd.xlane.f32.xlu1 %v253_v27  ;;  %v2500_v20 = vld [vmem:[%s2766_s6] ss:$0 sm:$0xff] }
 0x22b   :  { %v251_v29 = vmul.f32 1.442695, %v248_v28 }
 0x22d   :  { %2533 = vpow2.f32 %v251_v29 }
 0x22f   :  { %v290_v30 = vpop.permute.xlu0 %289 }
 0x230   :  { %310 = vmatpush.msra.mxu3 %v290_v30 }
 0x233   :  { %v2534_v31 = vpop.eup %2533 }
 0x234   :  { %v256_v32 = vsel %vm240_vm2, %v2534_v31, 0.0 }
 0x235   :  { %257 = vadd.xlane.f32.xlu2 %v256_v32 }
 0x29c   :  { %v255_v33 = vpop.xlane.xlu1 %254 }
 0x29d   :  { %2535 = vrcp.f32 %v255_v33 }
 0x2a3   :  { %v2536_v34 = vpop.eup %2535 }
 0x2a4   :  { %v261_v35 = vmul.f32 %v2536_v34, %v2532_v25 }
 0x2a6   :  { %2323 = vmatmul.msk.f32.vlgmr.msrb.gmra.mxu3 %vm240_vm2, %v261_v35 }
 0x2a8   :  { %v258_v36 = vpop.xlane.xlu2 %257 }
 0x2a9   :  { %2537 = vrcp.f32 %v258_v36  ;;  %v142_v36 = vld [vmem:[%s2756_s24 + $0x10] sm:$0xff] }
 0x2aa   :  { %2539 = vrcp.f32 %v2685_v51  ;;  %472 = vmatpush.msrb.mxu0 %v142_v36 }
 0x2af   :  { %v2538_v37 = vpop.eup %2537 }
 0x2b0   :  { %v262_v38 = vmul.f32 %v2538_v37, %v2534_v31  ;;  %v2540_v52 = vpop.eup %2539  ;;  %v141_v37 = vld [vmem:[%s2756_s24 + $0x8] sm:$0xff] }
 0x2b1   :  { %v361_v53 = vmul.f32 4.0, %v2540_v52  ;;  %vm365_vm3 = vweird.f32 %v2540_v52  ;;  %473 = vmatpush.msrb.mxu0 %v141_v37 }
 0x2b2   :  { %2324 = vmatmul.msk.f32.vlgmr.msra.gmra.mxu3 %vm240_vm2, %v262_v38  ;;  %v140_v38 = vld [vmem:[%s2756_s24] sm:$0xff] }
 0x2b3   :  { %v362_v54 = vsub.f32 1.0, %v361_v53  ;;  %474 = vmatpush.msrb.mxu0 %v140_v38 }
 0x2b5   :  { %v363_v55 = vmul.f32 %v2540_v52, %v362_v54 }
 0x2b7   :  { %v364_v56 = vadd.f32 %v2540_v52, %v363_v55 }
 0x2b9   :  { %v2892_v57 = vsel %vm365_vm3, %v2540_v52, %v364_v56 }
 0x329   :  { %v286_v40 = vpop.f32.mrf.mxu3 }
 0x32a   :  { %2326 = vmatmul.msk.f32.vlgmr.msrb.gmra.mxu1 %vm152_vm1, %v286_v40 }
 0x335   :  { %v312_v41 = vpop.f32.mrf.mxu3 }
 0x336   :  { %2327 = vmatmul.msk.f32.gmra.mxu1 %vm152_vm1, %v312_v41 }
 0x3a7   :  { %v341_v43 = vpop.f32.mrf.mxu1 }
 0x3a8   :  { %v347_v44 = vadd.f32 %v341_v43, %v2850_v2 }
 0x3aa   :  { %v352_v45 = vadd.f32 %v2499_v42, %v347_v44 }
 0x3ac   :  { %v354_v46 = vsel %vm152_vm1, %v352_v45, 0.0 }
 0x3ad   :  { %355 = vadd.xlane.f32.xlu1 %v354_v46  ;;  %v2503_v46 = vld [vmem:[%s2761_s30] ss:$0 sm:$0xff] }
 0x3b3   :  { %v344_v47 = vpop.f32.mrf.mxu1 }
 0x3b4   :  { %v348_v48 = vadd.f32 %v344_v47, %v2853_v3 }
 0x3b6   :  { %v353_v49 = vadd.f32 %v2499_v42, %v348_v48 }
 0x3b8   :  { %v357_v50 = vsel %vm152_vm1, %v353_v49, 0.0 }
 0x3b9   :  { %358 = vadd.xlane.f32.xlu1 %v357_v50 }
 0x420   :  { %v356_v58 = vpop.xlane.xlu1 %355 }
 0x421   :  { %v367_v59 = vmul.f32 %v2892_v57, %v356_v58 }
 0x423   :  { %v369_v60 = vsub.f32 %v352_v45, %v367_v59 }
 0x425   :  { %v371_v61 = vmul.f32 %v369_v60, %v369_v60 }
 0x427   :  { %v373_v62 = vsel %vm152_vm1, %v371_v61, 0.0 }
 0x428   :  { %374 = vadd.xlane.f32.xlu2 %v373_v62 }
 0x42c   :  { %v359_v63 = vpop.xlane.xlu1 %358 }
 0x42d   :  { %v368_v0 = vmul.f32 %v2892_v57, %v359_v63 }
 0x42f   :  { %v370_v1 = vsub.f32 %v353_v49, %v368_v0 }
 0x431   :  { %v372_v2 = vmul.f32 %v370_v1, %v370_v1 }
 0x433   :  { %v376_v3 = vsel %vm152_vm1, %v372_v2, 0.0  ;;  %v2333_v2 = vld [vmem:[%s2726_s25 + $0x4] sm:$0xf] }
 0x434   :  { %377 = vadd.xlane.f32.xlu2 %v376_v3  ;;  %2348 = vmatpush.msk.msrb.mxu3 %vm159_vm0, %v2333_v2 }
 0x49b   :  { %v375_v5 = vpop.xlane.xlu2 %374 }
 0x49c   :  { %v379_v6 = vmul.f32 %v375_v5, %v2892_v57 }
 0x49e   :  { %v381_v7 = vadd.f32 1e-05, %v379_v6 }
 0x4a0   :  { %2541 = vrsqrt.f32 %v381_v7  ;;  %vm389_vm5 = vweird.f32 %v381_v7 }
 0x4a6   :  { %v2542_v9 = vpop.eup %2541 }
 0x4a7   :  { %v384_v10 = vmul.f32 %v2542_v9, %v381_v7  ;;  %v378_v11 = vpop.xlane.xlu2 %377  ;;  %vm390_vm4 = vweird.f32 %v2542_v9 }
 0x4a8   :  { %v380_v12 = vmul.f32 %v378_v11, %v2892_v57  ;;  %vm391_vm6 = vmor %vm389_vm5, %vm390_vm4 }
 0x4a9   :  { %v385_v14 = vmul.f32 %v2542_v9, %v384_v10 }
 0x4aa   :  { %v382_v15 = vadd.f32 1e-05, %v380_v12 }
 0x4ab   :  { %v386_v16 = vmul.f32 0.5, %v385_v14 }
 0x4ac   :  { %2543 = vrsqrt.f32 %v382_v15  ;;  %vm399_vm8 = vweird.f32 %v382_v15 }
 0x4ad   :  { %v387_v17 = vsub.f32 1.5, %v386_v16  ;;  %v2504_v16 = vld [vmem:[%s2776_s18] ss:$0 sm:$0xff] }
 0x4af   :  { %v388_v19 = vmul.f32 %v2542_v9, %v387_v17 }
 0x4b1   :  { %v392_v21 = vsel %vm391_vm6, %v2542_v9, %v388_v19 }
 0x4b2   :  { %v2544_v22 = vpop.eup %2543  ;;  %v403_v23 = vmul.f32 %v392_v21, %v369_v60  ;;  %v2505_v21 = vld [vmem:[%s2781_s26] ss:$0 sm:$0xff] }
 0x4b3   :  { %v394_v25 = vmul.f32 %v2544_v22, %v382_v15  ;;  %vm400_vm7 = vweird.f32 %v2544_v22 }
 0x4b4   :  { %v408_v26 = vmul.f32 %v2500_v20, %v403_v23  ;;  %vm401_vm9 = vmor %vm399_vm8, %vm400_vm7 }
 0x4b5   :  { %v395_v27 = vmul.f32 %v2544_v22, %v394_v25 }
 0x4b6   :  { %v413_v28 = vadd.f32 %v2501_v24, %v408_v26 }
 0x4b7   :  { %v396_v29 = vmul.f32 0.5, %v395_v27 }
 0x4b8   :  { %2329 = vmatmul.msk.f32.vlgmr.msrb.gmra.mxu2 %vm152_vm1, %v413_v28 }
 0x4b9   :  { %v397_v30 = vsub.f32 1.5, %v396_v29 }
 0x4bb   :  { %v398_v31 = vmul.f32 %v2544_v22, %v397_v30 }
 0x4bd   :  { %v402_v32 = vsel %vm401_vm9, %v2544_v22, %v398_v31 }
 0x4be   :  { %v404_v33 = vmul.f32 %v402_v32, %v370_v1 }
 0x4c0   :  { %v409_v34 = vmul.f32 %v2500_v20, %v404_v33  ;;  %v2506_v33 = vld [vmem:[%s2731_s29 + $0x1] ss:$0 sm:$0xff] }
 0x4c2   :  { %v414_v35 = vadd.f32 %v2501_v24, %v409_v34 }
 0x4c4   :  { %2330 = vmatmul.msk.f32.gmra.mxu2 %vm152_vm1, %v414_v35 }
 0x53b   :  { %v444_v40 = vpop.f32.mrf.mxu2 }
 0x53c   :  { %v445_v41 = vadd.f32 %v2502_v39, %v444_v40 }
 0x53e   :  { %v450_v42 = vmax.f32 %v445_v41, 0.0 }
 0x540   :  { %2331 = vmatmul.msk.f32.vlgmr.msrb.gmra.mxu0 %vm452_vm10, %v450_v42 }
 0x547   :  { %v447_v43 = vpop.f32.mrf.mxu2 }
 0x548   :  { %v448_v44 = vadd.f32 %v2502_v39, %v447_v43 }
 0x54a   :  { %v451_v45 = vmax.f32 %v448_v44, 0.0 }
 0x54c   :  { %2332 = vmatmul.msk.f32.gmra.mxu0 %vm452_vm10, %v451_v45 }
 0x5bd   :  { %v476_v47 = vpop.f32.mrf.mxu0 }
 0x5be   :  { %v482_v48 = vadd.f32 %v476_v47, %v413_v28 }
 0x5c0   :  { %v487_v49 = vadd.f32 %v2503_v46, %v482_v48 }
 0x5c2   :  { %v489_v50 = vsel %vm152_vm1, %v487_v49, 0.0 }
 0x5c3   :  { %490 = vadd.xlane.f32.xlu1 %v489_v50 }
 0x5c9   :  { %v479_v51 = vpop.f32.mrf.mxu0 }
 0x5ca   :  { %v483_v52 = vadd.f32 %v479_v51, %v414_v35 }
 0x5cc   :  { %v488_v53 = vadd.f32 %v2503_v46, %v483_v52 }
 0x5ce   :  { %v492_v54 = vsel %vm152_vm1, %v488_v53, 0.0 }
 0x5cf   :  { %493 = vadd.xlane.f32.xlu2 %v492_v54 }
 0x636   :  { %v491_v55 = vpop.xlane.xlu1 %490 }
 0x637   :  { %v495_v56 = vmul.f32 %v491_v55, %v2892_v57 }
 0x639   :  { %v497_v58 = vsub.f32 %v487_v49, %v495_v56 }
 0x63b   :  { %v499_v59 = vmul.f32 %v497_v58, %v497_v58 }
 0x63d   :  { %v501_v60 = vsel %vm152_vm1, %v499_v59, 0.0 }
 0x63e   :  { %502 = vadd.xlane.f32.xlu0 %v501_v60 }
 0x642   :  { %v494_v61 = vpop.xlane.xlu2 %493 }
 0x643   :  { %v496_v62 = vmul.f32 %v494_v61, %v2892_v57 }
 0x645   :  { %v498_v63 = vsub.f32 %v488_v53, %v496_v62 }
 0x647   :  { %v500_v0 = vmul.f32 %v498_v63, %v498_v63 }
 0x649   :  { %v504_v1 = vsel %vm152_vm1, %v500_v0, 0.0 }
 0x64a   :  { %505 = vadd.xlane.f32.xlu2 %v504_v1  ;;  %v2335_v1 = vld [vmem:[%s2736_s3 + $0x4] sm:$0xf]  ;;  %s3254_s3 = sld [smem:[#allocation8_spill]] }
 0x6b1   :  { %v503_v3 = vpop.xlane.xlu0 %502 }
 0x6b2   :  { %v507_v4 = vmul.f32 %v503_v3, %v2892_v57 }
 0x6b4   :  { %v509_v5 = vadd.f32 1e-05, %v507_v4  ;;  %v2507_v4 = vld [vmem:[%s2741_s8 + $0x1] ss:$0 sm:$0xff]  ;;  %s3255_s8 = sld [smem:[#allocation6_spill]] }
 0x6b6   :  { %2545 = vrsqrt.f32 %v509_v5  ;;  %vm517_vm12 = vweird.f32 %v509_v5 }
 0x6bc   :  { %v2546_v6 = vpop.eup %2545 }
 0x6bd   :  { %v512_v7 = vmul.f32 %v2546_v6, %v509_v5  ;;  %v506_v8 = vpop.xlane.xlu2 %505  ;;  %vm518_vm11 = vweird.f32 %v2546_v6 }
 0x6be   :  { %v508_v9 = vmul.f32 %v506_v8, %v2892_v57  ;;  %vm519_vm13 = vmor %vm517_vm12, %vm518_vm11 }
 0x6bf   :  { %v513_v10 = vmul.f32 %v2546_v6, %v512_v7 }
 0x6c0   :  { %v510_v11 = vadd.f32 1e-05, %v508_v9 }
 0x6c1   :  { %v514_v12 = vmul.f32 0.5, %v513_v10 }
 0x6c2   :  { %2547 = vrsqrt.f32 %v510_v11  ;;  %vm527_vm15 = vweird.f32 %v510_v11 }
 0x6c3   :  { %v515_v14 = vsub.f32 1.5, %v514_v12 }
 0x6c5   :  { %v516_v15 = vmul.f32 %v2546_v6, %v515_v14 }
 0x6c7   :  { %v520_v17 = vsel %vm519_vm13, %v2546_v6, %v516_v15 }
 0x6c8   :  { %v2548_v19 = vpop.eup %2547  ;;  %v531_v20 = vmul.f32 %v520_v17, %v497_v58 }
 0x6c9   :  { %v522_v22 = vmul.f32 %v2548_v19, %v510_v11  ;;  %vm528_vm14 = vweird.f32 %v2548_v19 }
 0x6ca   :  { %v536_v23 = vmul.f32 %v2504_v16, %v531_v20  ;;  %vm529_vm3 = vmor %vm527_vm15, %vm528_vm14 }
 0x6cb   :  { %v523_v24 = vmul.f32 %v2548_v19, %v522_v22 }
 0x6cc   :  { %v2926_v25 = vadd.f32 %v2505_v21, %v536_v23 }
 0x6cd   :  { %v524_v26 = vmul.f32 0.5, %v523_v24 }
 0x6ce   :  { %2349 = vmatmul.msk.f32.vlgmr.msrb.gmra.mxu3 %vm152_vm1, %v2926_v25 }
 0x6cf   :  { %v525_v27 = vsub.f32 1.5, %v524_v26 }
 0x6d1   :  { %v526_v28 = vmul.f32 %v2548_v19, %v525_v27 }
 0x6d3   :  { %v530_v29 = vsel %vm529_vm3, %v2548_v19, %v526_v28 }
 0x6d4   :  { %v532_v30 = vmul.f32 %v530_v29, %v498_v63 }
 0x6d6   :  { %v537_v31 = vmul.f32 %v2504_v16, %v532_v30 }
 0x6d8   :  { %v2930_v32 = vadd.f32 %v2505_v21, %v537_v31 }
 0x6da   :  { %2350 = vmatmul.msk.f32.gmra.mxu3 %vm152_vm1, %v2930_v32 }
 0x751   :  { %v599_v34 = vpop.f32.mrf.mxu3 }
 0x752   :  { %v600_v35 = vadd.f32 %v2506_v33, %v599_v34 }
 0x754   :  { %606 = vrot.lane.b32.xlu1 %v600_v35, %s2684_s5 }
 0x75d   :  { %v602_v36 = vpop.f32.mrf.mxu3 }
 0x75e   :  { %v603_v37 = vadd.f32 %v2506_v33, %v602_v36 }
 0x760   :  { %633 = vrot.lane.b32.xlu1 %v603_v37, %s2684_s5 }
 0x7c6   :  { %v607_v38 = vpop.permute.xlu1 %606 }
 0x7c7   :  { %2351 = vmatpush.xpose.msk.msra.mxu1 %vm152_vm1, %v607_v38  ;;  %v2509_v38 = vld [vmem:[%s2771_s11 + $0x1] ss:$0 sm:$0xff]  ;;  %s3258_s11 = sld [smem:[#allocation11_spill]] }
 0x7ca   :  { %2352 = vmatmul.msk.f32.vlgmr.msra.gmra.mxu1 %vm152_vm1, %v600_v35 }
 0x7cb   :  { %2357 = vmatpush.msk.msrb.mxu1 %vm159_vm0, %v2335_v1 }
 0x7d2   :  { %v634_v39 = vpop.permute.xlu1 %633 }
 0x7d3   :  { %2353 = vmatpush.xpose.msk.msra.mxu2 %vm152_vm1, %v634_v39 }
 0x7d6   :  { %2354 = vmatmul.msk.f32.vlgmr.msra.gmra.mxu2 %vm152_vm1, %v603_v37 }
 0x847   :  { %v629_v40 = vpop.f32.mrf.mxu1 }
 0x848   :  { %v630_v41 = vadd.f32 %v629_v40, %v2870_v13 }
 0x84a   :  { %v659_v42 = vsel %vm240_vm2, %v630_v41, -inf }
 0x84b   :  { %660 = vmax.xlane.f32.xlu2 %v659_v42 }
 0x859   :  { %v656_v43 = vpop.f32.mrf.mxu2 }
 0x85a   :  { %v657_v44 = vadd.f32 %v656_v43, %v2874_v18 }
 0x85c   :  { %v662_v45 = vsel %vm240_vm2, %v657_v44, -inf }
 0x85d   :  { %663 = vmax.xlane.f32.xlu1 %v662_v45 }
 0x8be   :  { %v661_v46 = vpop.xlane.xlu2 %660 }
 0x8bf   :  { %v665_v47 = vsub.f32 %v630_v41, %v661_v46  ;;  %v2342_v41 = vld [vmem:[%s2756_s24 + $0x38] sm:$0xff] }
 0x8c1   :  { %v667_v48 = vmul.f32 1.442695, %v665_v47 }
 0x8c3   :  { %2549 = vpow2.f32 %v667_v48 }
 0x8c9   :  { %v2550_v49 = vpop.eup %2549 }
 0x8ca   :  { %v671_v50 = vsel %vm240_vm2, %v2550_v49, 0.0 }
 0x8cb   :  { %672 = vadd.xlane.f32.xlu2 %v671_v50 }
 0x8d0   :  { %v664_v51 = vpop.xlane.xlu1 %663 }
 0x8d1   :  { %v666_v52 = vsub.f32 %v657_v44, %v664_v51 }
 0x8d3   :  { %v669_v53 = vmul.f32 1.442695, %v666_v52 }
 0x8d5   :  { %2551 = vpow2.f32 %v669_v53 }
 0x8db   :  { %v2552_v54 = vpop.eup %2551 }
 0x8dc   :  { %v674_v55 = vsel %vm240_vm2, %v2552_v54, 0.0 }
 0x8dd   :  { %675 = vadd.xlane.f32.xlu0 %v674_v55  ;;  %v2341_v55 = vld [vmem:[%s2756_s24 + $0x30] sm:$0xff] }
 0x8e3   :  { %681 = vrot.lane.b32.xlu2 %v600_v35, %s2683_s0  ;;  %v2508_v35 = vld [vmem:[%s2766_s6 + $0x1] ss:$0 sm:$0xff]  ;;  %s3257_s6 = sld [smem:[#allocation10_spill]] }
 0x8f1   :  { %707 = vrot.lane.b32.xlu0 %v603_v37, %s2683_s0 }
 0x93e   :  { %v673_v56 = vpop.xlane.xlu2 %672 }
 0x93f   :  { %2553 = vrcp.f32 %v673_v56  ;;  %v2340_v56 = vld [vmem:[%s2756_s24 + $0x28] sm:$0xff] }
 0x945   :  { %v2554_v58 = vpop.eup %2553 }
 0x946   :  { %v679_v59 = vmul.f32 %v2554_v58, %v2550_v49  ;;  %v682_v60 = vpop.permute.xlu2 %681  ;;  %v2339_v58 = vld [vmem:[%s2756_s24 + $0x20] sm:$0xff] }
 0x947   :  { %702 = vmatpush.msra.mxu0 %v682_v60 }
 0x948   :  { %2355 = vmatmul.msk.f32.vlgmr.msra.gmra.mxu0 %vm240_vm2, %v679_v59  ;;  %v2510_v59 = vld [vmem:[%s2751_s19 + $0x1] ss:$0 sm:$0xff]  ;;  %s2687_s19 = smov 96  }
 0x949   :  { %881 = vmatpush.msrb.mxu0 %v2342_v41 }
 0x94b   :  { %882 = vmatpush.msrb.mxu0 %v2341_v55 }
 0x94d   :  { %883 = vmatpush.msrb.mxu0 %v2340_v56 }
 0x94f   :  { %884 = vmatpush.msrb.mxu0 %v2339_v58  ;;  %v2514_v58 = vld [vmem:[%s2731_s29 + $0x2] ss:$0 sm:$0xff]  ;;  %s2688_s29 = smov 104  }
 0x950   :  { %v676_v61 = vpop.xlane.xlu0 %675 }
 0x951   :  { %2555 = vrcp.f32 %v676_v61 }
 0x957   :  { %v2556_v62 = vpop.eup %2555 }
 0x958   :  { %v680_v63 = vmul.f32 %v2556_v62, %v2552_v54 }
 0x963   :  { %v708_v0 = vpop.permute.xlu0 %707 }
 0x964   :  { %728 = vmatpush.msra.mxu3 %v708_v0 }
 0x965   :  { %2356 = vmatmul.msk.f32.vlgmr.msra.gmra.mxu3 %vm240_vm2, %v680_v63 }
 0x9c5   :  { %v704_v2 = vpop.f32.mrf.mxu0 }
 0x9c6   :  { %2358 = vmatmul.msk.f32.vlgmr.msrb.gmra.mxu1 %vm152_vm1, %v704_v2  ;;  %v2511_v2 = vld [vmem:[%s2761_s30 + $0x1] ss:$0 sm:$0xff]  ;;  %s2689_s30 = smov 88  }
 0x9e8   :  { %v730_v3 = vpop.f32.mrf.mxu3 }
 0x9e9   :  { %2359 = vmatmul.msk.f32.gmra.mxu1 %vm152_vm1, %v730_v3 }
 0xa43   :  { %v759_v5 = vpop.f32.mrf.mxu1 }
 0xa44   :  { %v765_v6 = vadd.f32 %v759_v5, %v2926_v25  ;;  %v2337_v25 = vld [vmem:[%s2746_s14 + $0x4] sm:$0xf]  ;;  %s2686_s14 = smov 112  }
 0xa45   :  { %2360 = vmatpush.msk.msrb.mxu2 %vm159_vm0, %v2337_v25 }
 0xa46   :  { %v770_v7 = vadd.f32 %v2507_v4, %v765_v6 }
 0xa48   :  { %v772_v8 = vsel %vm152_vm1, %v770_v7, 0.0 }
 0xa49   :  { %773 = vadd.xlane.f32.xlu2 %v772_v8 }
 0xa66   :  { %v762_v9 = vpop.f32.mrf.mxu1 }
 0xa67   :  { %v766_v10 = vadd.f32 %v762_v9, %v2930_v32 }
 0xa69   :  { %v771_v11 = vadd.f32 %v2507_v4, %v766_v10 }
 0xa6b   :  { %v775_v12 = vsel %vm152_vm1, %v771_v11, 0.0 }
 0xa6c   :  { %776 = vadd.xlane.f32.xlu1 %v775_v12 }
 0xabc   :  { %v774_v14 = vpop.xlane.xlu2 %773 }
 0xabd   :  { %v778_v15 = vmul.f32 %v774_v14, %v2892_v57 }
 0xabf   :  { %v780_v16 = vsub.f32 %v770_v7, %v778_v15 }
 0xac1   :  { %v782_v17 = vmul.f32 %v780_v16, %v780_v16 }
 0xac3   :  { %v784_v19 = vsel %vm152_vm1, %v782_v17, 0.0 }
 0xac4   :  { %785 = vadd.xlane.f32.xlu0 %v784_v19 }
 0xadf   :  { %v777_v20 = vpop.xlane.xlu1 %776 }
 0xae0   :  { %v779_v21 = vmul.f32 %v777_v20, %v2892_v57 }
 0xae2   :  { %v781_v22 = vsub.f32 %v771_v11, %v779_v21 }
 0xae4   :  { %v783_v23 = vmul.f32 %v781_v22, %v781_v22 }
 0xae6   :  { %v787_v24 = vsel %vm152_vm1, %v783_v23, 0.0  ;;  %v2365_v23 = vld [vmem:[%s2726_s25 + $0x8] sm:$0xf]  ;;  %s3256_s25 = sld [smem:[#allocation9_spill]] }
 0xae7   :  { %788 = vadd.xlane.f32.xlu1 %v787_v24  ;;  %2367 = vmatpush.msk.msrb.mxu3 %vm159_vm0, %v2365_v23  ;;  %vm1122_vm0 = vcmask 130048  }
 0xb37   :  { %v786_v26 = vpop.xlane.xlu0 %785 }
 0xb38   :  { %v790_v27 = vmul.f32 %v786_v26, %v2892_v57 }
 0xb3a   :  { %v792_v28 = vadd.f32 1e-05, %v790_v27 }
 0xb3c   :  { %2557 = vrsqrt.f32 %v792_v28  ;;  %vm800_vm5 = vweird.f32 %v792_v28 }
 0xb42   :  { %v2558_v29 = vpop.eup %2557 }
 0xb43   :  { %v795_v30 = vmul.f32 %v2558_v29, %v792_v28  ;;  %vm801_vm4 = vweird.f32 %v2558_v29 }
 0xb44   :  { %vm802_vm6 = vmor %vm800_vm5, %vm801_vm4 }
 0xb45   :  { %v796_v31 = vmul.f32 %v2558_v29, %v795_v30 }
 0xb47   :  { %v797_v32 = vmul.f32 0.5, %v796_v31 }
 0xb49   :  { %v798_v33 = vsub.f32 1.5, %v797_v32 }
 0xb4b   :  { %v799_v34 = vmul.f32 %v2558_v29, %v798_v33  ;;  %v2512_v33 = vld [vmem:[%s2776_s18 + $0x1] ss:$0 sm:$0xff]  ;;  %s2690_s18 = smov 8  }
 0xb4d   :  { %v803_v36 = vsel %vm802_vm6, %v2558_v29, %v799_v34 }
 0xb4e   :  { %v814_v37 = vmul.f32 %v803_v36, %v780_v16  ;;  %v2513_v36 = vld [vmem:[%s2781_s26 + $0x1] ss:$0 sm:$0xff]  ;;  %s3259_s26 = sld [smem:[#allocation12_spill]] }
 0xb50   :  { %v819_v39 = vmul.f32 %v2508_v35, %v814_v37 }
 0xb52   :  { %v824_v40 = vadd.f32 %v2509_v38, %v819_v39  ;;  %v1101_v39 = vld [vmem:[%s3254_s3] sm:$0xff] }
 0xb54   :  { %2361 = vmatmul.msk.f32.vlgmr.msrb.gmra.mxu2 %vm152_vm1, %v824_v40 }
 0xb5a   :  { %v789_v42 = vpop.xlane.xlu1 %788 }
 0xb5b   :  { %v791_v43 = vmul.f32 %v789_v42, %v2892_v57 }
 0xb5d   :  { %v793_v44 = vadd.f32 1e-05, %v791_v43 }
 0xb5f   :  { %2559 = vrsqrt.f32 %v793_v44  ;;  %vm810_vm8 = vweird.f32 %v793_v44 }
 0xb65   :  { %v2560_v45 = vpop.eup %2559 }
 0xb66   :  { %v805_v46 = vmul.f32 %v2560_v45, %v793_v44  ;;  %vm811_vm7 = vweird.f32 %v2560_v45 }
 0xb67   :  { %vm812_vm9 = vmor %vm810_vm8, %vm811_vm7 }
 0xb68   :  { %v806_v47 = vmul.f32 %v2560_v45, %v805_v46 }
 0xb6a   :  { %v807_v48 = vmul.f32 0.5, %v806_v47 }
 0xb6c   :  { %v808_v49 = vsub.f32 1.5, %v807_v48 }
 0xb6e   :  { %v809_v50 = vmul.f32 %v2560_v45, %v808_v49 }
 0xb70   :  { %v813_v51 = vsel %vm812_vm9, %v2560_v45, %v809_v50 }
 0xb71   :  { %v815_v52 = vmul.f32 %v813_v51, %v781_v22 }
 0xb73   :  { %v820_v53 = vmul.f32 %v2508_v35, %v815_v52 }
 0xb75   :  { %v825_v54 = vadd.f32 %v2509_v38, %v820_v53  ;;  %v1102_v38 = vld [vmem:[%s3254_s3 + $0x8] sm:$0xff] }
 0xb76   :  { %1143 = vmatpush.msra.mxu0 %v1102_v38 }
 0xb77   :  { %2362 = vmatmul.msk.f32.gmra.mxu2 %vm152_vm1, %v825_v54 }
 0xb78   :  { %1144 = vmatpush.msra.mxu0 %v1101_v39 }
 0xbd7   :  { %v855_v60 = vpop.f32.mrf.mxu2 }
 0xbd8   :  { %v856_v61 = vadd.f32 %v2510_v59, %v855_v60 }
 0xbda   :  { %v861_v62 = vmax.f32 %v856_v61, 0.0 }
 0xbdc   :  { %2363 = vmatmul.msk.f32.vlgmr.msrb.gmra.mxu0 %vm452_vm10, %v861_v62 }
 0xbfa   :  { %v858_v63 = vpop.f32.mrf.mxu2 }
 0xbfb   :  { %v859_v0 = vadd.f32 %v2510_v59, %v858_v63  ;;  %v3012_v63 = vld [vmem:[%s3255_s8 + $0x8] sm:$0xff] }
 0xbfd   :  { %v862_v1 = vmax.f32 %v859_v0, 0.0 }
 0xbff   :  { %2364 = vmatmul.msk.f32.gmra.mxu0 %vm452_vm10, %v862_v1 }
 0xc59   :  { %v886_v3 = vpop.f32.mrf.mxu0 }
 0xc5a   :  { %v892_v4 = vadd.f32 %v886_v3, %v824_v40  ;;  %v2994_v40 = vld [vmem:[%s3255_s8] sm:$0xff] }
 0xc5b   :  { %2374 = vmatmul.msk.f32.vlgmr.msra.gmra.mxu0 %vm1122_vm0, %v2994_v40 }
 0xc5c   :  { %v897_v5 = vadd.f32 %v2511_v2, %v892_v4 }
 0xc5e   :  { %v899_v6 = vsel %vm152_vm1, %v897_v5, 0.0 }
 0xc5f   :  { %900 = vadd.xlane.f32.xlu1 %v899_v6 }
 0xc63   :  { %2375 = vmatmul.msk.f32.gmra.mxu0 %vm1122_vm0, %v3012_v63 }
 0xc7c   :  { %v889_v7 = vpop.f32.mrf.mxu0 }
 0xc7d   :  { %v893_v8 = vadd.f32 %v889_v7, %v825_v54 }
 0xc7f   :  { %v898_v9 = vadd.f32 %v2511_v2, %v893_v8 }
 0xc81   :  { %v902_v10 = vsel %vm152_vm1, %v898_v9, 0.0 }
 0xc82   :  { %903 = vadd.xlane.f32.xlu1 %v902_v10 }
 0xcd2   :  { %v901_v11 = vpop.xlane.xlu1 %900 }
 0xcd3   :  { %v905_v12 = vmul.f32 %v901_v11, %v2892_v57 }
 0xcd5   :  { %v907_v14 = vsub.f32 %v897_v5, %v905_v12 }
 0xcd7   :  { %v909_v15 = vmul.f32 %v907_v14, %v907_v14 }
 0xcd8   :  { %v1146_v55 = vpop.f32.mrf.mxu0 }
 0xcd9   :  { %v911_v16 = vsel %vm152_vm1, %v909_v15, 0.0 }
 0xcda   :  { %912 = vadd.xlane.f32.xlu2 %v911_v16 }
 0xce0   :  { %v1149_v3 = vpop.f32.mrf.mxu0 }
 0xcf5   :  { %v904_v17 = vpop.xlane.xlu1 %903 }
 0xcf6   :  { %v906_v19 = vmul.f32 %v904_v17, %v2892_v57 }
 0xcf8   :  { %v908_v20 = vsub.f32 %v898_v9, %v906_v19 }
 0xcfa   :  { %v910_v21 = vmul.f32 %v908_v20, %v908_v20 }
 0xcfc   :  { %v914_v22 = vsel %vm152_vm1, %v910_v21, 0.0 }
 0xcfd   :  { %915 = vadd.xlane.f32.xlu1 %v914_v22 }
 0xd4d   :  { %v913_v24 = vpop.xlane.xlu2 %912 }
 0xd4e   :  { %v917_v25 = vmul.f32 %v913_v24, %v2892_v57 }
 0xd50   :  { %v919_v26 = vadd.f32 1e-05, %v917_v25 }
 0xd52   :  { %2561 = vrsqrt.f32 %v919_v26  ;;  %vm927_vm12 = vweird.f32 %v919_v26 }
 0xd58   :  { %v2562_v27 = vpop.eup %2561 }
 0xd59   :  { %v922_v28 = vmul.f32 %v2562_v27, %v919_v26  ;;  %vm928_vm11 = vweird.f32 %v2562_v27 }
 0xd5a   :  { %vm929_vm13 = vmor %vm927_vm12, %vm928_vm11 }
 0xd5b   :  { %v923_v29 = vmul.f32 %v2562_v27, %v922_v28 }
 0xd5d   :  { %v924_v30 = vmul.f32 0.5, %v923_v29 }
 0xd5f   :  { %v925_v31 = vsub.f32 1.5, %v924_v30 }
 0xd61   :  { %v926_v32 = vmul.f32 %v2562_v27, %v925_v31 }
 0xd63   :  { %v930_v34 = vsel %vm929_vm13, %v2562_v27, %v926_v32 }
 0xd64   :  { %v941_v35 = vmul.f32 %v930_v34, %v907_v14 }
 0xd66   :  { %v946_v37 = vmul.f32 %v2512_v33, %v941_v35 }
 0xd68   :  { %v951_v41 = vadd.f32 %v2513_v36, %v946_v37 }
 0xd6a   :  { %2368 = vmatmul.msk.f32.vlgmr.msrb.gmra.mxu3 %vm152_vm1, %v951_v41 }
 0xd70   :  { %v916_v42 = vpop.xlane.xlu1 %915 }
 0xd71   :  { %v918_v43 = vmul.f32 %v916_v42, %v2892_v57  ;;  %v2515_v57 = vld [vmem:[%s3256_s25] ss:$0 sm:$0xff] }
 0xd72   :  { %v3002_v56 = vadd.f32 %v2515_v57, %v1146_v55  ;;  %v3023_v4 = vadd.f32 %v2515_v57, %v1149_v3 }
 0xd73   :  { %v920_v44 = vadd.f32 1e-05, %v918_v43 }
 0xd74   :  { %1153 = vrot.lane.b32.xlu0 %v3002_v56, %s2686_s14 }
 0xd75   :  { %2563 = vrsqrt.f32 %v920_v44  ;;  %vm937_vm15 = vweird.f32 %v920_v44 }
 0xd7b   :  { %v2564_v45 = vpop.eup %2563 }
 0xd7c   :  { %v932_v46 = vmul.f32 %v2564_v45, %v920_v44  ;;  %vm938_vm14 = vweird.f32 %v2564_v45 }
 0xd7d   :  { %vm939_vm3 = vmor %vm937_vm15, %vm938_vm14 }
 0xd7e   :  { %v933_v47 = vmul.f32 %v2564_v45, %v932_v46 }
 0xd80   :  { %v934_v48 = vmul.f32 0.5, %v933_v47 }
 0xd82   :  { %v935_v49 = vsub.f32 1.5, %v934_v48 }
 0xd84   :  { %v936_v50 = vmul.f32 %v2564_v45, %v935_v49 }
 0xd86   :  { %v940_v51 = vsel %vm939_vm3, %v2564_v45, %v936_v50 }
 0xd87   :  { %v942_v52 = vmul.f32 %v940_v51, %v908_v20  ;;  %v1094_v20 = vld [vmem:[#allocation2] sm:$0x1] }
 0xd88   :  { %2433 = vpush %v1094_v20 }
 0xd89   :  { %v947_v53 = vmul.f32 %v2512_v33, %v942_v52 }
 0xd8b   :  { %v952_v54 = vadd.f32 %v2513_v36, %v947_v53 }
 0xd8d   :  { %2369 = vmatmul.msk.f32.gmra.mxu3 %vm152_vm1, %v952_v54 }
 0xdb9   :  { %s3041_s24 = spop %2433 }
 0xdba   :  { %v1096_v37 = vstv %s3041_s24 }
 0xde6   :  { %v1154_v1 = vpop.permute.xlu0 %1153 }
 0xde7   :  { %2376 = vmatpush.xpose.msk.msra.mxu3 %vm240_vm2, %v1154_v1 }
 0xdea   :  { %2377 = vmatmul.msk.f32.vlgmr.msra.gmra.mxu3 %vm240_vm2, %v3002_v56 }
 0xded   :  { %v986_v59 = vpop.f32.mrf.mxu3 }
 0xdee   :  { %v987_v60 = vadd.f32 %v2514_v58, %v986_v59  ;;  %v2476_v59 = vpack.i.bf16 %v3023_v4, %v3002_v56 }
 0xdf0   :  { %993 = vrot.lane.b32.xlu2 %v987_v60, %s2684_s5 }
 0xe10   :  { %v989_v61 = vpop.f32.mrf.mxu3 }
 0xe11   :  { %v990_v62 = vadd.f32 %v2514_v58, %v989_v61 }
 0xe13   :  { %1020 = vrot.lane.b32.xlu0 %v990_v62, %s2684_s5 }
 0xe1b   :  { %1230 = vrot.lane.b32.xlu0 %v3002_v56, %s2687_s19 }
 0xe23   :  { %1312 = vrot.lane.b32.xlu0 %v3023_v4, %s2688_s29 }
 0xe2b   :  { %1310 = vrot.lane.b32.xlu0 %v3023_v4, %s2683_s0 }
 0xe33   :  { %1284 = vrot.lane.b32.xlu0 %v3002_v56, %s2688_s29 }
 0xe4a   :  { %v994_v0 = vpop.permute.xlu2 %993 }
 0xe4b   :  { %2370 = vmatpush.xpose.msk.msra.mxu1 %vm152_vm1, %v994_v0 }
 0xe4e   :  { %2371 = vmatmul.msk.f32.vlgmr.msra.gmra.mxu1 %vm152_vm1, %v987_v60 }
 0xe6d   :  { %v1176_v35 = vpop.f32.mrf.mxu3 }
 0xe6e   :  { %v1177_v41 = vadd.f32 %v1176_v35, %v2870_v13 }
 0xe85   :  { %v1021_v2 = vpop.permute.xlu0 %1020 }
 0xe86   :  { %2372 = vmatpush.xpose.msk.msra.mxu2 %vm152_vm1, %v1021_v2 }
 0xe89   :  { %2373 = vmatmul.msk.f32.vlgmr.msra.gmra.mxu2 %vm152_vm1, %v990_v62 }
 0xe8d   :  { %v1231_v8 = vpop.permute.xlu0 %1230 }
 0xe8e   :  { %1251 = vmatpush.msrb.mxu2 %v1231_v8 }
 0xe95   :  { %v1313_v12 = vpop.permute.xlu0 %1312 }
 0xe96   :  { %2384 = vmatpush.xpose.msk.msra.mxu2 %vm240_vm2, %v1313_v12 }
 0xe9d   :  { %v1311_v21 = vpop.permute.xlu0 %1310 }
 0xea5   :  { %v1285_v23 = vpop.permute.xlu0 %1284 }
 0xecb   :  { %v1016_v5 = vpop.f32.mrf.mxu1 }
 0xecc   :  { %v1017_v6 = vadd.f32 %v1016_v5, %v2870_v13 }
 0xece   :  { %v1046_v7 = vsel %vm240_vm2, %v1017_v6, -inf }
 0xecf   :  { %1047 = vmax.xlane.f32.xlu1 %v1046_v7 }
 0xf0c   :  { %v1043_v9 = vpop.f32.mrf.mxu2 }
 0xf0d   :  { %v1044_v10 = vadd.f32 %v1043_v9, %v2874_v18 }
 0xf0f   :  { %v1049_v11 = vsel %vm240_vm2, %v1044_v10, -inf }
 0xf10   :  { %1050 = vmax.xlane.f32.xlu0 %v1049_v11 }
 0xf24   :  { %1256 = vrot.lane.b32.xlu0 %v3023_v4, %s2687_s19 }
 0xf42   :  { %v1048_v14 = vpop.xlane.xlu1 %1047 }
 0xf43   :  { %v1052_v15 = vsub.f32 %v1017_v6, %v1048_v14 }
 0xf45   :  { %v1054_v16 = vmul.f32 1.442695, %v1052_v15 }
 0xf47   :  { %2565 = vpow2.f32 %v1054_v16 }
 0xf4d   :  { %v2566_v17 = vpop.eup %2565 }
 0xf4e   :  { %v1058_v19 = vsel %vm240_vm2, %v2566_v17, 0.0 }
 0xf4f   :  { %1059 = vadd.xlane.f32.xlu1 %v1058_v19 }
 0xf68   :  { %1180 = vrot.lane.b32.xlu1 %v3023_v4, %s2686_s14 }
 0xf83   :  { %v1051_v28 = vpop.xlane.xlu0 %1050 }
 0xf84   :  { %v1053_v32 = vsub.f32 %v1044_v10, %v1051_v28 }
 0xf86   :  { %v1056_v39 = vmul.f32 1.442695, %v1053_v32 }
 0xf96   :  { %v1257_v51 = vpop.permute.xlu0 %1256 }
 0xf97   :  { %1277 = vmatpush.msrb.mxu3 %v1257_v51 }
 0xfc2   :  { %v1060_v22 = vpop.xlane.xlu1 %1059 }
 0xfc3   :  { %2567 = vrcp.f32 %v1060_v22  ;;  %v1075_v27 = vand.u32 2147483648, %v1060_v22  ;;  %v1073_v30 = vand.u32 2147483647, %v1060_v22  ;;  %vm1069_vm4 = vweird.f32 %v1060_v22 }
 0xfc4   :  { %2569 = vpow2.f32 %v1056_v39 }
 0xfc5   :  { %v1076_v33 = vor.u32 1.1754944e-38, %v1075_v27  ;;  %vm1074_vm6 = vcmp.eq.f32.partialorder %v1073_v30, 8.507059e+37 }
 0xfc9   :  { %v2568_v24 = vpop.eup %2567 }
 0xfca   :  { %v1065_v25 = vmul.f32 %v2568_v24, %v1060_v22  ;;  %vm1070_vm1 = vweird.f32 %v2568_v24  ;;  %v2570_v46 = vpop.eup %2569 }
 0xfcb   :  { %vm1071_vm5 = vmor %vm1069_vm4, %vm1070_vm1  ;;  %v1061_v47 = vsel %vm240_vm2, %v2570_v46, 0.0 }
 0xfcc   :  { %v1066_v26 = vsub.f32 1.0, %v1065_v25 }
 0xfce   :  { %v1067_v29 = vmul.f32 %v2568_v24, %v1066_v26 }
 0xfd0   :  { %v1068_v31 = vadd.f32 %v2568_v24, %v1067_v29 }
 0xfd2   :  { %v1072_v34 = vsel %vm1071_vm5, %v2568_v24, %v1068_v31 }
 0xfd3   :  { %v1077_v36 = vsel %vm1074_vm6, %v1076_v33, %v1072_v34 }
 0xfd4   :  { %v1078_v38 = vmul.f32 %v2566_v17, %v1077_v36 }
 0xfd6   :  { %v3047_v42 = vmul.f32 %v1096_v37, %v1078_v38 }
 0xfd8   :  { %v1206_v43 = vadd.f32 %v1177_v41, %v3047_v42 }
 0xfda   :  { %v1181_v44 = vpop.permute.xlu1 %1180  ;;  %v1208_v45 = vsel %vm240_vm2, %v1206_v43, -inf }
 0xfdb   :  { %1209 = vmax.xlane.f32.xlu2 %v1208_v45  ;;  %2378 = vmatpush.xpose.msk.msrb.mxu1 %vm240_vm2, %v1181_v44 }
 0xfde   :  { %2379 = vmatmul.msk.f32.vlgmr.msrb.gmra.mxu1 %vm240_vm2, %v3023_v4 }
 0xfdf   :  { %2382 = vmatpush.xpose.msk.msra.mxu1 %vm240_vm2, %v1285_v23 }
 0xfe3   :  { %1062 = vadd.xlane.f32.xlu2 %v1061_v47 }
0x104e   :  { %v1210_v48 = vpop.xlane.xlu2 %1209 }
0x104f   :  { %v1214_v49 = vsub.f32 %v1206_v43, %v1210_v48 }
0x1051   :  { %v1216_v50 = vmul.f32 1.442695, %v1214_v49 }
0x1053   :  { %2571 = vpow2.f32 %v1216_v50 }
0x1059   :  { %v2572_v52 = vpop.eup %2571 }
0x105a   :  { %v1220_v53 = vsel %vm240_vm2, %v2572_v52, 0.0 }
0x105b   :  { %1221 = vadd.xlane.f32.xlu1 %v1220_v53  ;;  %v1203_v54 = vpop.f32.mrf.mxu1  ;;  %v1105_v53 = vld [vmem:[%s3257_s6 + $0x8] sm:$0xff] }
0x105c   :  { %v1204_v57 = vadd.f32 %v1203_v54, %v2874_v18  ;;  %1444 = vmatpush.msrb.mxu1 %v1105_v53 }
0x105e   :  { %v1207_v55 = vadd.f32 %v1204_v57, %v3047_v42 }
0x1060   :  { %v1211_v58 = vsel %vm240_vm2, %v1207_v55, -inf }
0x1074   :  { %1282 = vrot.lane.b32.xlu1 %v3002_v56, %s2683_s0  ;;  %v1063_v56 = vpop.xlane.xlu2 %1062 }
0x1075   :  { %v1090_v10 = vand.u32 2147483648, %v1063_v56  ;;  %vm1084_vm8 = vweird.f32 %v1063_v56  ;;  %v1088_v11 = vand.u32 2147483647, %v1063_v56 }
0x1077   :  { %v1091_v14 = vor.u32 1.1754944e-38, %v1090_v10  ;;  %vm1089_vm11 = vcmp.eq.f32.partialorder %v1088_v11, 8.507059e+37 }
0x109e   :  { %1212 = vmax.xlane.f32.xlu1 %v1211_v58  ;;  %v1104_v58 = vld [vmem:[%s3257_s6] sm:$0xff] }
0x109f   :  { %1445 = vmatpush.msrb.mxu1 %v1104_v58 }
0x10b7   :  { %2477 = vrot.lane.b32.xlu1 %v2476_v59, %s2689_s30 }
0x10ce   :  { %v1222_v60 = vpop.xlane.xlu1 %1221 }
0x10cf   :  { %2573 = vrcp.f32 %v1222_v60 }
0x10d0   :  { %2575 = vrcp.f32 %v1063_v56 }
0x10d5   :  { %v2574_v61 = vpop.eup %2573 }
0x10d6   :  { %v1228_v62 = vmul.f32 %v2574_v61, %v2572_v52  ;;  %v2576_v4 = vpop.eup %2575 }
0x10d7   :  { %v1080_v6 = vmul.f32 %v2576_v4, %v1063_v56  ;;  %vm1085_vm7 = vweird.f32 %v2576_v4 }
0x10d8   :  { %2380 = vmatmul.msk.f32.vlgmr.msrb.gmra.mxu2 %vm240_vm2, %v1228_v62  ;;  %vm1086_vm9 = vmor %vm1084_vm8, %vm1085_vm7 }
0x10d9   :  { %v1081_v7 = vsub.f32 1.0, %v1080_v6 }
0x10db   :  { %v1082_v8 = vmul.f32 %v2576_v4, %v1081_v7 }
0x10dd   :  { %v1083_v9 = vadd.f32 %v2576_v4, %v1082_v8  ;;  %v2691_v8 = vmov 16.0  }
0x10df   :  { %v1087_v12 = vsel %vm1086_vm9, %v2576_v4, %v1083_v9 }
0x10e0   :  { %2385 = vmatmul.msk.f32.vlgmr.msra.gmra.mxu2 %vm240_vm2, %v1311_v21  ;;  %v1092_v16 = vsel %vm1089_vm11, %v1091_v14, %v1087_v12 }
0x10e1   :  { %v1093_v17 = vmul.f32 %v2570_v46, %v1092_v16 }
0x10e3   :  { %v3071_v21 = vmul.f32 %v1096_v37, %v1093_v17 }
0x10e6   :  { %v1283_v0 = vpop.permute.xlu1 %1282 }
0x10e7   :  { %2383 = vmatmul.msk.f32.vlgmr.msra.gmra.mxu1 %vm240_vm2, %v1283_v0  ;;  %v2516_v0 = vld [vmem:[%s3258_s11] ss:$0 sm:$0xff] }
0x1111   :  { %v1213_v1 = vpop.xlane.xlu1 %1212 }
0x1112   :  { %v1215_v24 = vsub.f32 %v1207_v55, %v1213_v1 }
0x1114   :  { %v1218_v27 = vmul.f32 1.442695, %v1215_v24 }
0x1116   :  { %2577 = vpow2.f32 %v1218_v27  ;;  %v1107_v27 = vld [vmem:[%s3259_s26] sm:$0xff] }
0x111c   :  { %v2578_v30 = vpop.eup %2577 }
0x111d   :  { %v1223_v31 = vsel %vm240_vm2, %v2578_v30, 0.0 }
0x1129   :  { %v2478_v2 = vpop.permute.xlu1 %2477 }
0x112a   :  { %v2480_v3 = vunpack.i.h.bf16 %v2478_v2  ;;  %v2479_v5 = vunpack.i.l.bf16 %v2478_v2 }
0x112c   :  { %1383 = vmatpush.msrb.mxu0 %v2479_v5  ;;  %1409 = vmatpush.msra.mxu3 %v2480_v3 }
0x115b   :  { %v1253_v15 = vpop.f32.mrf.mxu2 }
0x1163   :  { %v1335_v22 = vpop.f32.mrf.mxu2 }
0x1164   :  { %v1307_v19 = vpop.f32.mrf.mxu1  ;;  %v1336_v25 = vadd.f32 %v1335_v22, %v2874_v18 }
0x1165   :  { %v1308_v20 = vadd.f32 %v1307_v19, %v2870_v13 }
0x1166   :  { %v1339_v28 = vadd.f32 %v1336_v25, %v3071_v21 }
0x1167   :  { %v1338_v23 = vadd.f32 %v1308_v20, %v3071_v21 }
0x1168   :  { %v1343_v29 = vsel %vm240_vm2, %v1339_v28, -inf }
0x1169   :  { %v1340_v26 = vsel %vm240_vm2, %v1338_v23, -inf }
0x116a   :  { %1341 = vmax.xlane.f32.xlu2 %v1340_v26  ;;  %v1108_v26 = vld [vmem:[%s3259_s26 + $0x8] sm:$0xff] }
0x116b   :  { %1544 = vmatpush.msrb.mxu2 %v1108_v26 }
0x116d   :  { %1545 = vmatpush.msrb.mxu2 %v1107_v27  ;;  %v2395_v27 = vld [vmem:[%s3254_s3 + $0x18] sm:$0xff] }
0x1172   :  { %1344 = vmax.xlane.f32.xlu2 %v1343_v29 }
0x117a   :  { %1224 = vadd.xlane.f32.xlu2 %v1223_v31 }
0x11dd   :  { %v1342_v32 = vpop.xlane.xlu2 %1341 }
0x11de   :  { %v1346_v33 = vsub.f32 %v1338_v23, %v1342_v32 }
0x11e0   :  { %v1348_v34 = vmul.f32 1.442695, %v1346_v33 }
0x11e2   :  { %2579 = vpow2.f32 %v1348_v34 }
0x11e5   :  { %v1345_v35 = vpop.xlane.xlu2 %1344 }
0x11e6   :  { %v1347_v36 = vsub.f32 %v1339_v28, %v1345_v35 }
0x11e8   :  { %v2580_v37 = vpop.eup %2579  ;;  %v1350_v38 = vmul.f32 1.442695, %v1347_v36 }
0x11e9   :  { %v1352_v39 = vsel %vm240_vm2, %v2580_v37, 0.0 }
0x11ea   :  { %2581 = vpow2.f32 %v1350_v38  ;;  %1353 = vadd.xlane.f32.xlu2 %v1352_v39 }
0x11ed   :  { %v1225_v41 = vpop.xlane.xlu2 %1224 }
0x11ee   :  { %2583 = vrcp.f32 %v1225_v41  ;;  %v2518_v41 = vld [vmem:[%s2831_s10] ss:$0 sm:$0xff] }
0x11f0   :  { %v2582_v43 = vpop.eup %2581 }
0x11f1   :  { %v1355_v44 = vsel %vm240_vm2, %v2582_v43, 0.0 }
0x11f2   :  { %1356 = vadd.xlane.f32.xlu2 %v1355_v44 }
0x11f4   :  { %v2584_v45 = vpop.eup %2583 }
0x11f5   :  { %v1229_v46 = vmul.f32 %v2584_v45, %v2578_v30  ;;  %v1113_v45 = vld [vmem:[%s3261_s21 + $0x18] sm:$0xff] }
0x11f6   :  { %1573 = vmatpush.msra.mxu0 %v1113_v45 }
0x11f7   :  { %2381 = vmatmul.msk.f32.vlgmr.msrb.gmra.mxu3 %vm240_vm2, %v1229_v46 }
0x11f8   :  { %1698 = vmatpush.msrb.mxu3 %v2395_v27 }
0x125d   :  { %v1354_v47 = vpop.xlane.xlu2 %1353 }
0x125e   :  { %2585 = vrcp.f32 %v1354_v47 }
0x1264   :  { %v2586_v48 = vpop.eup %2585 }
0x1265   :  { %v1360_v49 = vmul.f32 %v2586_v48, %v2580_v37  ;;  %v1357_v50 = vpop.xlane.xlu2 %1356  ;;  %v2517_v37 = vld [vmem:[%s3260_s4] ss:$0 sm:$0xff] }
0x1266   :  { %2587 = vrcp.f32 %v1357_v50 }
0x1267   :  { %2386 = vmatmul.msk.f32.vlgmr.msrb.gmra.mxu0 %vm240_vm2, %v1360_v49  ;;  %2589 = vrcp.f32 %v2691_v8 }
0x126c   :  { %v2588_v51 = vpop.eup %2587 }
0x126d   :  { %v1361_v52 = vmul.f32 %v2588_v51, %v2582_v43  ;;  %v2590_v9 = vpop.eup %2589 }
0x126e   :  { %v1467_v10 = vmul.f32 16.0, %v2590_v9  ;;  %vm1471_vm12 = vweird.f32 %v2590_v9 }
0x126f   :  { %2387 = vmatmul.msk.f32.vlgmr.msra.gmra.mxu3 %vm240_vm2, %v1361_v52 }
0x1270   :  { %v1468_v11 = vsub.f32 1.0, %v1467_v10 }
0x1272   :  { %v1469_v12 = vmul.f32 %v2590_v9, %v1468_v11 }
0x1274   :  { %v1470_v14 = vadd.f32 %v2590_v9, %v1469_v12 }
0x127a   :  { %v1279_v57 = vpop.f32.mrf.mxu3 }
0x12e4   :  { %v1385_v54 = vpop.f32.mrf.mxu0 }
0x12e5   :  { %1416 = vrot.lane.b32.xlu2 %v1385_v54, %s2690_s18 }
0x12f2   :  { %v1411_v55 = vpop.f32.mrf.mxu3 }
0x12f3   :  { %1418 = vrot.lane.b32.xlu0 %v1411_v55, %s2690_s18 }
0x133f   :  { %v1417_v59 = vpop.permute.xlu2 %1416 }
0x1340   :  { %v1422_v60 = vsel %vm240_vm2, %v1253_v15, %v1417_v59 }
0x1341   :  { %2388 = vmatmul.msk.f32.vlgmr.msrb.gmra.mxu1 %vm1122_vm0, %v1422_v60  ;;  %v1112_v60 = vld [vmem:[%s3261_s21 + $0x10] sm:$0xff] }
0x1342   :  { %1574 = vmatpush.msra.mxu0 %v1112_v60  ;;  %v2523_v60 = vld [vmem:[%s3256_s25 + $0x1] ss:$0 sm:$0xff] }
0x1365   :  { %v1419_v61 = vpop.permute.xlu0 %1418 }
0x1366   :  { %v1423_v62 = vsel %vm240_vm2, %v1279_v57, %v1419_v61  ;;  %v1111_v61 = vld [vmem:[%s3261_s21 + $0x8] sm:$0xff] }
0x1367   :  { %2389 = vmatmul.msk.f32.gmra.mxu1 %vm1122_vm0, %v1423_v62  ;;  %1575 = vmatpush.msra.mxu0 %v1111_v61  ;;  %v1110_v62 = vld [vmem:[%s3261_s21] sm:$0xff] }
0x1369   :  { %1576 = vmatpush.msra.mxu0 %v1110_v62 }
0x13be   :  { %v1447_v1 = vpop.f32.mrf.mxu1 }
0x13bf   :  { %v1453_v2 = vadd.f32 %v1447_v1, %v2994_v40  ;;  %v3097_v40 = vsel %vm1471_vm12, %v2590_v9, %v1470_v14 }
0x13c1   :  { %v1458_v3 = vadd.f32 %v2516_v0, %v1453_v2 }
0x13c3   :  { %v1460_v5 = vsel %vm1122_vm0, %v1458_v3, 0.0 }
0x13c4   :  { %1461 = vadd.xlane.f32.xlu0 %v1460_v5 }
0x13e4   :  { %v1450_v56 = vpop.f32.mrf.mxu1 }
0x13e5   :  { %v1454_v4 = vadd.f32 %v1450_v56, %v3012_v63 }
0x13e7   :  { %v1459_v6 = vadd.f32 %v2516_v0, %v1454_v4  ;;  %v2519_v0 = vld [vmem:[%s3262_s7] ss:$0 sm:$0xff] }
0x13e9   :  { %v1463_v7 = vsel %vm1122_vm0, %v1459_v6, 0.0 }
0x13ea   :  { %1464 = vadd.xlane.f32.xlu1 %v1463_v7 }
0x1437   :  { %v1462_v15 = vpop.xlane.xlu0 %1461 }
0x1438   :  { %v1473_v16 = vmul.f32 %v3097_v40, %v1462_v15 }
0x143a   :  { %v1475_v63 = vsub.f32 %v1458_v3, %v1473_v16 }
0x143c   :  { %v1477_v17 = vmul.f32 %v1475_v63, %v1475_v63 }
0x143e   :  { %v1479_v19 = vsel %vm1122_vm0, %v1477_v17, 0.0 }
0x143f   :  { %1480 = vadd.xlane.f32.xlu2 %v1479_v19 }
0x145d   :  { %v1465_v20 = vpop.xlane.xlu1 %1464 }
0x145e   :  { %v1474_v22 = vmul.f32 %v3097_v40, %v1465_v20 }
0x1460   :  { %v1476_v23 = vsub.f32 %v1459_v6, %v1474_v22  ;;  %v2520_v6 = vld [vmem:[%s3263_s12] ss:$0 sm:$0xff] }
0x1462   :  { %v1478_v24 = vmul.f32 %v1476_v23, %v1476_v23 }
0x1464   :  { %v1482_v25 = vsel %vm1122_vm0, %v1478_v24, 0.0 }
0x1465   :  { %1483 = vadd.xlane.f32.xlu0 %v1482_v25 }
0x14b2   :  { %v1481_v28 = vpop.xlane.xlu2 %1480 }
0x14b3   :  { %v1485_v29 = vmul.f32 %v1481_v28, %v3097_v40  ;;  %v2394_v28 = vld [vmem:[%s3254_s3 + $0x10] sm:$0xff] }
0x14b4   :  { %1699 = vmatpush.msrb.mxu3 %v2394_v28 }
0x14b5   :  { %v1487_v30 = vadd.f32 1e-05, %v1485_v29 }
0x14b7   :  { %2591 = vrsqrt.f32 %v1487_v30  ;;  %vm1495_vm14 = vweird.f32 %v1487_v30 }
0x14bd   :  { %v2592_v31 = vpop.eup %2591 }
0x14be   :  { %v1490_v32 = vmul.f32 %v2592_v31, %v1487_v30  ;;  %vm1496_vm13 = vweird.f32 %v2592_v31 }
0x14bf   :  { %vm1497_vm15 = vmor %vm1495_vm14, %vm1496_vm13 }
0x14c0   :  { %v1491_v33 = vmul.f32 %v2592_v31, %v1490_v32 }
0x14c2   :  { %v1492_v34 = vmul.f32 0.5, %v1491_v33 }
0x14c4   :  { %v1493_v35 = vsub.f32 1.5, %v1492_v34 }
0x14c6   :  { %v1494_v36 = vmul.f32 %v2592_v31, %v1493_v35 }
0x14c8   :  { %v1498_v38 = vsel %vm1497_vm15, %v2592_v31, %v1494_v36 }
0x14c9   :  { %v1509_v39 = vmul.f32 %v1498_v38, %v1475_v63  ;;  %v2521_v38 = vld [vmem:[%s2836_s17] ss:$0 sm:$0xff] }
0x14cb   :  { %v1514_v43 = vmul.f32 %v2517_v37, %v1509_v39 }
0x14cd   :  { %v1519_v44 = vadd.f32 %v2518_v41, %v1514_v43  ;;  %v2522_v43 = vld [vmem:[%s2841_s9] ss:$0 sm:$0xff] }
0x14cf   :  { %2390 = vmatmul.msk.f32.vlgmr.msrb.gmra.mxu2 %vm1122_vm0, %v1519_v44 }
0x14d8   :  { %v1484_v46 = vpop.xlane.xlu0 %1483 }
0x14d9   :  { %v1486_v47 = vmul.f32 %v1484_v46, %v3097_v40 }
0x14db   :  { %v1488_v48 = vadd.f32 1e-05, %v1486_v47 }
0x14dd   :  { %2593 = vrsqrt.f32 %v1488_v48  ;;  %vm1505_vm1 = vweird.f32 %v1488_v48 }
0x14e3   :  { %v2594_v49 = vpop.eup %2593 }
0x14e4   :  { %v1500_v50 = vmul.f32 %v2594_v49, %v1488_v48  ;;  %vm1506_vm3 = vweird.f32 %v2594_v49 }
0x14e5   :  { %vm1507_vm4 = vmor %vm1505_vm1, %vm1506_vm3 }
0x14e6   :  { %v1501_v51 = vmul.f32 %v2594_v49, %v1500_v50 }
0x14e8   :  { %v1502_v52 = vmul.f32 0.5, %v1501_v51 }
0x14ea   :  { %v1503_v53 = vsub.f32 1.5, %v1502_v52 }
0x14ec   :  { %v1504_v54 = vmul.f32 %v2594_v49, %v1503_v53 }
0x14ee   :  { %v1508_v57 = vsel %vm1507_vm4, %v2594_v49, %v1504_v54 }
0x14ef   :  { %v1510_v55 = vmul.f32 %v1508_v57, %v1476_v23 }
0x14f1   :  { %v1515_v58 = vmul.f32 %v2517_v37, %v1510_v55 }
0x14f3   :  { %v1520_v59 = vadd.f32 %v2518_v41, %v1515_v58 }
0x14f5   :  { %2391 = vmatmul.msk.f32.gmra.mxu2 %vm1122_vm0, %v1520_v59 }
0x1552   :  { %v1547_v1 = vpop.f32.mrf.mxu2 }
0x1553   :  { %v1548_v2 = vadd.f32 %v2519_v0, %v1547_v1 }
0x1555   :  { %v1553_v3 = vmax.f32 %v1548_v2, 0.0 }
0x1557   :  { %2392 = vmatmul.msk.f32.vlgmr.msra.gmra.mxu0 %vm452_vm10, %v1553_v3 }
0x1578   :  { %v1550_v5 = vpop.f32.mrf.mxu2 }
0x1579   :  { %v1551_v56 = vadd.f32 %v2519_v0, %v1550_v5 }
0x157b   :  { %v1554_v4 = vmax.f32 %v1551_v56, 0.0 }
0x157d   :  { %2393 = vmatmul.msk.f32.gmra.mxu0 %vm452_vm10, %v1554_v4 }
0x15d4   :  { %v1578_v7 = vpop.f32.mrf.mxu0 }
0x15d5   :  { %v1584_v8 = vadd.f32 %v1578_v7, %v1519_v44 }
0x15d7   :  { %v1589_v9 = vadd.f32 %v2520_v6, %v1584_v8 }
0x15d9   :  { %v1591_v10 = vsel %vm1122_vm0, %v1589_v9, 0.0 }
0x15da   :  { %1592 = vadd.xlane.f32.xlu1 %v1591_v10 }
0x15fa   :  { %v1581_v11 = vpop.f32.mrf.mxu0 }
0x15fb   :  { %v1585_v12 = vadd.f32 %v1581_v11, %v1520_v59 }
0x15fd   :  { %v1590_v14 = vadd.f32 %v2520_v6, %v1585_v12 }
0x15ff   :  { %v1594_v15 = vsel %vm1122_vm0, %v1590_v14, 0.0 }
0x1600   :  { %1595 = vadd.xlane.f32.xlu2 %v1594_v15 }
0x164d   :  { %v1593_v16 = vpop.xlane.xlu1 %1592 }
0x164e   :  { %v1597_v63 = vmul.f32 %v1593_v16, %v3097_v40 }
0x1650   :  { %v1599_v17 = vsub.f32 %v1589_v9, %v1597_v63 }
0x1652   :  { %v1601_v19 = vmul.f32 %v1599_v17, %v1599_v17 }
0x1654   :  { %v1603_v20 = vsel %vm1122_vm0, %v1601_v19, 0.0 }
0x1655   :  { %1604 = vadd.xlane.f32.xlu0 %v1603_v20 }
0x1673   :  { %v1596_v22 = vpop.xlane.xlu2 %1595 }
0x1674   :  { %v1598_v23 = vmul.f32 %v1596_v22, %v3097_v40 }
0x1676   :  { %v1600_v24 = vsub.f32 %v1590_v14, %v1598_v23 }
0x1678   :  { %v1602_v25 = vmul.f32 %v1600_v24, %v1600_v24 }
0x167a   :  { %v1606_v26 = vsel %vm1122_vm0, %v1602_v25, 0.0 }
0x167b   :  { %1607 = vadd.xlane.f32.xlu1 %v1606_v26 }
0x16c8   :  { %v1605_v29 = vpop.xlane.xlu0 %1604 }
0x16c9   :  { %v1609_v30 = vmul.f32 %v1605_v29, %v3097_v40 }
0x16cb   :  { %v1611_v31 = vadd.f32 1e-05, %v1609_v30 }
0x16cd   :  { %2595 = vrsqrt.f32 %v1611_v31  ;;  %vm1619_vm6 = vweird.f32 %v1611_v31 }
0x16d3   :  { %v2596_v32 = vpop.eup %2595 }
0x16d4   :  { %v1614_v33 = vmul.f32 %v2596_v32, %v1611_v31  ;;  %vm1620_vm5 = vweird.f32 %v2596_v32 }
0x16d5   :  { %vm1621_vm7 = vmor %vm1619_vm6, %vm1620_vm5 }
0x16d6   :  { %v1615_v34 = vmul.f32 %v2596_v32, %v1614_v33 }
0x16d8   :  { %v1616_v35 = vmul.f32 0.5, %v1615_v34 }
0x16da   :  { %v1617_v36 = vsub.f32 1.5, %v1616_v35 }
0x16dc   :  { %v1618_v37 = vmul.f32 %v2596_v32, %v1617_v36 }
0x16de   :  { %v1622_v39 = vsel %vm1621_vm7, %v2596_v32, %v1618_v37 }
0x16df   :  { %v1633_v41 = vmul.f32 %v1622_v39, %v1599_v17 }
0x16e1   :  { %v1638_v44 = vmul.f32 %v2521_v38, %v1633_v41 }
0x16e3   :  { %v3130_v45 = vadd.f32 %v2522_v43, %v1638_v44 }
0x16e5   :  { %2412 = vmatmul.msk.f32.vlgmr.msrb.gmra.mxu3 %vm1122_vm0, %v3130_v45 }
0x16ee   :  { %v1608_v46 = vpop.xlane.xlu1 %1607 }
0x16ef   :  { %v1610_v47 = vmul.f32 %v1608_v46, %v3097_v40 }
0x16f1   :  { %v1612_v48 = vadd.f32 1e-05, %v1610_v47 }
0x16f3   :  { %2597 = vrsqrt.f32 %v1612_v48  ;;  %vm1629_vm9 = vweird.f32 %v1612_v48 }
0x16f9   :  { %v2598_v49 = vpop.eup %2597 }
0x16fa   :  { %v1624_v50 = vmul.f32 %v2598_v49, %v1612_v48  ;;  %vm1630_vm8 = vweird.f32 %v2598_v49 }
0x16fb   :  { %vm1631_vm11 = vmor %vm1629_vm9, %vm1630_vm8 }
0x16fc   :  { %v1625_v51 = vmul.f32 %v2598_v49, %v1624_v50 }
0x16fe   :  { %v1626_v52 = vmul.f32 0.5, %v1625_v51 }
0x1700   :  { %v1627_v53 = vsub.f32 1.5, %v1626_v52 }
0x1702   :  { %v1628_v54 = vmul.f32 %v2598_v49, %v1627_v53 }
0x1704   :  { %v1632_v57 = vsel %vm1631_vm11, %v2598_v49, %v1628_v54 }
0x1705   :  { %v1634_v55 = vmul.f32 %v1632_v57, %v1600_v24 }
0x1707   :  { %v1639_v58 = vmul.f32 %v2521_v38, %v1634_v55 }
0x1709   :  { %v3135_v59 = vadd.f32 %v2522_v43, %v1639_v58 }
0x170b   :  { %2413 = vmatmul.msk.f32.gmra.mxu3 %vm1122_vm0, %v3135_v59 }
0x1768   :  { %v1701_v61 = vpop.f32.mrf.mxu3 }
0x1769   :  { %v1702_v62 = vadd.f32 %v2523_v60, %v1701_v61 }
0x176b   :  { %1708 = vrot.lane.b32.xlu0 %v1702_v62, %s2686_s14 }
0x1773   :  { %1839 = vrot.lane.b32.xlu0 %v1702_v62, %s2688_s29 }
0x178e   :  { %v1704_v0 = vpop.f32.mrf.mxu3 }
0x178f   :  { %v1705_v1 = vadd.f32 %v2523_v60, %v1704_v0 }
0x1791   :  { %1867 = vrot.lane.b32.xlu1 %v1705_v1, %s2688_s29  ;;  %1735 = vrot.lane.b32.xlu2 %v1705_v1, %s2686_s14 }
0x1799   :  { %1837 = vrot.lane.b32.xlu1 %v1702_v62, %s2683_s0  ;;  %1865 = vrot.lane.b32.xlu2 %v1705_v1, %s2683_s0 }
0x17dd   :  { %v1709_v2 = vpop.permute.xlu0 %1708 }
0x17de   :  { %2414 = vmatpush.xpose.msk.msra.mxu1 %vm240_vm2, %v1709_v2  ;;  %v2398_v2 = vld [vmem:[%s3257_s6 + $0x18] sm:$0xff] }
0x17e1   :  { %2415 = vmatmul.msk.f32.vlgmr.msra.gmra.mxu1 %vm240_vm2, %v1702_v62 }
0x17e5   :  { %v1840_v3 = vpop.permute.xlu0 %1839 }
0x17e6   :  { %2420 = vmatpush.xpose.msk.msrb.mxu1 %vm240_vm2, %v1840_v3 }
0x17ea   :  { %1999 = vmatpush.msra.mxu1 %v2398_v2  ;;  %v2527_v2 = vld [vmem:[%s3262_s7 + $0x1] ss:$0 sm:$0xff] }
0x17eb   :  { %v1736_v5 = vpop.permute.xlu2 %1735 }
0x17ec   :  { %2416 = vmatpush.xpose.msk.msra.mxu2 %vm240_vm2, %v1736_v5 }
0x17ef   :  { %2417 = vmatmul.msk.f32.vlgmr.msra.gmra.mxu2 %vm240_vm2, %v1705_v1 }
0x17f3   :  { %v1866_v4 = vpop.permute.xlu2 %1865 }
0x1803   :  { %v1868_v56 = vpop.permute.xlu1 %1867 }
0x1804   :  { %2422 = vmatpush.xpose.msk.msrb.mxu2 %vm240_vm2, %v1868_v56 }
0x1807   :  { %2423 = vmatmul.msk.f32.vlgmr.msrb.gmra.mxu2 %vm240_vm2, %v1866_v4 }
0x180b   :  { %v1838_v6 = vpop.permute.xlu1 %1837 }
0x180c   :  { %2421 = vmatmul.msk.f32.vlgmr.msrb.gmra.mxu1 %vm240_vm2, %v1838_v6  ;;  %v2397_v6 = vld [vmem:[%s3257_s6 + $0x10] sm:$0xff] }
0x180d   :  { %2000 = vmatpush.msra.mxu1 %v2397_v6 }
0x185e   :  { %v1731_v7 = vpop.f32.mrf.mxu1 }
0x185f   :  { %v1732_v8 = vadd.f32 %v1731_v7, %v2870_v13 }
0x1861   :  { %v1761_v9 = vadd.f32 %v1732_v8, %v3047_v42 }
0x1863   :  { %v1763_v10 = vsel %vm240_vm2, %v1761_v9, -inf }
0x1864   :  { %1764 = vmax.xlane.f32.xlu2 %v1763_v10 }
0x1872   :  { %v1758_v11 = vpop.f32.mrf.mxu2 }
0x1873   :  { %v1759_v12 = vadd.f32 %v1758_v11, %v2874_v18  ;;  %v2524_v11 = vld [vmem:[%s3258_s11 + $0x1] ss:$0 sm:$0xff] }
0x1875   :  { %v1762_v14 = vadd.f32 %v1759_v12, %v3047_v42 }
0x1877   :  { %v1766_v15 = vsel %vm240_vm2, %v1762_v14, -inf }
0x1878   :  { %1767 = vmax.xlane.f32.xlu0 %v1766_v15 }
0x1889   :  { %v1862_v16 = vpop.f32.mrf.mxu1 }
0x188a   :  { %v1863_v63 = vadd.f32 %v1862_v16, %v2870_v13  ;;  %v1890_v17 = vpop.f32.mrf.mxu2 }
0x188b   :  { %v1891_v19 = vadd.f32 %v1890_v17, %v2874_v18 }
0x188c   :  { %v1893_v20 = vadd.f32 %v1863_v63, %v3071_v21 }
0x188d   :  { %v1894_v22 = vadd.f32 %v1891_v19, %v3071_v21  ;;  %v2481_v21 = vpack.i.bf16 %v1705_v1, %v1702_v62 }
0x188e   :  { %v1895_v23 = vsel %vm240_vm2, %v1893_v20, -inf }
0x188f   :  { %1896 = vmax.xlane.f32.xlu1 %v1895_v23  ;;  %v1898_v24 = vsel %vm240_vm2, %v1894_v22, -inf }
0x1890   :  { %1899 = vmax.xlane.f32.xlu2 %v1898_v24 }
0x18d7   :  { %v1765_v42 = vpop.xlane.xlu2 %1764 }
0x18d8   :  { %v1769_v25 = vsub.f32 %v1761_v9, %v1765_v42 }
0x18da   :  { %v1771_v26 = vmul.f32 1.442695, %v1769_v25 }
0x18dc   :  { %2599 = vpow2.f32 %v1771_v26 }
0x18e2   :  { %v2600_v27 = vpop.eup %2599 }
0x18e3   :  { %v1775_v13 = vsel %vm240_vm2, %v2600_v27, 0.0 }
0x18e4   :  { %1776 = vadd.xlane.f32.xlu0 %v1775_v13 }
0x18eb   :  { %v1768_v28 = vpop.xlane.xlu0 %1767 }
0x18ec   :  { %v1770_v18 = vsub.f32 %v1762_v14, %v1768_v28  ;;  %v2401_v28 = vld [vmem:[%s3259_s26 + $0x18] sm:$0xff] }
0x18ed   :  { %2092 = vmatpush.msra.mxu2 %v2401_v28 }
0x18ee   :  { %v1773_v29 = vmul.f32 1.442695, %v1770_v18  ;;  %v2400_v18 = vld [vmem:[%s3259_s26 + $0x10] sm:$0xff] }
0x18ef   :  { %2093 = vmatpush.msra.mxu2 %v2400_v18  ;;  %v2627_v18 = vld [vmem:[%s2713_s13] sm:$0x3] }
0x18f0   :  { %2601 = vpow2.f32 %v1773_v29 }
0x18f6   :  { %v2602_v30 = vpop.eup %2601 }
0x18f7   :  { %v1778_v31 = vsel %vm240_vm2, %v2602_v30, 0.0 }
0x18f8   :  { %1779 = vadd.xlane.f32.xlu2 %v1778_v31  ;;  %2482 = vrot.lane.b32.xlu0 %v2481_v21, %s2687_s19 }
0x1902   :  { %v1897_v32 = vpop.xlane.xlu1 %1896 }
0x1903   :  { %v1901_v33 = vsub.f32 %v1893_v20, %v1897_v32  ;;  %v1900_v34 = vpop.xlane.xlu2 %1899 }
0x1904   :  { %v1902_v35 = vsub.f32 %v1894_v22, %v1900_v34 }
0x1905   :  { %v1903_v36 = vmul.f32 1.442695, %v1901_v33 }
0x1906   :  { %v1905_v37 = vmul.f32 1.442695, %v1902_v35 }
0x1907   :  { %2603 = vpow2.f32 %v1903_v36 }
0x1908   :  { %2605 = vpow2.f32 %v1905_v37  ;;  %v2525_v37 = vld [vmem:[%s3260_s4 + $0x1] ss:$0 sm:$0xff] }
0x190d   :  { %v2604_v38 = vpop.eup %2603 }
0x190e   :  { %v2606_v39 = vpop.eup %2605  ;;  %v1907_v41 = vsel %vm240_vm2, %v2604_v38, 0.0 }
0x190f   :  { %1908 = vadd.xlane.f32.xlu1 %v1907_v41  ;;  %v1910_v43 = vsel %vm240_vm2, %v2606_v39, 0.0  ;;  %v2526_v41 = vld [vmem:[%s2831_s10 + $0x1] ss:$0 sm:$0xff]  ;;  %s3264_s10 = sld [smem:[#allocation7_spill]] }
0x1910   :  { %1911 = vadd.xlane.f32.xlu2 %v1910_v43 }
0x1928   :  { %2487 = vrot.lane.b32.xlu1 %v2481_v21, %s2689_s30 }
0x1957   :  { %v1777_v44 = vpop.xlane.xlu0 %1776 }
0x1958   :  { %2607 = vrcp.f32 %v1777_v44 }
0x195e   :  { %v2608_v46 = vpop.eup %2607 }
0x195f   :  { %v1783_v51 = vmul.f32 %v2608_v46, %v2600_v27  ;;  %v2406_v46 = vld [vmem:[%s3261_s21 + $0x38] sm:$0xff] }
0x196a   :  { %v2483_v47 = vpop.permute.xlu0 %2482 }
0x196b   :  { %v2485_v48 = vunpack.i.h.bf16 %v2483_v47  ;;  %v2484_v49 = vunpack.i.l.bf16 %v2483_v47  ;;  %v1780_v50 = vpop.xlane.xlu2 %1779 }
0x196c   :  { %2609 = vrcp.f32 %v1780_v50 }
0x196d   :  { %1806 = vmatpush.msrb.mxu0 %v2484_v49  ;;  %1832 = vmatpush.msra.mxu3 %v2485_v48 }
0x196e   :  { %2418 = vmatmul.msk.f32.vlgmr.msrb.gmra.mxu0 %vm240_vm2, %v1783_v51 }
0x1972   :  { %v2610_v52 = vpop.eup %2609 }
0x1973   :  { %v1784_v53 = vmul.f32 %v2610_v52, %v2602_v30 }
0x1975   :  { %2419 = vmatmul.msk.f32.vlgmr.msra.gmra.mxu3 %vm240_vm2, %v1784_v53 }
0x1982   :  { %v1909_v54 = vpop.xlane.xlu1 %1908 }
0x1983   :  { %v1912_v57 = vpop.xlane.xlu2 %1911  ;;  %2611 = vrcp.f32 %v1909_v54 }
0x1984   :  { %2613 = vrcp.f32 %v1912_v57 }
0x1989   :  { %v2612_v55 = vpop.eup %2611 }
0x198a   :  { %v2614_v58 = vpop.eup %2613  ;;  %v1915_v0 = vmul.f32 %v2612_v55, %v2604_v38 }
0x198b   :  { %v1916_v1 = vmul.f32 %v2614_v58, %v2606_v39 }
0x199a   :  { %v2488_v60 = vpop.permute.xlu1 %2487 }
0x199b   :  { %v2490_v61 = vunpack.i.h.bf16 %v2488_v60  ;;  %v2489_v62 = vunpack.i.l.bf16 %v2488_v60 }
0x199d   :  { %1938 = vmatpush.msra.mxu0 %v2489_v62  ;;  %1964 = vmatpush.msrb.mxu3 %v2490_v61  ;;  %v2405_v62 = vld [vmem:[%s3261_s21 + $0x30] sm:$0xff] }
0x199e   :  { %2424 = vmatmul.msk.f32.vlgmr.msra.gmra.mxu0 %vm240_vm2, %v1915_v0  ;;  %2425 = vmatmul.msk.f32.vlgmr.msrb.gmra.mxu3 %vm240_vm2, %v1916_v1  ;;  %v2404_v0 = vld [vmem:[%s3261_s21 + $0x28] sm:$0xff]  ;;  %v2403_v1 = vld [vmem:[%s3261_s21 + $0x20] sm:$0xff] }
0x199f   :  { %2121 = vmatpush.msrb.mxu0 %v2406_v46 }
0x19a1   :  { %2122 = vmatpush.msrb.mxu0 %v2405_v62 }
0x19a3   :  { %2123 = vmatpush.msrb.mxu0 %v2404_v0 }
0x19a5   :  { %2124 = vmatpush.msrb.mxu0 %v2403_v1 }
0x19eb   :  { %v1808_v3 = vpop.f32.mrf.mxu0 }
0x19f8   :  { %v1834_v5 = vpop.f32.mrf.mxu3 }
0x1a1b   :  { %v1940_v56 = vpop.f32.mrf.mxu0 }
0x1a1c   :  { %1971 = vrot.lane.b32.xlu2 %v1940_v56, %s2690_s18 }
0x1a21   :  { %v1966_v4 = vpop.f32.mrf.mxu3 }
0x1a22   :  { %1973 = vrot.lane.b32.xlu0 %v1966_v4, %s2690_s18 }
0x1a76   :  { %v1972_v7 = vpop.permute.xlu2 %1971 }
0x1a77   :  { %v1977_v8 = vsel %vm240_vm2, %v1808_v3, %v1972_v7 }
0x1a78   :  { %2426 = vmatmul.msk.f32.vlgmr.msra.gmra.mxu1 %vm1122_vm0, %v1977_v8  ;;  %v2528_v8 = vld [vmem:[%s3263_s12 + $0x1] ss:$0 sm:$0xff] }
0x1a94   :  { %v1974_v9 = vpop.permute.xlu0 %1973 }
0x1a95   :  { %v1978_v10 = vsel %vm240_vm2, %v1834_v5, %v1974_v9 }
0x1a96   :  { %2427 = vmatmul.msk.f32.gmra.mxu1 %vm1122_vm0, %v1978_v10 }
0x1af5   :  { %v2002_v12 = vpop.f32.mrf.mxu1 }
0x1af6   :  { %v2008_v14 = vadd.f32 %v2002_v12, %v3130_v45 }
0x1af8   :  { %v2013_v15 = vadd.f32 %v2524_v11, %v2008_v14 }
0x1afa   :  { %v2015_v16 = vsel %vm1122_vm0, %v2013_v15, 0.0 }
0x1afb   :  { %2016 = vadd.xlane.f32.xlu0 %v2015_v16 }
0x1b13   :  { %v2005_v63 = vpop.f32.mrf.mxu1 }
0x1b14   :  { %v2009_v17 = vadd.f32 %v2005_v63, %v3135_v59 }
0x1b16   :  { %v2014_v19 = vadd.f32 %v2524_v11, %v2009_v17 }
0x1b18   :  { %v2018_v20 = vsel %vm1122_vm0, %v2014_v19, 0.0 }
0x1b19   :  { %2019 = vadd.xlane.f32.xlu1 %v2018_v20 }
0x1b6e   :  { %v2017_v22 = vpop.xlane.xlu0 %2016 }
0x1b6f   :  { %v2021_v23 = vmul.f32 %v2017_v22, %v3097_v40 }
0x1b71   :  { %v2023_v24 = vsub.f32 %v2013_v15, %v2021_v23  ;;  %v2225_v23 = vld [vmem:[%s3264_s10] sm:$0x3] }
0x1b73   :  { %v2025_v42 = vmul.f32 %v2023_v24, %v2023_v24 }
0x1b75   :  { %v2027_v45 = vsel %vm1122_vm0, %v2025_v42, 0.0 }
0x1b76   :  { %2028 = vadd.xlane.f32.xlu2 %v2027_v45  ;;  %v2692_v45 = vmov 0  }
0x1b77   :  { %2491 = vset.pattern.permute.xlu0 %v2692_v45 }
0x1b8c   :  { %v2020_v25 = vpop.xlane.xlu1 %2019 }
0x1b8d   :  { %v2022_v26 = vmul.f32 %v2020_v25, %v3097_v40 }
0x1b8f   :  { %v2024_v27 = vsub.f32 %v2014_v19, %v2022_v26 }
0x1b91   :  { %v2026_v13 = vmul.f32 %v2024_v27, %v2024_v27 }
0x1b93   :  { %v2030_v59 = vsel %vm1122_vm0, %v2026_v13, 0.0 }
0x1b94   :  { %2031 = vadd.xlane.f32.xlu0 %v2030_v59 }
0x1be9   :  { %v2029_v29 = vpop.xlane.xlu2 %2028 }
0x1bea   :  { %v2033_v30 = vmul.f32 %v2029_v29, %v3097_v40  ;;  %v2693_v29 = vmov 1.0  }
0x1bec   :  { %v2035_v21 = vadd.f32 1e-05, %v2033_v30 }
0x1bee   :  { %2615 = vrsqrt.f32 %v2035_v21  ;;  %vm2043_vm12 = vweird.f32 %v2035_v21 }
0x1bf4   :  { %v2616_v31 = vpop.eup %2615 }
0x1bf5   :  { %v2038_v32 = vmul.f32 %v2616_v31, %v2035_v21  ;;  %vm2044_vm2 = vweird.f32 %v2616_v31 }
0x1bf6   :  { %vm2045_vm13 = vmor %vm2043_vm12, %vm2044_vm2 }
0x1bf7   :  { %v2039_v33 = vmul.f32 %v2616_v31, %v2038_v32 }
0x1bf9   :  { %v2040_v34 = vmul.f32 0.5, %v2039_v33 }
0x1bfb   :  { %v2041_v35 = vsub.f32 1.5, %v2040_v34 }
0x1bfd   :  { %v2042_v36 = vmul.f32 %v2616_v31, %v2041_v35 }
0x1bff   :  { %v2046_v38 = vsel %vm2045_vm13, %v2616_v31, %v2042_v36 }
0x1c00   :  { %v2057_v39 = vmul.f32 %v2046_v38, %v2023_v24  ;;  %v2196_v24 = vlaneseq }
0x1c02   :  { %v2062_v43 = vmul.f32 %v2525_v37, %v2057_v39  ;;  %v2197_v25 = vshrl.u32 %v2196_v24, 7 }
0x1c04   :  { %v2067_v44 = vadd.f32 %v2526_v41, %v2062_v43  ;;  %2492 = vset.pattern.permute.xlu2 %v2197_v25 }
0x1c06   :  { %2428 = vmatmul.msk.f32.vlgmr.msra.gmra.mxu2 %vm1122_vm0, %v2067_v44 }
0x1c07   :  { %v2032_v47 = vpop.xlane.xlu0 %2031 }
0x1c08   :  { %v2034_v48 = vmul.f32 %v2032_v47, %v3097_v40 }
0x1c0a   :  { %v2036_v49 = vadd.f32 1e-05, %v2034_v48 }
0x1c0c   :  { %2617 = vrsqrt.f32 %v2036_v49  ;;  %vm2053_vm15 = vweird.f32 %v2036_v49 }
0x1c12   :  { %v2618_v50 = vpop.eup %2617 }
0x1c13   :  { %v2048_v51 = vmul.f32 %v2618_v50, %v2036_v49  ;;  %vm2054_vm14 = vweird.f32 %v2618_v50  ;;  %v2529_v49 = vld [vmem:[%s2836_s17 + $0x1] ss:$0 sm:$0xff]  ;;  %s2278_s17 = sshll.u32 %s2846_s2, 4  ;;  %s2279_s17 = int_to_ptr.hbm [resolvable:$true] %s2278_s17 }
0x1c14   :  { %vm2055_vm3 = vmor %vm2053_vm15, %vm2054_vm14  ;;  %s2640_s15 = sshra.s32 %s2279_s17, 4  ;;  %s2641_s15 = int_to_ptr.hbm [resolvable:$true] %s2640_s15 }
0x1c15   :  { %v2049_v52 = vmul.f32 %v2618_v50, %v2048_v51  ;;  %s2642_s16 = scalar_lea.hbm %s2641_s15, 2  ;;  %p2645_p1 = scmp.lt.s32.totalorder %s2641_s15, %s2846_s2 }
0x1c16   :  { %p2643_p0 = scmp.ne.s32.totalorder %s2641_s15, %s2642_s16  ;;  %p2646_p2 = scmp.lt.s32.totalorder %s2644_s20, %s2642_s16 }
0x1c17   :  { %v2050_v53 = vmul.f32 0.5, %v2049_v52  ;;  %v2530_v52 = vld [vmem:[%s2841_s9 + $0x1] ss:$0 sm:$0xff]  ;;  %s2694_s9 = smov [#allocation3]  }
0x1c18   :  { %s2276_s13 = sshll.u32 %s2694_s9, 4  ;;  %p2647_p3 = por %p2646_p2, %p2645_p1  ;;  %s2277_s13 = int_to_ptr.vmem [resolvable:$true] %s2276_s13 }
0x1c19   :  { %v2051_v54 = vsub.f32 1.5, %v2050_v53 }
0x1c1a   :  { %p2648_p4 = pnand %p2647_p3, %p2643_p0 }
0x1c1b   :  { %v2052_v57 = vmul.f32 %v2618_v50, %v2051_v54 }
0x1c1d   :  { %v2056_v55 = vsel %vm2055_vm3, %v2618_v50, %v2052_v57  ;;  %vm2266_vm3 = vcmask 1041409  }
0x1c1e   :  { %v2058_v58 = vmul.f32 %v2056_v55, %v2024_v27 }
0x1c20   :  { %v2063_v60 = vmul.f32 %v2525_v37, %v2058_v58 }
0x1c22   :  { %v2068_v61 = vadd.f32 %v2526_v41, %v2063_v60 }
0x1c24   :  { %2429 = vmatmul.msk.f32.gmra.mxu2 %vm1122_vm0, %v2068_v61 }
0x1c89   :  { %v2095_v3 = vpop.f32.mrf.mxu2 }
0x1c8a   :  { %v2096_v5 = vadd.f32 %v2527_v2, %v2095_v3 }
0x1c8c   :  { %v2101_v56 = vmax.f32 %v2096_v5, 0.0 }
0x1c8e   :  { %2430 = vmatmul.msk.f32.vlgmr.msrb.gmra.mxu0 %vm452_vm10, %v2101_v56 }
0x1ca7   :  { %v2098_v4 = vpop.f32.mrf.mxu2 }
0x1ca8   :  { %v2099_v6 = vadd.f32 %v2527_v2, %v2098_v4 }
0x1caa   :  { %v2102_v7 = vmax.f32 %v2099_v6, 0.0 }
0x1cac   :  { %2431 = vmatmul.msk.f32.gmra.mxu0 %vm452_vm10, %v2102_v7  ;;  %vm2193_vm10 = vcmp.lt.f32.partialorder %v2627_v18, -1.0 }
0x1cad   :  { %v2194_v30 = vsel %vm2193_vm10, 0.0, %v2693_v29  ;;  %vm2269_vm10 = vcmask 123904  }
0x1cae   :  { %v2195_v21 = vperm.slane %v2194_v30, 0  ;;  %v2202_v31 = vperm.slane %v2194_v30, 1 }
0x1cb0   :  { %v2493_v32 = vpack.i.bf16 %v2195_v21, %v2202_v31 }
0x1d0b   :  { %v2126_v9 = vpop.f32.mrf.mxu0 }
0x1d0c   :  { %v2132_v10 = vadd.f32 %v2126_v9, %v2067_v44 }
0x1d0e   :  { %v2137_v11 = vadd.f32 %v2528_v8, %v2132_v10 }
0x1d10   :  { %v2139_v12 = vsel %vm1122_vm0, %v2137_v11, 0.0 }
0x1d11   :  { %2140 = vadd.xlane.f32.xlu0 %v2139_v12 }
0x1d25   :  { %2228 = vperm.xlu0 %2491, %v2225_v23  }
0x1d29   :  { %v2129_v14 = vpop.f32.mrf.mxu0 }
0x1d2a   :  { %v2133_v15 = vadd.f32 %v2129_v14, %v2068_v61 }
0x1d2c   :  { %v2138_v16 = vadd.f32 %v2528_v8, %v2133_v15 }
0x1d2e   :  { %v2142_v63 = vsel %vm1122_vm0, %v2138_v16, 0.0 }
0x1d2f   :  { %2143 = vadd.xlane.f32.xlu1 %v2142_v63 }
0x1d84   :  { %v2141_v17 = vpop.xlane.xlu0 %2140 }
0x1d85   :  { %v2145_v19 = vmul.f32 %v2141_v17, %v3097_v40 }
0x1d87   :  { %v2147_v20 = vsub.f32 %v2137_v11, %v2145_v19 }
0x1d89   :  { %v2149_v22 = vmul.f32 %v2147_v20, %v2147_v20 }
0x1d8b   :  { %v2151_v42 = vsel %vm1122_vm0, %v2149_v22, 0.0 }
0x1d8c   :  { %2152 = vadd.xlane.f32.xlu1 %v2151_v42 }
0x1d97   :  { %v2229_v54 = vpop.permute.xlu0 %2228 }
0x1d98   :  { %v2230_v58 = vrot.slane %v2229_v54, 1  ;;  %vm2238_vm9 = vweird.f32 %v2229_v54  ;;  %v2244_v25 = vand.u32 2147483648, %v2229_v54 }
0x1d9a   :  { %vm2253_vm2 = vweird.f32 %v2230_v58  ;;  %v2257_v18 = vand.u32 2147483647, %v2230_v58  ;;  %v2245_v31 = vor.u32 1.1754944e-38, %v2244_v25 }
0x1d9c   :  { %vm2258_vm15 = vcmp.eq.f32.partialorder %v2257_v18, 8.507059e+37 }
0x1da2   :  { %v2144_v26 = vpop.xlane.xlu1 %2143 }
0x1da3   :  { %v2146_v27 = vmul.f32 %v2144_v26, %v3097_v40  ;;  %v2259_v26 = vand.u32 2147483648, %v2230_v58 }
0x1da5   :  { %v2148_v13 = vsub.f32 %v2138_v16, %v2146_v27 }
0x1da7   :  { %v2150_v59 = vmul.f32 %v2148_v13, %v2148_v13 }
0x1da9   :  { %v2154_v28 = vsel %vm1122_vm0, %v2150_v59, 0.0  ;;  %v2242_v59 = vand.u32 2147483647, %v2229_v54 }
0x1daa   :  { %2155 = vadd.xlane.f32.xlu2 %v2154_v28 }
0x1dab   :  { %vm2243_vm14 = vcmp.eq.f32.partialorder %v2242_v59, 8.507059e+37 }
0x1dc2   :  { %2494 = vperm.xlu2 %2492, %v2493_v32   ;;  %v2260_v32 = vor.u32 1.1754944e-38, %v2259_v26 }
0x1dff   :  { %v2153_v33 = vpop.xlane.xlu1 %2152 }
0x1e00   :  { %v2157_v34 = vmul.f32 %v2153_v33, %v3097_v40 }
0x1e02   :  { %v2159_v35 = vadd.f32 1e-05, %v2157_v34 }
0x1e04   :  { %2619 = vrsqrt.f32 %v2159_v35  ;;  %vm2167_vm4 = vweird.f32 %v2159_v35 }
0x1e0a   :  { %v2620_v36 = vpop.eup %2619 }
0x1e0b   :  { %v2162_v37 = vmul.f32 %v2620_v36, %v2159_v35  ;;  %vm2168_vm1 = vweird.f32 %v2620_v36 }
0x1e0c   :  { %vm2169_vm5 = vmor %vm2167_vm4, %vm2168_vm1 }
0x1e0d   :  { %v2163_v38 = vmul.f32 %v2620_v36, %v2162_v37 }
0x1e0f   :  { %v2164_v39 = vmul.f32 0.5, %v2163_v38 }
0x1e11   :  { %v2165_v41 = vsub.f32 1.5, %v2164_v39 }
0x1e13   :  { %v2166_v43 = vmul.f32 %v2620_v36, %v2165_v41 }
0x1e15   :  { %v2170_v47 = vsel %vm2169_vm5, %v2620_v36, %v2166_v43 }
0x1e16   :  { %v2181_v50 = vmul.f32 %v2170_v47, %v2147_v20 }
0x1e18   :  { %v2186_v53 = vmul.f32 %v2529_v49, %v2181_v50 }
0x1e1a   :  { %v2191_v61 = vadd.f32 %v2530_v52, %v2186_v53 }
0x1e1d   :  { %v2156_v44 = vpop.xlane.xlu2 %2155 }
0x1e1e   :  { %v2158_v46 = vmul.f32 %v2156_v44, %v3097_v40 }
0x1e20   :  { %v2160_v48 = vadd.f32 1e-05, %v2158_v46 }
0x1e22   :  { %2621 = vrsqrt.f32 %v2160_v48  ;;  %vm2177_vm7 = vweird.f32 %v2160_v48 }
0x1e23   :  { %2623 = vrcp.f32 %v2229_v54 }
0x1e24   :  { %2625 = vrcp.f32 %v2230_v58 }
0x1e25   :  { %v2495_v51 = vpop.permute.xlu2 %2494 }
0x1e26   :  { %v2497_v55 = vunpack.i.h.bf16 %v2495_v51  ;;  %v2496_v11 = vunpack.i.l.bf16 %v2495_v51 }
0x1e28   :  { %v2622_v57 = vpop.eup %2621  ;;  %v2209_v0 = vmul.f32 %v2497_v55, %v2191_v61 }
0x1e29   :  { %v2172_v60 = vmul.f32 %v2622_v57, %v2160_v48  ;;  %vm2178_vm6 = vweird.f32 %v2622_v57  ;;  %v2624_v3 = vpop.eup %2623 }
0x1e2a   :  { %v2211_v2 = vsel %vm1122_vm0, %v2209_v0, 0.0  ;;  %v2626_v56 = vpop.eup %2625  ;;  %vm2179_vm8 = vmor %vm2177_vm7, %vm2178_vm6  ;;  %v2234_v8 = vmul.f32 %v2624_v3, %v2229_v54  ;;  %vm2239_vm11 = vweird.f32 %v2624_v3 }
0x1e2b   :  { %v2173_v62 = vmul.f32 %v2622_v57, %v2172_v60  ;;  %v2212_v6 = vrot.slane %v2211_v2, 4  ;;  %v2249_v9 = vmul.f32 %v2626_v56, %v2230_v58  ;;  %vm2254_vm12 = vweird.f32 %v2626_v56  ;;  %vm3223_vm13 = vmor %vm2238_vm9, %vm2239_vm11 }
0x1e2c   :  { %v2235_v15 = vsub.f32 1.0, %v2234_v8 }
0x1e2d   :  { %v2174_v1 = vmul.f32 0.5, %v2173_v62  ;;  %v2213_v12 = vadd.f32 %v2212_v6, %v2211_v2  ;;  %v2250_v16 = vsub.f32 1.0, %v2249_v9 }
0x1e2e   :  { %v2236_v20 = vmul.f32 %v2624_v3, %v2235_v15 }
0x1e2f   :  { %v2175_v40 = vsub.f32 1.5, %v2174_v1  ;;  %v2214_v17 = vrot.slane %v2213_v12, 2  ;;  %v2251_v23 = vmul.f32 %v2626_v56, %v2250_v16 }
0x1e30   :  { %v2237_v45 = vadd.f32 %v2624_v3, %v2236_v20 }
0x1e31   :  { %v2176_v5 = vmul.f32 %v2622_v57, %v2175_v40  ;;  %v2215_v24 = vadd.f32 %v2214_v17, %v2213_v12  ;;  %v2252_v28 = vadd.f32 %v2626_v56, %v2251_v23 }
0x1e32   :  { %v2241_v21 = vsel %vm3223_vm13, %v2624_v3, %v2237_v45 }
0x1e33   :  { %v2180_v4 = vsel %vm2179_vm8, %v2622_v57, %v2176_v5  ;;  %v2216_v29 = vrot.slane %v2215_v24, 1  ;;  %v2246_v37 = vsel %vm2243_vm14, %v2245_v31, %v2241_v21 }
0x1e34   :  { %v2182_v7 = vmul.f32 %v2180_v4, %v2148_v13 }
0x1e35   :  { %v2217_v35 = vadd.f32 %v2216_v29, %v2215_v24 }
0x1e36   :  { %v2187_v10 = vmul.f32 %v2529_v49, %v2182_v7 }
0x1e37   :  { %v2247_v41 = vmul.f32 %v2246_v37, %v2217_v35 }
0x1e38   :  { %v2192_v14 = vadd.f32 %v2530_v52, %v2187_v10 }
0x1e3a   :  { %v2210_v63 = vmul.f32 %v2496_v11, %v2192_v14 }
0x1e3c   :  { %v2218_v19 = vsel %vm1122_vm0, %v2210_v63, 0.0  ;;  %vm2255_vm0 = vmor %vm2253_vm2, %vm2254_vm12 }
0x1e3d   :  { %v2219_v22 = vrot.slane %v2218_v19, 4  ;;  %v2256_v34 = vsel %vm2255_vm0, %v2626_v56, %v2252_v28 }
0x1e3e   :  { %v2261_v38 = vsel %vm2258_vm15, %v2260_v32, %v2256_v34 }
0x1e3f   :  { %v2220_v42 = vadd.f32 %v2219_v22, %v2218_v19 }
0x1e41   :  { %v2221_v27 = vrot.slane %v2220_v42, 2 }
0x1e43   :  { %v2222_v30 = vadd.f32 %v2221_v27, %v2220_v42 }
0x1e45   :  { %v2223_v33 = vrot.slane %v2222_v30, 1 }
0x1e47   :  { %v2224_v36 = vadd.f32 %v2223_v33, %v2222_v30 }
0x1e49   :  { %v2262_v39 = vmul.f32 %v2261_v38, %v2224_v36 }
0x1e4b   :  { %v2265_v43 = vrot.slane %v2262_v39, 7 }
0x1e4d   :  { %v2267_v44 = vsel %vm2266_vm3, %v2265_v43, %v2247_v41 }
0x1e4e   :  { %2270 = vst.msk [vmem:[#allocation3] sm:$0x3] %vm2269_vm10, %v2267_v44 }
0x1e4f   :  { %2651 = shalt.err (!%p2648_p4)
}
0x1e50   :  { %2281 = dma.vmem_to_hbm [thread:$0]  %s2277_s13, 32, %s2279_s17, [#allocation4]  }
0x1e51   :  { %2652 = dma.done.wait [#allocation4], 32  }
0x1e52   :  { %2653 = vsyncadd [#allocation4], 4294967264 }
0x1e53   :  { %2286 = vsyncpa [#allocation4], 1 }

</bundles_post_ra>
